<compile_context>
chip_gen: v6e
topology: v6e:2x2x1
jax: 0.10.0
libtpu: 0.0.40
codegen_flags: <defaults>
</compile_context>

<pallas_src>
import functools

import jax
import jax.numpy as jnp
from jax import lax
from jax.experimental import pallas as pl
from jax.experimental.pallas import tpu as pltpu

BN_EPS = 1e-5


# ----------------------------------------------------------------------------
# Fused kernel: ReLU -> dilated depthwise conv -> 1x1 pointwise conv -> BN.
# Single invocation; whole (tiny) problem resident in VMEM/SMEM.
# ----------------------------------------------------------------------------
def _dil_conv_s_kernel(x_ref, wdw_ref, wpw_ref, gamma_ref, beta_ref,
                       o_ref, xp_ref, *,
                       k, dilation, padding, h, w, c_in, c_out, pad0, eps):
    # x_ref    : (N, C_in, H*W)    VMEM, lane-dense flattened NCHW input
    # wdw_ref  : (C_in*k*k,)       SMEM depthwise weights (scalars)
    # wpw_ref  : (C_out*C_in,)     SMEM pointwise weights (scalars)
    # gamma_ref: (C_out,)          SMEM
    # beta_ref : (C_out,)          SMEM
    # o_ref    : (N, C_out, H*W)   VMEM, lane-dense output
    # xp_ref   : (N, C_in, WTOT)   VMEM scratch: ReLU(x) at lane offset pad0,
    #                              zeros elsewhere (acts as spatial zero pad).
    n = x_ref.shape[0]
    hw = h * w

    # --- ReLU + zero padding: one zero fill + one lane-aligned slab store ---
    xp_ref[...] = jnp.zeros_like(xp_ref)
    xp_ref[:, :, pad0:pad0 + hw] = jnp.maximum(x_ref[...], 0.0)

    # --- Column-validity masks (horizontal taps wrap across rows in the
    #     flattened layout; vertical out-of-range taps hit the zero pad and
    #     need no mask).  One (1, HW) f32 mask per kw offset, b == 0 is trivial.
    col = lax.broadcasted_iota(jnp.int32, (1, hw), 1) % w
    col_masks = []
    for kw in range(k):
        b = kw * dilation - padding
        ok = jnp.logical_and(col + b >= 0, col + b <= w - 1)
        col_masks.append(ok.astype(jnp.float32))

    # --- Dilated depthwise conv: constant lane-shifted slices of the padded
    #     slab + per-channel SMEM-scalar FMAs on dense (N, HW) vregs (VPU). ---
    dw = []
    for c in range(c_in):
        acc = None
        for kw in range(k):
            b = kw * dilation - padding
            acc_b = None
            for kh in range(k):
                a = kh * dilation - padding
                off = pad0 + a * w + b                      # static lane shift
                src = xp_ref[:, c, pl.ds(off, hw)]          # (N, HW) dense
                term = src * wdw_ref[c * (k * k) + kh * k + kw]
                acc_b = term if acc_b is None else acc_b + term
            if b != 0:
                acc_b = acc_b * col_masks[kw]
            acc = acc_b if acc is None else acc + acc_b
        dw.append(acc)                                      # (N, HW) f32

    # --- Pointwise 1x1 conv (VPU scalar FMAs) + BatchNorm (batch statistics,
    #     biased variance, fp32).  Reductions run over dense 256-lane rows. ---
    inv_cnt = 1.0 / float(n * hw)
    for co in range(c_out):
        y = dw[0] * wpw_ref[co * c_in]
        for ci in range(1, c_in):
            y = y + dw[ci] * wpw_ref[co * c_in + ci]        # (N, HW) dense

        s = jnp.sum(y, axis=1, keepdims=True)               # (N, 1)
        s = jnp.sum(s, axis=0, keepdims=True)               # (1, 1)
        mean = s * inv_cnt
        d = y - mean
        s2 = jnp.sum(d * d, axis=1, keepdims=True)
        s2 = jnp.sum(s2, axis=0, keepdims=True)
        var = s2 * inv_cnt                                   # (1, 1)

        scale = gamma_ref[co] * lax.rsqrt(var + eps)
        o_ref[:, co, :] = d * scale + beta_ref[co]           # full-lane store


# ----------------------------------------------------------------------------
# Wrapper (NCHW in, NCHW out; only free trailing-dim reshapes outside kernel).
# ----------------------------------------------------------------------------
def dil_conv_s(x_nchw, w_dw, w_pw, gamma, beta, *,
               kernel_size, stride, padding, dilation):
    """x_nchw: (N, C_in, H, W). w_dw: (C_in, 1, k, k). w_pw: (C_out, C_in, 1, 1)."""
    n, c_in, h, w = x_nchw.shape
    c_out = w_pw.shape[0]
    k = kernel_size

    if stride != 1:
        # TODO(synk): stride > 1 breaks the constant-lane-shift tap trick.
        raise NotImplementedError("fused DilConvS kernel supports stride == 1")
    h_out = (h + 2 * padding - dilation * (k - 1) - 1) // stride + 1
    w_out = (w + 2 * padding - dilation * (k - 1) - 1) // stride + 1
    if h_out != h or w_out != w:
        # TODO(synk): non-'same' configurations need a different tap layout.
        raise NotImplementedError("fused DilConvS kernel assumes 'same' output size")

    hw = h * w
    # Lane pad on each side must cover the largest tap shift p*(W+1); round up
    # to a multiple of 128 so the ReLU slab store is lane-tile aligned.
    side = max(padding * (w + 1), 1)
    pad0 = max(128, ((side + 127) // 128) * 128)
    wtot = pad0 + hw + pad0

    x_flat = x_nchw.reshape(n, c_in, hw).astype(jnp.float32)      # free reshape
    wdw_flat = w_dw.reshape(c_in * k * k).astype(jnp.float32)     # [c, 0, kh, kw]
    wpw_flat = w_pw.reshape(c_out * c_in).astype(jnp.float32)     # [co, ci, 0, 0]

    kernel = functools.partial(
        _dil_conv_s_kernel, k=k, dilation=dilation, padding=padding,
        h=h, w=w, c_in=c_in, c_out=c_out, pad0=pad0, eps=BN_EPS)

    out_flat = pl.pallas_call(
        kernel,
        out_shape=jax.ShapeDtypeStruct((n, c_out, hw), jnp.float32),
        in_specs=[
            pl.BlockSpec(memory_space=pltpu.MemorySpace.VMEM),   # x (flattened)
            pl.BlockSpec(memory_space=pltpu.MemorySpace.SMEM),   # depthwise w
            pl.BlockSpec(memory_space=pltpu.MemorySpace.SMEM),   # pointwise w
            pl.BlockSpec(memory_space=pltpu.MemorySpace.SMEM),   # gamma
            pl.BlockSpec(memory_space=pltpu.MemorySpace.SMEM),   # beta
        ],
        out_specs=pl.BlockSpec(memory_space=pltpu.MemorySpace.VMEM),
        scratch_shapes=[pltpu.VMEM((n, c_in, wtot), jnp.float32)],
    )(x_flat, wdw_flat, wpw_flat,
      gamma.astype(jnp.float32), beta.astype(jnp.float32))

    return out_flat.reshape(n, c_out, h_out, w_out)               # free reshape


# ----------------------------------------------------------------------------
# Pure-JAX reference (correctness sanity check).
# ----------------------------------------------------------------------------
def _reference(x_nchw, w_dw, w_pw, gamma, beta, *,
               kernel_size, stride, padding, dilation):
    c_in = x_nchw.shape[1]
    xr = jnp.maximum(x_nchw, 0.0)
    dw = lax.conv_general_dilated(
        xr, w_dw, window_strides=(stride, stride),
        padding=[(padding, padding), (padding, padding)],
        rhs_dilation=(dilation, dilation),
        dimension_numbers=("NCHW", "OIHW", "NCHW"),
        feature_group_count=c_in)
    pw = lax.conv_general_dilated(
        dw, w_pw, window_strides=(1, 1), padding=[(0, 0), (0, 0)],
        dimension_numbers=("NCHW", "OIHW", "NCHW"))
    mean = jnp.mean(pw, axis=(0, 2, 3), keepdims=True)
    var = jnp.mean((pw - mean) ** 2, axis=(0, 2, 3), keepdims=True)
    g = gamma.reshape(1, -1, 1, 1)
    b = beta.reshape(1, -1, 1, 1)
    return (pw - mean) * g * lax.rsqrt(var + BN_EPS) + b


if __name__ == "__main__":
    # DilConvS(C_in=4, C_out=8, kernel_size=3, stride=1, padding=2, dilation=2)
    N, C_IN, C_OUT, H, W = 2, 4, 8, 16, 16
    K, STRIDE, PAD, DIL = 3, 1, 2, 2

    key = jax.random.PRNGKey(0)
    k_x, k_dw, k_pw = jax.random.split(key, 3)

    x = jax.random.normal(k_x, (N, C_IN, H, W), dtype=jnp.float32)
    w_dw = jax.random.normal(k_dw, (C_IN, 1, K, K), dtype=jnp.float32) * 0.2
    w_pw = jax.random.normal(k_pw, (C_OUT, C_IN, 1, 1), dtype=jnp.float32) * 0.2
    gamma = jnp.ones((C_OUT,), dtype=jnp.float32)   # BN affine init (weight=1)
    beta = jnp.zeros((C_OUT,), dtype=jnp.float32)   # BN affine init (bias=0)

    fused = jax.jit(functools.partial(
        dil_conv_s, kernel_size=K, stride=STRIDE, padding=PAD, dilation=DIL))
    out = jax.block_until_ready(fused(x, w_dw, w_pw, gamma, beta))

    ref = _reference(x, w_dw, w_pw, gamma, beta,
                     kernel_size=K, stride=STRIDE, padding=PAD, dilation=DIL)
    assert out.shape == (N, C_OUT, H, W)
    assert jnp.allclose(out, ref, rtol=1e-4, atol=1e-4), \
        float(jnp.max(jnp.abs(out - ref)))

    print("KERNEL_OK")
</pallas_src>

<mosaic_0001>
module attributes {stable_mosaic.version = 11 : i64} {
  func.func @_dil_conv_s_kernel(%arg0: memref<2x4x256xf32, #tpu.memory_space<vmem>>, %arg1: memref<36xf32, #tpu.memory_space<smem>>, %arg2: memref<32xf32, #tpu.memory_space<smem>>, %arg3: memref<8xf32, #tpu.memory_space<smem>>, %arg4: memref<8xf32, #tpu.memory_space<smem>>, %arg5: memref<2x8x256xf32, #tpu.memory_space<vmem>>, %arg6: memref<2x4x512xf32, #tpu.memory_space<vmem>>) attributes {dimension_semantics = [], scalar_prefetch = 0 : i64, scratch_operands = 1 : i64, tpu.core_type = #tpu.core_type<tc>} {
    %cst = arith.constant 0.000000e+00 : f32
    %0 = vector.broadcast %cst : f32 to vector<2x4x512xf32>
    %c0 = arith.constant 0 : index
    %c0_0 = arith.constant 0 : index
    %c0_1 = arith.constant 0 : index
    %1 = vector.load %arg6[%c0, %c0_0, %c0_1] : memref<2x4x512xf32, #tpu.memory_space<vmem>>, vector<2x4x512xf32>
    tpu.vector_store %arg6[%c0, %c0_0, %c0_1], %0 {strides = array<i32>} : memref<2x4x512xf32, #tpu.memory_space<vmem>>, vector<2x4x512xf32>,
    %c0_2 = arith.constant 0 : index
    %c0_3 = arith.constant 0 : index
    %c0_4 = arith.constant 0 : index
    %2 = vector.load %arg0[%c0_2, %c0_3, %c0_4] : memref<2x4x256xf32, #tpu.memory_space<vmem>>, vector<2x4x256xf32>
    %cst_5 = arith.constant 0.000000e+00 : f32
    %3 = vector.broadcast %cst_5 : f32 to vector<2x4x256xf32>
    %4 = arith.maximumf %2, %3 : vector<2x4x256xf32>
    %c0_6 = arith.constant 0 : index
    %c0_7 = arith.constant 0 : index
    %c128 = arith.constant 128 : index
    %5 = vector.load %arg6[%c0_6, %c0_7, %c128] : memref<2x4x512xf32, #tpu.memory_space<vmem>>, vector<2x4x256xf32>
    tpu.vector_store %arg6[%c0_6, %c0_7, %c128], %4 {strides = array<i32>} : memref<2x4x512xf32, #tpu.memory_space<vmem>>, vector<2x4x256xf32>,
    %6 = tpu.iota {dimensions = array<i32: 1>} : vector<1x256xi32>
    %c16_i32 = arith.constant 16 : i32
    %c0_i32 = arith.constant 0 : i32
    %7 = arith.cmpi eq, %c16_i32, %c0_i32 : i32
    %c1_i32 = arith.constant 1 : i32
    %8 = arith.select %7, %c1_i32, %c16_i32 : i32
    %9 = vector.broadcast %8 : i32 to vector<1x256xi32>
    %10 = arith.remsi %6, %9 : vector<1x256xi32>
    %c0_i32_8 = arith.constant 0 : i32
    %11 = vector.broadcast %c0_i32_8 : i32 to vector<1x256xi32>
    %12 = arith.cmpi ne, %10, %11 : vector<1x256xi32>
    %c0_i32_9 = arith.constant 0 : i32
    %13 = vector.broadcast %c0_i32_9 : i32 to vector<1x256xi32>
    %14 = arith.cmpi slt, %10, %13 : vector<1x256xi32>
    %c0_i32_10 = arith.constant 0 : i32
    %15 = arith.cmpi slt, %8, %c0_i32_10 : i32
    %16 = vector.broadcast %15 : i1 to vector<1x256xi1>
    %17 = vector.broadcast %16 : vector<1x256xi1> to vector<1x256xi1>
    %18 = arith.xori %14, %17 : vector<1x256xi1>
    %19 = arith.andi %18, %12 : vector<1x256xi1>
    %20 = vector.broadcast %8 : i32 to vector<1x256xi32>
    %21 = arith.addi %10, %20 : vector<1x256xi32>
    %22 = arith.select %19, %21, %10 : vector<1x256xi1>, vector<1x256xi32>
    %c-2_i32 = arith.constant -2 : i32
    %23 = vector.broadcast %c-2_i32 : i32 to vector<1x256xi32>
    %24 = arith.addi %22, %23 : vector<1x256xi32>
    %c0_i32_11 = arith.constant 0 : i32
    %25 = vector.broadcast %c0_i32_11 : i32 to vector<1x256xi32>
    %26 = arith.cmpi sge, %24, %25 : vector<1x256xi32>
    %c-2_i32_12 = arith.constant -2 : i32
    %27 = vector.broadcast %c-2_i32_12 : i32 to vector<1x256xi32>
    %28 = arith.addi %22, %27 : vector<1x256xi32>
    %c15_i32 = arith.constant 15 : i32
    %29 = vector.broadcast %c15_i32 : i32 to vector<1x256xi32>
    %30 = arith.cmpi sle, %28, %29 : vector<1x256xi32>
    %31 = arith.andi %26, %30 : vector<1x256xi1>
    %32 = arith.extui %31 : vector<1x256xi1> to vector<1x256xi32>
    %33 = arith.sitofp %32 : vector<1x256xi32> to vector<1x256xf32>
    %c2_i32 = arith.constant 2 : i32
    %34 = vector.broadcast %c2_i32 : i32 to vector<1x256xi32>
    %35 = arith.addi %22, %34 : vector<1x256xi32>
    %c0_i32_13 = arith.constant 0 : i32
    %36 = vector.broadcast %c0_i32_13 : i32 to vector<1x256xi32>
    %37 = arith.cmpi sge, %35, %36 : vector<1x256xi32>
    %c2_i32_14 = arith.constant 2 : i32
    %38 = vector.broadcast %c2_i32_14 : i32 to vector<1x256xi32>
    %39 = arith.addi %22, %38 : vector<1x256xi32>
    %c15_i32_15 = arith.constant 15 : i32
    %40 = vector.broadcast %c15_i32_15 : i32 to vector<1x256xi32>
    %41 = arith.cmpi sle, %39, %40 : vector<1x256xi32>
    %42 = arith.andi %37, %41 : vector<1x256xi1>
    %43 = arith.extui %42 : vector<1x256xi1> to vector<1x256xi32>
    %44 = arith.sitofp %43 : vector<1x256xi32> to vector<1x256xf32>
    %c0_16 = arith.constant 0 : index
    %c0_17 = arith.constant 0 : index
    %c94 = arith.constant 94 : index
    %45 = vector.load %arg6[%c0_16, %c0_17, %c94] : memref<2x4x512xf32, #tpu.memory_space<vmem>>, vector<2x1x256xf32>
    %46 = vector.shape_cast %45 : vector<2x1x256xf32> to vector<2x256xf32>
    %c0_18 = arith.constant 0 : index
    %47 = memref.load %arg1[%c0_18] : memref<36xf32, #tpu.memory_space<smem>>
    %48 = vector.broadcast %47 : f32 to vector<2x256xf32>
    %49 = arith.mulf %46, %48 : vector<2x256xf32>
    %c0_19 = arith.constant 0 : index
    %c0_20 = arith.constant 0 : index
    %c126 = arith.constant 126 : index
    %50 = vector.load %arg6[%c0_19, %c0_20, %c126] : memref<2x4x512xf32, #tpu.memory_space<vmem>>, vector<2x1x256xf32>
    %51 = vector.shape_cast %50 : vector<2x1x256xf32> to vector<2x256xf32>
    %c3 = arith.constant 3 : index
    %52 = memref.load %arg1[%c3] : memref<36xf32, #tpu.memory_space<smem>>
    %53 = vector.broadcast %52 : f32 to vector<2x256xf32>
    %54 = arith.mulf %51, %53 : vector<2x256xf32>
    %55 = arith.addf %49, %54 : vector<2x256xf32>
    %c0_21 = arith.constant 0 : index
    %c0_22 = arith.constant 0 : index
    %c158 = arith.constant 158 : index
    %56 = vector.load %arg6[%c0_21, %c0_22, %c158] : memref<2x4x512xf32, #tpu.memory_space<vmem>>, vector<2x1x256xf32>
    %57 = vector.shape_cast %56 : vector<2x1x256xf32> to vector<2x256xf32>
    %c6 = arith.constant 6 : index
    %58 = memref.load %arg1[%c6] : memref<36xf32, #tpu.memory_space<smem>>
    %59 = vector.broadcast %58 : f32 to vector<2x256xf32>
    %60 = arith.mulf %57, %59 : vector<2x256xf32>
    %61 = arith.addf %55, %60 : vector<2x256xf32>
    %62 = vector.broadcast %33 : vector<1x256xf32> to vector<2x256xf32>
    %63 = arith.mulf %61, %62 : vector<2x256xf32>
    %c0_23 = arith.constant 0 : index
    %c0_24 = arith.constant 0 : index
    %c96 = arith.constant 96 : index
    %64 = vector.load %arg6[%c0_23, %c0_24, %c96] : memref<2x4x512xf32, #tpu.memory_space<vmem>>, vector<2x1x256xf32>
    %65 = vector.shape_cast %64 : vector<2x1x256xf32> to vector<2x256xf32>
    %c1 = arith.constant 1 : index
    %66 = memref.load %arg1[%c1] : memref<36xf32, #tpu.memory_space<smem>>
    %67 = vector.broadcast %66 : f32 to vector<2x256xf32>
    %68 = arith.mulf %65, %67 : vector<2x256xf32>
    %c0_25 = arith.constant 0 : index
    %c0_26 = arith.constant 0 : index
    %c128_27 = arith.constant 128 : index
    %69 = vector.load %arg6[%c0_25, %c0_26, %c128_27] : memref<2x4x512xf32, #tpu.memory_space<vmem>>, vector<2x1x256xf32>
    %70 = vector.shape_cast %69 : vector<2x1x256xf32> to vector<2x256xf32>
    %c4 = arith.constant 4 : index
    %71 = memref.load %arg1[%c4] : memref<36xf32, #tpu.memory_space<smem>>
    %72 = vector.broadcast %71 : f32 to vector<2x256xf32>
    %73 = arith.mulf %70, %72 : vector<2x256xf32>
    %74 = arith.addf %68, %73 : vector<2x256xf32>
    %c0_28 = arith.constant 0 : index
    %c0_29 = arith.constant 0 : index
    %c160 = arith.constant 160 : index
    %75 = vector.load %arg6[%c0_28, %c0_29, %c160] : memref<2x4x512xf32, #tpu.memory_space<vmem>>, vector<2x1x256xf32>
    %76 = vector.shape_cast %75 : vector<2x1x256xf32> to vector<2x256xf32>
    %c7 = arith.constant 7 : index
    %77 = memref.load %arg1[%c7] : memref<36xf32, #tpu.memory_space<smem>>
    %78 = vector.broadcast %77 : f32 to vector<2x256xf32>
    %79 = arith.mulf %76, %78 : vector<2x256xf32>
    %80 = arith.addf %74, %79 : vector<2x256xf32>
    %81 = arith.addf %63, %80 : vector<2x256xf32>
    %c0_30 = arith.constant 0 : index
    %c0_31 = arith.constant 0 : index
    %c98 = arith.constant 98 : index
    %82 = vector.load %arg6[%c0_30, %c0_31, %c98] : memref<2x4x512xf32, #tpu.memory_space<vmem>>, vector<2x1x256xf32>
    %83 = vector.shape_cast %82 : vector<2x1x256xf32> to vector<2x256xf32>
    %c2 = arith.constant 2 : index
    %84 = memref.load %arg1[%c2] : memref<36xf32, #tpu.memory_space<smem>>
    %85 = vector.broadcast %84 : f32 to vector<2x256xf32>
    %86 = arith.mulf %83, %85 : vector<2x256xf32>
    %c0_32 = arith.constant 0 : index
    %c0_33 = arith.constant 0 : index
    %c130 = arith.constant 130 : index
    %87 = vector.load %arg6[%c0_32, %c0_33, %c130] : memref<2x4x512xf32, #tpu.memory_space<vmem>>, vector<2x1x256xf32>
    %88 = vector.shape_cast %87 : vector<2x1x256xf32> to vector<2x256xf32>
    %c5 = arith.constant 5 : index
    %89 = memref.load %arg1[%c5] : memref<36xf32, #tpu.memory_space<smem>>
    %90 = vector.broadcast %89 : f32 to vector<2x256xf32>
    %91 = arith.mulf %88, %90 : vector<2x256xf32>
    %92 = arith.addf %86, %91 : vector<2x256xf32>
    %c0_34 = arith.constant 0 : index
    %c0_35 = arith.constant 0 : index
    %c162 = arith.constant 162 : index
    %93 = vector.load %arg6[%c0_34, %c0_35, %c162] : memref<2x4x512xf32, #tpu.memory_space<vmem>>, vector<2x1x256xf32>
    %94 = vector.shape_cast %93 : vector<2x1x256xf32> to vector<2x256xf32>
    %c8 = arith.constant 8 : index
    %95 = memref.load %arg1[%c8] : memref<36xf32, #tpu.memory_space<smem>>
    %96 = vector.broadcast %95 : f32 to vector<2x256xf32>
    %97 = arith.mulf %94, %96 : vector<2x256xf32>
    %98 = arith.addf %92, %97 : vector<2x256xf32>
    %99 = vector.broadcast %44 : vector<1x256xf32> to vector<2x256xf32>
    %100 = arith.mulf %98, %99 : vector<2x256xf32>
    %101 = arith.addf %81, %100 : vector<2x256xf32>
    %c0_36 = arith.constant 0 : index
    %c1_37 = arith.constant 1 : index
    %c94_38 = arith.constant 94 : index
    %102 = vector.load %arg6[%c0_36, %c1_37, %c94_38] : memref<2x4x512xf32, #tpu.memory_space<vmem>>, vector<2x1x256xf32>
    %103 = vector.shape_cast %102 : vector<2x1x256xf32> to vector<2x256xf32>
    %c9 = arith.constant 9 : index
    %104 = memref.load %arg1[%c9] : memref<36xf32, #tpu.memory_space<smem>>
    %105 = vector.broadcast %104 : f32 to vector<2x256xf32>
    %106 = arith.mulf %103, %105 : vector<2x256xf32>
    %c0_39 = arith.constant 0 : index
    %c1_40 = arith.constant 1 : index
    %c126_41 = arith.constant 126 : index
    %107 = vector.load %arg6[%c0_39, %c1_40, %c126_41] : memref<2x4x512xf32, #tpu.memory_space<vmem>>, vector<2x1x256xf32>
    %108 = vector.shape_cast %107 : vector<2x1x256xf32> to vector<2x256xf32>
    %c12 = arith.constant 12 : index
    %109 = memref.load %arg1[%c12] : memref<36xf32, #tpu.memory_space<smem>>
    %110 = vector.broadcast %109 : f32 to vector<2x256xf32>
    %111 = arith.mulf %108, %110 : vector<2x256xf32>
    %112 = arith.addf %106, %111 : vector<2x256xf32>
    %c0_42 = arith.constant 0 : index
    %c1_43 = arith.constant 1 : index
    %c158_44 = arith.constant 158 : index
    %113 = vector.load %arg6[%c0_42, %c1_43, %c158_44] : memref<2x4x512xf32, #tpu.memory_space<vmem>>, vector<2x1x256xf32>
    %114 = vector.shape_cast %113 : vector<2x1x256xf32> to vector<2x256xf32>
    %c15 = arith.constant 15 : index
    %115 = memref.load %arg1[%c15] : memref<36xf32, #tpu.memory_space<smem>>
    %116 = vector.broadcast %115 : f32 to vector<2x256xf32>
    %117 = arith.mulf %114, %116 : vector<2x256xf32>
    %118 = arith.addf %112, %117 : vector<2x256xf32>
    %119 = vector.broadcast %33 : vector<1x256xf32> to vector<2x256xf32>
    %120 = arith.mulf %118, %119 : vector<2x256xf32>
    %c0_45 = arith.constant 0 : index
    %c1_46 = arith.constant 1 : index
    %c96_47 = arith.constant 96 : index
    %121 = vector.load %arg6[%c0_45, %c1_46, %c96_47] : memref<2x4x512xf32, #tpu.memory_space<vmem>>, vector<2x1x256xf32>
    %122 = vector.shape_cast %121 : vector<2x1x256xf32> to vector<2x256xf32>
    %c10 = arith.constant 10 : index
    %123 = memref.load %arg1[%c10] : memref<36xf32, #tpu.memory_space<smem>>
    %124 = vector.broadcast %123 : f32 to vector<2x256xf32>
    %125 = arith.mulf %122, %124 : vector<2x256xf32>
    %c0_48 = arith.constant 0 : index
    %c1_49 = arith.constant 1 : index
    %c128_50 = arith.constant 128 : index
    %126 = vector.load %arg6[%c0_48, %c1_49, %c128_50] : memref<2x4x512xf32, #tpu.memory_space<vmem>>, vector<2x1x256xf32>
    %127 = vector.shape_cast %126 : vector<2x1x256xf32> to vector<2x256xf32>
    %c13 = arith.constant 13 : index
    %128 = memref.load %arg1[%c13] : memref<36xf32, #tpu.memory_space<smem>>
    %129 = vector.broadcast %128 : f32 to vector<2x256xf32>
    %130 = arith.mulf %127, %129 : vector<2x256xf32>
    %131 = arith.addf %125, %130 : vector<2x256xf32>
    %c0_51 = arith.constant 0 : index
    %c1_52 = arith.constant 1 : index
    %c160_53 = arith.constant 160 : index
    %132 = vector.load %arg6[%c0_51, %c1_52, %c160_53] : memref<2x4x512xf32, #tpu.memory_space<vmem>>, vector<2x1x256xf32>
    %133 = vector.shape_cast %132 : vector<2x1x256xf32> to vector<2x256xf32>
    %c16 = arith.constant 16 : index
    %134 = memref.load %arg1[%c16] : memref<36xf32, #tpu.memory_space<smem>>
    %135 = vector.broadcast %134 : f32 to vector<2x256xf32>
    %136 = arith.mulf %133, %135 : vector<2x256xf32>
    %137 = arith.addf %131, %136 : vector<2x256xf32>
    %138 = arith.addf %120, %137 : vector<2x256xf32>
    %c0_54 = arith.constant 0 : index
    %c1_55 = arith.constant 1 : index
    %c98_56 = arith.constant 98 : index
    %139 = vector.load %arg6[%c0_54, %c1_55, %c98_56] : memref<2x4x512xf32, #tpu.memory_space<vmem>>, vector<2x1x256xf32>
    %140 = vector.shape_cast %139 : vector<2x1x256xf32> to vector<2x256xf32>
    %c11 = arith.constant 11 : index
    %141 = memref.load %arg1[%c11] : memref<36xf32, #tpu.memory_space<smem>>
    %142 = vector.broadcast %141 : f32 to vector<2x256xf32>
    %143 = arith.mulf %140, %142 : vector<2x256xf32>
    %c0_57 = arith.constant 0 : index
    %c1_58 = arith.constant 1 : index
    %c130_59 = arith.constant 130 : index
    %144 = vector.load %arg6[%c0_57, %c1_58, %c130_59] : memref<2x4x512xf32, #tpu.memory_space<vmem>>, vector<2x1x256xf32>
    %145 = vector.shape_cast %144 : vector<2x1x256xf32> to vector<2x256xf32>
    %c14 = arith.constant 14 : index
    %146 = memref.load %arg1[%c14] : memref<36xf32, #tpu.memory_space<smem>>
    %147 = vector.broadcast %146 : f32 to vector<2x256xf32>
    %148 = arith.mulf %145, %147 : vector<2x256xf32>
    %149 = arith.addf %143, %148 : vector<2x256xf32>
    %c0_60 = arith.constant 0 : index
    %c1_61 = arith.constant 1 : index
    %c162_62 = arith.constant 162 : index
    %150 = vector.load %arg6[%c0_60, %c1_61, %c162_62] : memref<2x4x512xf32, #tpu.memory_space<vmem>>, vector<2x1x256xf32>
    %151 = vector.shape_cast %150 : vector<2x1x256xf32> to vector<2x256xf32>
    %c17 = arith.constant 17 : index
    %152 = memref.load %arg1[%c17] : memref<36xf32, #tpu.memory_space<smem>>
    %153 = vector.broadcast %152 : f32 to vector<2x256xf32>
    %154 = arith.mulf %151, %153 : vector<2x256xf32>
    %155 = arith.addf %149, %154 : vector<2x256xf32>
    %156 = vector.broadcast %44 : vector<1x256xf32> to vector<2x256xf32>
    %157 = arith.mulf %155, %156 : vector<2x256xf32>
    %158 = arith.addf %138, %157 : vector<2x256xf32>
    %c0_63 = arith.constant 0 : index
    %c2_64 = arith.constant 2 : index
    %c94_65 = arith.constant 94 : index
    %159 = vector.load %arg6[%c0_63, %c2_64, %c94_65] : memref<2x4x512xf32, #tpu.memory_space<vmem>>, vector<2x1x256xf32>
    %160 = vector.shape_cast %159 : vector<2x1x256xf32> to vector<2x256xf32>
    %c18 = arith.constant 18 : index
    %161 = memref.load %arg1[%c18] : memref<36xf32, #tpu.memory_space<smem>>
    %162 = vector.broadcast %161 : f32 to vector<2x256xf32>
    %163 = arith.mulf %160, %162 : vector<2x256xf32>
    %c0_66 = arith.constant 0 : index
    %c2_67 = arith.constant 2 : index
    %c126_68 = arith.constant 126 : index
    %164 = vector.load %arg6[%c0_66, %c2_67, %c126_68] : memref<2x4x512xf32, #tpu.memory_space<vmem>>, vector<2x1x256xf32>
    %165 = vector.shape_cast %164 : vector<2x1x256xf32> to vector<2x256xf32>
    %c21 = arith.constant 21 : index
    %166 = memref.load %arg1[%c21] : memref<36xf32, #tpu.memory_space<smem>>
    %167 = vector.broadcast %166 : f32 to vector<2x256xf32>
    %168 = arith.mulf %165, %167 : vector<2x256xf32>
    %169 = arith.addf %163, %168 : vector<2x256xf32>
    %c0_69 = arith.constant 0 : index
    %c2_70 = arith.constant 2 : index
    %c158_71 = arith.constant 158 : index
    %170 = vector.load %arg6[%c0_69, %c2_70, %c158_71] : memref<2x4x512xf32, #tpu.memory_space<vmem>>, vector<2x1x256xf32>
    %171 = vector.shape_cast %170 : vector<2x1x256xf32> to vector<2x256xf32>
    %c24 = arith.constant 24 : index
    %172 = memref.load %arg1[%c24] : memref<36xf32, #tpu.memory_space<smem>>
    %173 = vector.broadcast %172 : f32 to vector<2x256xf32>
    %174 = arith.mulf %171, %173 : vector<2x256xf32>
    %175 = arith.addf %169, %174 : vector<2x256xf32>
    %176 = vector.broadcast %33 : vector<1x256xf32> to vector<2x256xf32>
    %177 = arith.mulf %175, %176 : vector<2x256xf32>
    %c0_72 = arith.constant 0 : index
    %c2_73 = arith.constant 2 : index
    %c96_74 = arith.constant 96 : index
    %178 = vector.load %arg6[%c0_72, %c2_73, %c96_74] : memref<2x4x512xf32, #tpu.memory_space<vmem>>, vector<2x1x256xf32>
    %179 = vector.shape_cast %178 : vector<2x1x256xf32> to vector<2x256xf32>
    %c19 = arith.constant 19 : index
    %180 = memref.load %arg1[%c19] : memref<36xf32, #tpu.memory_space<smem>>
    %181 = vector.broadcast %180 : f32 to vector<2x256xf32>
    %182 = arith.mulf %179, %181 : vector<2x256xf32>
    %c0_75 = arith.constant 0 : index
    %c2_76 = arith.constant 2 : index
    %c128_77 = arith.constant 128 : index
    %183 = vector.load %arg6[%c0_75, %c2_76, %c128_77] : memref<2x4x512xf32, #tpu.memory_space<vmem>>, vector<2x1x256xf32>
    %184 = vector.shape_cast %183 : vector<2x1x256xf32> to vector<2x256xf32>
    %c22 = arith.constant 22 : index
    %185 = memref.load %arg1[%c22] : memref<36xf32, #tpu.memory_space<smem>>
    %186 = vector.broadcast %185 : f32 to vector<2x256xf32>
    %187 = arith.mulf %184, %186 : vector<2x256xf32>
    %188 = arith.addf %182, %187 : vector<2x256xf32>
    %c0_78 = arith.constant 0 : index
    %c2_79 = arith.constant 2 : index
    %c160_80 = arith.constant 160 : index
    %189 = vector.load %arg6[%c0_78, %c2_79, %c160_80] : memref<2x4x512xf32, #tpu.memory_space<vmem>>, vector<2x1x256xf32>
    %190 = vector.shape_cast %189 : vector<2x1x256xf32> to vector<2x256xf32>
    %c25 = arith.constant 25 : index
    %191 = memref.load %arg1[%c25] : memref<36xf32, #tpu.memory_space<smem>>
    %192 = vector.broadcast %191 : f32 to vector<2x256xf32>
    %193 = arith.mulf %190, %192 : vector<2x256xf32>
    %194 = arith.addf %188, %193 : vector<2x256xf32>
    %195 = arith.addf %177, %194 : vector<2x256xf32>
    %c0_81 = arith.constant 0 : index
    %c2_82 = arith.constant 2 : index
    %c98_83 = arith.constant 98 : index
    %196 = vector.load %arg6[%c0_81, %c2_82, %c98_83] : memref<2x4x512xf32, #tpu.memory_space<vmem>>, vector<2x1x256xf32>
    %197 = vector.shape_cast %196 : vector<2x1x256xf32> to vector<2x256xf32>
    %c20 = arith.constant 20 : index
    %198 = memref.load %arg1[%c20] : memref<36xf32, #tpu.memory_space<smem>>
    %199 = vector.broadcast %198 : f32 to vector<2x256xf32>
    %200 = arith.mulf %197, %199 : vector<2x256xf32>
    %c0_84 = arith.constant 0 : index
    %c2_85 = arith.constant 2 : index
    %c130_86 = arith.constant 130 : index
    %201 = vector.load %arg6[%c0_84, %c2_85, %c130_86] : memref<2x4x512xf32, #tpu.memory_space<vmem>>, vector<2x1x256xf32>
    %202 = vector.shape_cast %201 : vector<2x1x256xf32> to vector<2x256xf32>
    %c23 = arith.constant 23 : index
    %203 = memref.load %arg1[%c23] : memref<36xf32, #tpu.memory_space<smem>>
    %204 = vector.broadcast %203 : f32 to vector<2x256xf32>
    %205 = arith.mulf %202, %204 : vector<2x256xf32>
    %206 = arith.addf %200, %205 : vector<2x256xf32>
    %c0_87 = arith.constant 0 : index
    %c2_88 = arith.constant 2 : index
    %c162_89 = arith.constant 162 : index
    %207 = vector.load %arg6[%c0_87, %c2_88, %c162_89] : memref<2x4x512xf32, #tpu.memory_space<vmem>>, vector<2x1x256xf32>
    %208 = vector.shape_cast %207 : vector<2x1x256xf32> to vector<2x256xf32>
    %c26 = arith.constant 26 : index
    %209 = memref.load %arg1[%c26] : memref<36xf32, #tpu.memory_space<smem>>
    %210 = vector.broadcast %209 : f32 to vector<2x256xf32>
    %211 = arith.mulf %208, %210 : vector<2x256xf32>
    %212 = arith.addf %206, %211 : vector<2x256xf32>
    %213 = vector.broadcast %44 : vector<1x256xf32> to vector<2x256xf32>
    %214 = arith.mulf %212, %213 : vector<2x256xf32>
    %215 = arith.addf %195, %214 : vector<2x256xf32>
    %c0_90 = arith.constant 0 : index
    %c3_91 = arith.constant 3 : index
    %c94_92 = arith.constant 94 : index
    %216 = vector.load %arg6[%c0_90, %c3_91, %c94_92] : memref<2x4x512xf32, #tpu.memory_space<vmem>>, vector<2x1x256xf32>
    %217 = vector.shape_cast %216 : vector<2x1x256xf32> to vector<2x256xf32>
    %c27 = arith.constant 27 : index
    %218 = memref.load %arg1[%c27] : memref<36xf32, #tpu.memory_space<smem>>
    %219 = vector.broadcast %218 : f32 to vector<2x256xf32>
    %220 = arith.mulf %217, %219 : vector<2x256xf32>
    %c0_93 = arith.constant 0 : index
    %c3_94 = arith.constant 3 : index
    %c126_95 = arith.constant 126 : index
    %221 = vector.load %arg6[%c0_93, %c3_94, %c126_95] : memref<2x4x512xf32, #tpu.memory_space<vmem>>, vector<2x1x256xf32>
    %222 = vector.shape_cast %221 : vector<2x1x256xf32> to vector<2x256xf32>
    %c30 = arith.constant 30 : index
    %223 = memref.load %arg1[%c30] : memref<36xf32, #tpu.memory_space<smem>>
    %224 = vector.broadcast %223 : f32 to vector<2x256xf32>
    %225 = arith.mulf %222, %224 : vector<2x256xf32>
    %226 = arith.addf %220, %225 : vector<2x256xf32>
    %c0_96 = arith.constant 0 : index
    %c3_97 = arith.constant 3 : index
    %c158_98 = arith.constant 158 : index
    %227 = vector.load %arg6[%c0_96, %c3_97, %c158_98] : memref<2x4x512xf32, #tpu.memory_space<vmem>>, vector<2x1x256xf32>
    %228 = vector.shape_cast %227 : vector<2x1x256xf32> to vector<2x256xf32>
    %c33 = arith.constant 33 : index
    %229 = memref.load %arg1[%c33] : memref<36xf32, #tpu.memory_space<smem>>
    %230 = vector.broadcast %229 : f32 to vector<2x256xf32>
    %231 = arith.mulf %228, %230 : vector<2x256xf32>
    %232 = arith.addf %226, %231 : vector<2x256xf32>
    %233 = vector.broadcast %33 : vector<1x256xf32> to vector<2x256xf32>
    %234 = arith.mulf %232, %233 : vector<2x256xf32>
    %c0_99 = arith.constant 0 : index
    %c3_100 = arith.constant 3 : index
    %c96_101 = arith.constant 96 : index
    %235 = vector.load %arg6[%c0_99, %c3_100, %c96_101] : memref<2x4x512xf32, #tpu.memory_space<vmem>>, vector<2x1x256xf32>
    %236 = vector.shape_cast %235 : vector<2x1x256xf32> to vector<2x256xf32>
    %c28 = arith.constant 28 : index
    %237 = memref.load %arg1[%c28] : memref<36xf32, #tpu.memory_space<smem>>
    %238 = vector.broadcast %237 : f32 to vector<2x256xf32>
    %239 = arith.mulf %236, %238 : vector<2x256xf32>
    %c0_102 = arith.constant 0 : index
    %c3_103 = arith.constant 3 : index
    %c128_104 = arith.constant 128 : index
    %240 = vector.load %arg6[%c0_102, %c3_103, %c128_104] : memref<2x4x512xf32, #tpu.memory_space<vmem>>, vector<2x1x256xf32>
    %241 = vector.shape_cast %240 : vector<2x1x256xf32> to vector<2x256xf32>
    %c31 = arith.constant 31 : index
    %242 = memref.load %arg1[%c31] : memref<36xf32, #tpu.memory_space<smem>>
    %243 = vector.broadcast %242 : f32 to vector<2x256xf32>
    %244 = arith.mulf %241, %243 : vector<2x256xf32>
    %245 = arith.addf %239, %244 : vector<2x256xf32>
    %c0_105 = arith.constant 0 : index
    %c3_106 = arith.constant 3 : index
    %c160_107 = arith.constant 160 : index
    %246 = vector.load %arg6[%c0_105, %c3_106, %c160_107] : memref<2x4x512xf32, #tpu.memory_space<vmem>>, vector<2x1x256xf32>
    %247 = vector.shape_cast %246 : vector<2x1x256xf32> to vector<2x256xf32>
    %c34 = arith.constant 34 : index
    %248 = memref.load %arg1[%c34] : memref<36xf32, #tpu.memory_space<smem>>
    %249 = vector.broadcast %248 : f32 to vector<2x256xf32>
    %250 = arith.mulf %247, %249 : vector<2x256xf32>
    %251 = arith.addf %245, %250 : vector<2x256xf32>
    %252 = arith.addf %234, %251 : vector<2x256xf32>
    %c0_108 = arith.constant 0 : index
    %c3_109 = arith.constant 3 : index
    %c98_110 = arith.constant 98 : index
    %253 = vector.load %arg6[%c0_108, %c3_109, %c98_110] : memref<2x4x512xf32, #tpu.memory_space<vmem>>, vector<2x1x256xf32>
    %254 = vector.shape_cast %253 : vector<2x1x256xf32> to vector<2x256xf32>
    %c29 = arith.constant 29 : index
    %255 = memref.load %arg1[%c29] : memref<36xf32, #tpu.memory_space<smem>>
    %256 = vector.broadcast %255 : f32 to vector<2x256xf32>
    %257 = arith.mulf %254, %256 : vector<2x256xf32>
    %c0_111 = arith.constant 0 : index
    %c3_112 = arith.constant 3 : index
    %c130_113 = arith.constant 130 : index
    %258 = vector.load %arg6[%c0_111, %c3_112, %c130_113] : memref<2x4x512xf32, #tpu.memory_space<vmem>>, vector<2x1x256xf32>
    %259 = vector.shape_cast %258 : vector<2x1x256xf32> to vector<2x256xf32>
    %c32 = arith.constant 32 : index
    %260 = memref.load %arg1[%c32] : memref<36xf32, #tpu.memory_space<smem>>
    %261 = vector.broadcast %260 : f32 to vector<2x256xf32>
    %262 = arith.mulf %259, %261 : vector<2x256xf32>
    %263 = arith.addf %257, %262 : vector<2x256xf32>
    %c0_114 = arith.constant 0 : index
    %c3_115 = arith.constant 3 : index
    %c162_116 = arith.constant 162 : index
    %264 = vector.load %arg6[%c0_114, %c3_115, %c162_116] : memref<2x4x512xf32, #tpu.memory_space<vmem>>, vector<2x1x256xf32>
    %265 = vector.shape_cast %264 : vector<2x1x256xf32> to vector<2x256xf32>
    %c35 = arith.constant 35 : index
    %266 = memref.load %arg1[%c35] : memref<36xf32, #tpu.memory_space<smem>>
    %267 = vector.broadcast %266 : f32 to vector<2x256xf32>
    %268 = arith.mulf %265, %267 : vector<2x256xf32>
    %269 = arith.addf %263, %268 : vector<2x256xf32>
    %270 = vector.broadcast %44 : vector<1x256xf32> to vector<2x256xf32>
    %271 = arith.mulf %269, %270 : vector<2x256xf32>
    %272 = arith.addf %252, %271 : vector<2x256xf32>
    %c0_117 = arith.constant 0 : index
    %273 = memref.load %arg2[%c0_117] : memref<32xf32, #tpu.memory_space<smem>>
    %274 = vector.broadcast %273 : f32 to vector<2x256xf32>
    %275 = arith.mulf %101, %274 : vector<2x256xf32>
    %c1_118 = arith.constant 1 : index
    %276 = memref.load %arg2[%c1_118] : memref<32xf32, #tpu.memory_space<smem>>
    %277 = vector.broadcast %276 : f32 to vector<2x256xf32>
    %278 = arith.mulf %158, %277 : vector<2x256xf32>
    %279 = arith.addf %275, %278 : vector<2x256xf32>
    %c2_119 = arith.constant 2 : index
    %280 = memref.load %arg2[%c2_119] : memref<32xf32, #tpu.memory_space<smem>>
    %281 = vector.broadcast %280 : f32 to vector<2x256xf32>
    %282 = arith.mulf %215, %281 : vector<2x256xf32>
    %283 = arith.addf %279, %282 : vector<2x256xf32>
    %c3_120 = arith.constant 3 : index
    %284 = memref.load %arg2[%c3_120] : memref<32xf32, #tpu.memory_space<smem>>
    %285 = vector.broadcast %284 : f32 to vector<2x256xf32>
    %286 = arith.mulf %272, %285 : vector<2x256xf32>
    %287 = arith.addf %283, %286 : vector<2x256xf32>
    %cst_121 = arith.constant dense<0.000000e+00> : vector<2xf32>
    %288 = vector.multi_reduction <add>, %287, %cst_121 [1] : vector<2x256xf32> to vector<2xf32>
    %289 = vector.shape_cast %288 : vector<2xf32> to vector<2x1xf32>
    %cst_122 = arith.constant dense<0.000000e+00> : vector<1xf32>
    %290 = vector.multi_reduction <add>, %289, %cst_122 [0] : vector<2x1xf32> to vector<1xf32>
    %291 = vector.shape_cast %290 : vector<1xf32> to vector<1x1xf32>
    %cst_123 = arith.constant 0.001953125 : f32
    %292 = vector.broadcast %cst_123 : f32 to vector<1x1xf32>
    %293 = arith.mulf %291, %292 : vector<1x1xf32>
    %294 = vector.broadcast %293 : vector<1x1xf32> to vector<2x256xf32>
    %295 = arith.subf %287, %294 : vector<2x256xf32>
    %296 = arith.mulf %295, %295 : vector<2x256xf32>
    %cst_124 = arith.constant dense<0.000000e+00> : vector<2xf32>
    %297 = vector.multi_reduction <add>, %296, %cst_124 [1] : vector<2x256xf32> to vector<2xf32>
    %298 = vector.shape_cast %297 : vector<2xf32> to vector<2x1xf32>
    %cst_125 = arith.constant dense<0.000000e+00> : vector<1xf32>
    %299 = vector.multi_reduction <add>, %298, %cst_125 [0] : vector<2x1xf32> to vector<1xf32>
    %300 = vector.shape_cast %299 : vector<1xf32> to vector<1x1xf32>
    %cst_126 = arith.constant 0.001953125 : f32
    %301 = vector.broadcast %cst_126 : f32 to vector<1x1xf32>
    %302 = arith.mulf %300, %301 : vector<1x1xf32>
    %c0_127 = arith.constant 0 : index
    %303 = memref.load %arg3[%c0_127] : memref<8xf32, #tpu.memory_space<smem>>
    %cst_128 = arith.constant 9.99999974E-6 : f32
    %304 = vector.broadcast %cst_128 : f32 to vector<1x1xf32>
    %305 = arith.addf %302, %304 : vector<1x1xf32>
    %306 = math.rsqrt %305 : vector<1x1xf32>
    %307 = vector.broadcast %303 : f32 to vector<1x1xf32>
    %308 = arith.mulf %307, %306 : vector<1x1xf32>
    %309 = vector.broadcast %308 : vector<1x1xf32> to vector<2x256xf32>
    %310 = arith.mulf %295, %309 : vector<2x256xf32>
    %c0_129 = arith.constant 0 : index
    %311 = memref.load %arg4[%c0_129] : memref<8xf32, #tpu.memory_space<smem>>
    %312 = vector.broadcast %311 : f32 to vector<2x256xf32>
    %313 = arith.addf %310, %312 : vector<2x256xf32>
    %c0_130 = arith.constant 0 : index
    %c0_131 = arith.constant 0 : index
    %c0_132 = arith.constant 0 : index
    %314 = vector.load %arg5[%c0_130, %c0_131, %c0_132] : memref<2x8x256xf32, #tpu.memory_space<vmem>>, vector<2x1x256xf32>
    %315 = vector.shape_cast %314 : vector<2x1x256xf32> to vector<2x256xf32>
    %316 = vector.shape_cast %313 : vector<2x256xf32> to vector<2x1x256xf32>
    tpu.vector_store %arg5[%c0_130, %c0_131, %c0_132], %316 {strides = array<i32>} : memref<2x8x256xf32, #tpu.memory_space<vmem>>, vector<2x1x256xf32>,
    %c4_133 = arith.constant 4 : index
    %317 = memref.load %arg2[%c4_133] : memref<32xf32, #tpu.memory_space<smem>>
    %318 = vector.broadcast %317 : f32 to vector<2x256xf32>
    %319 = arith.mulf %101, %318 : vector<2x256xf32>
    %c5_134 = arith.constant 5 : index
    %320 = memref.load %arg2[%c5_134] : memref<32xf32, #tpu.memory_space<smem>>
    %321 = vector.broadcast %320 : f32 to vector<2x256xf32>
    %322 = arith.mulf %158, %321 : vector<2x256xf32>
    %323 = arith.addf %319, %322 : vector<2x256xf32>
    %c6_135 = arith.constant 6 : index
    %324 = memref.load %arg2[%c6_135] : memref<32xf32, #tpu.memory_space<smem>>
    %325 = vector.broadcast %324 : f32 to vector<2x256xf32>
    %326 = arith.mulf %215, %325 : vector<2x256xf32>
    %327 = arith.addf %323, %326 : vector<2x256xf32>
    %c7_136 = arith.constant 7 : index
    %328 = memref.load %arg2[%c7_136] : memref<32xf32, #tpu.memory_space<smem>>
    %329 = vector.broadcast %328 : f32 to vector<2x256xf32>
    %330 = arith.mulf %272, %329 : vector<2x256xf32>
    %331 = arith.addf %327, %330 : vector<2x256xf32>
    %cst_137 = arith.constant dense<0.000000e+00> : vector<2xf32>
    %332 = vector.multi_reduction <add>, %331, %cst_137 [1] : vector<2x256xf32> to vector<2xf32>
    %333 = vector.shape_cast %332 : vector<2xf32> to vector<2x1xf32>
    %cst_138 = arith.constant dense<0.000000e+00> : vector<1xf32>
    %334 = vector.multi_reduction <add>, %333, %cst_138 [0] : vector<2x1xf32> to vector<1xf32>
    %335 = vector.shape_cast %334 : vector<1xf32> to vector<1x1xf32>
    %cst_139 = arith.constant 0.001953125 : f32
    %336 = vector.broadcast %cst_139 : f32 to vector<1x1xf32>
    %337 = arith.mulf %335, %336 : vector<1x1xf32>
    %338 = vector.broadcast %337 : vector<1x1xf32> to vector<2x256xf32>
    %339 = arith.subf %331, %338 : vector<2x256xf32>
    %340 = arith.mulf %339, %339 : vector<2x256xf32>
    %cst_140 = arith.constant dense<0.000000e+00> : vector<2xf32>
    %341 = vector.multi_reduction <add>, %340, %cst_140 [1] : vector<2x256xf32> to vector<2xf32>
    %342 = vector.shape_cast %341 : vector<2xf32> to vector<2x1xf32>
    %cst_141 = arith.constant dense<0.000000e+00> : vector<1xf32>
    %343 = vector.multi_reduction <add>, %342, %cst_141 [0] : vector<2x1xf32> to vector<1xf32>
    %344 = vector.shape_cast %343 : vector<1xf32> to vector<1x1xf32>
    %cst_142 = arith.constant 0.001953125 : f32
    %345 = vector.broadcast %cst_142 : f32 to vector<1x1xf32>
    %346 = arith.mulf %344, %345 : vector<1x1xf32>
    %c1_143 = arith.constant 1 : index
    %347 = memref.load %arg3[%c1_143] : memref<8xf32, #tpu.memory_space<smem>>
    %cst_144 = arith.constant 9.99999974E-6 : f32
    %348 = vector.broadcast %cst_144 : f32 to vector<1x1xf32>
    %349 = arith.addf %346, %348 : vector<1x1xf32>
    %350 = math.rsqrt %349 : vector<1x1xf32>
    %351 = vector.broadcast %347 : f32 to vector<1x1xf32>
    %352 = arith.mulf %351, %350 : vector<1x1xf32>
    %353 = vector.broadcast %352 : vector<1x1xf32> to vector<2x256xf32>
    %354 = arith.mulf %339, %353 : vector<2x256xf32>
    %c1_145 = arith.constant 1 : index
    %355 = memref.load %arg4[%c1_145] : memref<8xf32, #tpu.memory_space<smem>>
    %356 = vector.broadcast %355 : f32 to vector<2x256xf32>
    %357 = arith.addf %354, %356 : vector<2x256xf32>
    %c0_146 = arith.constant 0 : index
    %c1_147 = arith.constant 1 : index
    %c0_148 = arith.constant 0 : index
    %358 = vector.load %arg5[%c0_146, %c1_147, %c0_148] : memref<2x8x256xf32, #tpu.memory_space<vmem>>, vector<2x1x256xf32>
    %359 = vector.shape_cast %358 : vector<2x1x256xf32> to vector<2x256xf32>
    %360 = vector.shape_cast %357 : vector<2x256xf32> to vector<2x1x256xf32>
    tpu.vector_store %arg5[%c0_146, %c1_147, %c0_148], %360 {strides = array<i32>} : memref<2x8x256xf32, #tpu.memory_space<vmem>>, vector<2x1x256xf32>,
    %c8_149 = arith.constant 8 : index
    %361 = memref.load %arg2[%c8_149] : memref<32xf32, #tpu.memory_space<smem>>
    %362 = vector.broadcast %361 : f32 to vector<2x256xf32>
    %363 = arith.mulf %101, %362 : vector<2x256xf32>
    %c9_150 = arith.constant 9 : index
    %364 = memref.load %arg2[%c9_150] : memref<32xf32, #tpu.memory_space<smem>>
    %365 = vector.broadcast %364 : f32 to vector<2x256xf32>
    %366 = arith.mulf %158, %365 : vector<2x256xf32>
    %367 = arith.addf %363, %366 : vector<2x256xf32>
    %c10_151 = arith.constant 10 : index
    %368 = memref.load %arg2[%c10_151] : memref<32xf32, #tpu.memory_space<smem>>
    %369 = vector.broadcast %368 : f32 to vector<2x256xf32>
    %370 = arith.mulf %215, %369 : vector<2x256xf32>
    %371 = arith.addf %367, %370 : vector<2x256xf32>
    %c11_152 = arith.constant 11 : index
    %372 = memref.load %arg2[%c11_152] : memref<32xf32, #tpu.memory_space<smem>>
    %373 = vector.broadcast %372 : f32 to vector<2x256xf32>
    %374 = arith.mulf %272, %373 : vector<2x256xf32>
    %375 = arith.addf %371, %374 : vector<2x256xf32>
    %cst_153 = arith.constant dense<0.000000e+00> : vector<2xf32>
    %376 = vector.multi_reduction <add>, %375, %cst_153 [1] : vector<2x256xf32> to vector<2xf32>
    %377 = vector.shape_cast %376 : vector<2xf32> to vector<2x1xf32>
    %cst_154 = arith.constant dense<0.000000e+00> : vector<1xf32>
    %378 = vector.multi_reduction <add>, %377, %cst_154 [0] : vector<2x1xf32> to vector<1xf32>
    %379 = vector.shape_cast %378 : vector<1xf32> to vector<1x1xf32>
    %cst_155 = arith.constant 0.001953125 : f32
    %380 = vector.broadcast %cst_155 : f32 to vector<1x1xf32>
    %381 = arith.mulf %379, %380 : vector<1x1xf32>
    %382 = vector.broadcast %381 : vector<1x1xf32> to vector<2x256xf32>
    %383 = arith.subf %375, %382 : vector<2x256xf32>
    %384 = arith.mulf %383, %383 : vector<2x256xf32>
    %cst_156 = arith.constant dense<0.000000e+00> : vector<2xf32>
    %385 = vector.multi_reduction <add>, %384, %cst_156 [1] : vector<2x256xf32> to vector<2xf32>
    %386 = vector.shape_cast %385 : vector<2xf32> to vector<2x1xf32>
    %cst_157 = arith.constant dense<0.000000e+00> : vector<1xf32>
    %387 = vector.multi_reduction <add>, %386, %cst_157 [0] : vector<2x1xf32> to vector<1xf32>
    %388 = vector.shape_cast %387 : vector<1xf32> to vector<1x1xf32>
    %cst_158 = arith.constant 0.001953125 : f32
    %389 = vector.broadcast %cst_158 : f32 to vector<1x1xf32>
    %390 = arith.mulf %388, %389 : vector<1x1xf32>
    %c2_159 = arith.constant 2 : index
    %391 = memref.load %arg3[%c2_159] : memref<8xf32, #tpu.memory_space<smem>>
    %cst_160 = arith.constant 9.99999974E-6 : f32
    %392 = vector.broadcast %cst_160 : f32 to vector<1x1xf32>
    %393 = arith.addf %390, %392 : vector<1x1xf32>
    %394 = math.rsqrt %393 : vector<1x1xf32>
    %395 = vector.broadcast %391 : f32 to vector<1x1xf32>
    %396 = arith.mulf %395, %394 : vector<1x1xf32>
    %397 = vector.broadcast %396 : vector<1x1xf32> to vector<2x256xf32>
    %398 = arith.mulf %383, %397 : vector<2x256xf32>
    %c2_161 = arith.constant 2 : index
    %399 = memref.load %arg4[%c2_161] : memref<8xf32, #tpu.memory_space<smem>>
    %400 = vector.broadcast %399 : f32 to vector<2x256xf32>
    %401 = arith.addf %398, %400 : vector<2x256xf32>
    %c0_162 = arith.constant 0 : index
    %c2_163 = arith.constant 2 : index
    %c0_164 = arith.constant 0 : index
    %402 = vector.load %arg5[%c0_162, %c2_163, %c0_164] : memref<2x8x256xf32, #tpu.memory_space<vmem>>, vector<2x1x256xf32>
    %403 = vector.shape_cast %402 : vector<2x1x256xf32> to vector<2x256xf32>
    %404 = vector.shape_cast %401 : vector<2x256xf32> to vector<2x1x256xf32>
    tpu.vector_store %arg5[%c0_162, %c2_163, %c0_164], %404 {strides = array<i32>} : memref<2x8x256xf32, #tpu.memory_space<vmem>>, vector<2x1x256xf32>,
    %c12_165 = arith.constant 12 : index
    %405 = memref.load %arg2[%c12_165] : memref<32xf32, #tpu.memory_space<smem>>
    %406 = vector.broadcast %405 : f32 to vector<2x256xf32>
    %407 = arith.mulf %101, %406 : vector<2x256xf32>
    %c13_166 = arith.constant 13 : index
    %408 = memref.load %arg2[%c13_166] : memref<32xf32, #tpu.memory_space<smem>>
    %409 = vector.broadcast %408 : f32 to vector<2x256xf32>
    %410 = arith.mulf %158, %409 : vector<2x256xf32>
    %411 = arith.addf %407, %410 : vector<2x256xf32>
    %c14_167 = arith.constant 14 : index
    %412 = memref.load %arg2[%c14_167] : memref<32xf32, #tpu.memory_space<smem>>
    %413 = vector.broadcast %412 : f32 to vector<2x256xf32>
    %414 = arith.mulf %215, %413 : vector<2x256xf32>
    %415 = arith.addf %411, %414 : vector<2x256xf32>
    %c15_168 = arith.constant 15 : index
    %416 = memref.load %arg2[%c15_168] : memref<32xf32, #tpu.memory_space<smem>>
    %417 = vector.broadcast %416 : f32 to vector<2x256xf32>
    %418 = arith.mulf %272, %417 : vector<2x256xf32>
    %419 = arith.addf %415, %418 : vector<2x256xf32>
    %cst_169 = arith.constant dense<0.000000e+00> : vector<2xf32>
    %420 = vector.multi_reduction <add>, %419, %cst_169 [1] : vector<2x256xf32> to vector<2xf32>
    %421 = vector.shape_cast %420 : vector<2xf32> to vector<2x1xf32>
    %cst_170 = arith.constant dense<0.000000e+00> : vector<1xf32>
    %422 = vector.multi_reduction <add>, %421, %cst_170 [0] : vector<2x1xf32> to vector<1xf32>
    %423 = vector.shape_cast %422 : vector<1xf32> to vector<1x1xf32>
    %cst_171 = arith.constant 0.001953125 : f32
    %424 = vector.broadcast %cst_171 : f32 to vector<1x1xf32>
    %425 = arith.mulf %423, %424 : vector<1x1xf32>
    %426 = vector.broadcast %425 : vector<1x1xf32> to vector<2x256xf32>
    %427 = arith.subf %419, %426 : vector<2x256xf32>
    %428 = arith.mulf %427, %427 : vector<2x256xf32>
    %cst_172 = arith.constant dense<0.000000e+00> : vector<2xf32>
    %429 = vector.multi_reduction <add>, %428, %cst_172 [1] : vector<2x256xf32> to vector<2xf32>
    %430 = vector.shape_cast %429 : vector<2xf32> to vector<2x1xf32>
    %cst_173 = arith.constant dense<0.000000e+00> : vector<1xf32>
    %431 = vector.multi_reduction <add>, %430, %cst_173 [0] : vector<2x1xf32> to vector<1xf32>
    %432 = vector.shape_cast %431 : vector<1xf32> to vector<1x1xf32>
    %cst_174 = arith.constant 0.001953125 : f32
    %433 = vector.broadcast %cst_174 : f32 to vector<1x1xf32>
    %434 = arith.mulf %432, %433 : vector<1x1xf32>
    %c3_175 = arith.constant 3 : index
    %435 = memref.load %arg3[%c3_175] : memref<8xf32, #tpu.memory_space<smem>>
    %cst_176 = arith.constant 9.99999974E-6 : f32
    %436 = vector.broadcast %cst_176 : f32 to vector<1x1xf32>
    %437 = arith.addf %434, %436 : vector<1x1xf32>
    %438 = math.rsqrt %437 : vector<1x1xf32>
    %439 = vector.broadcast %435 : f32 to vector<1x1xf32>
    %440 = arith.mulf %439, %438 : vector<1x1xf32>
    %441 = vector.broadcast %440 : vector<1x1xf32> to vector<2x256xf32>
    %442 = arith.mulf %427, %441 : vector<2x256xf32>
    %c3_177 = arith.constant 3 : index
    %443 = memref.load %arg4[%c3_177] : memref<8xf32, #tpu.memory_space<smem>>
    %444 = vector.broadcast %443 : f32 to vector<2x256xf32>
    %445 = arith.addf %442, %444 : vector<2x256xf32>
    %c0_178 = arith.constant 0 : index
    %c3_179 = arith.constant 3 : index
    %c0_180 = arith.constant 0 : index
    %446 = vector.load %arg5[%c0_178, %c3_179, %c0_180] : memref<2x8x256xf32, #tpu.memory_space<vmem>>, vector<2x1x256xf32>
    %447 = vector.shape_cast %446 : vector<2x1x256xf32> to vector<2x256xf32>
    %448 = vector.shape_cast %445 : vector<2x256xf32> to vector<2x1x256xf32>
    tpu.vector_store %arg5[%c0_178, %c3_179, %c0_180], %448 {strides = array<i32>} : memref<2x8x256xf32, #tpu.memory_space<vmem>>, vector<2x1x256xf32>,
    %c16_181 = arith.constant 16 : index
    %449 = memref.load %arg2[%c16_181] : memref<32xf32, #tpu.memory_space<smem>>
    %450 = vector.broadcast %449 : f32 to vector<2x256xf32>
    %451 = arith.mulf %101, %450 : vector<2x256xf32>
    %c17_182 = arith.constant 17 : index
    %452 = memref.load %arg2[%c17_182] : memref<32xf32, #tpu.memory_space<smem>>
    %453 = vector.broadcast %452 : f32 to vector<2x256xf32>
    %454 = arith.mulf %158, %453 : vector<2x256xf32>
    %455 = arith.addf %451, %454 : vector<2x256xf32>
    %c18_183 = arith.constant 18 : index
    %456 = memref.load %arg2[%c18_183] : memref<32xf32, #tpu.memory_space<smem>>
    %457 = vector.broadcast %456 : f32 to vector<2x256xf32>
    %458 = arith.mulf %215, %457 : vector<2x256xf32>
    %459 = arith.addf %455, %458 : vector<2x256xf32>
    %c19_184 = arith.constant 19 : index
    %460 = memref.load %arg2[%c19_184] : memref<32xf32, #tpu.memory_space<smem>>
    %461 = vector.broadcast %460 : f32 to vector<2x256xf32>
    %462 = arith.mulf %272, %461 : vector<2x256xf32>
    %463 = arith.addf %459, %462 : vector<2x256xf32>
    %cst_185 = arith.constant dense<0.000000e+00> : vector<2xf32>
    %464 = vector.multi_reduction <add>, %463, %cst_185 [1] : vector<2x256xf32> to vector<2xf32>
    %465 = vector.shape_cast %464 : vector<2xf32> to vector<2x1xf32>
    %cst_186 = arith.constant dense<0.000000e+00> : vector<1xf32>
    %466 = vector.multi_reduction <add>, %465, %cst_186 [0] : vector<2x1xf32> to vector<1xf32>
    %467 = vector.shape_cast %466 : vector<1xf32> to vector<1x1xf32>
    %cst_187 = arith.constant 0.001953125 : f32
    %468 = vector.broadcast %cst_187 : f32 to vector<1x1xf32>
    %469 = arith.mulf %467, %468 : vector<1x1xf32>
    %470 = vector.broadcast %469 : vector<1x1xf32> to vector<2x256xf32>
    %471 = arith.subf %463, %470 : vector<2x256xf32>
    %472 = arith.mulf %471, %471 : vector<2x256xf32>
    %cst_188 = arith.constant dense<0.000000e+00> : vector<2xf32>
    %473 = vector.multi_reduction <add>, %472, %cst_188 [1] : vector<2x256xf32> to vector<2xf32>
    %474 = vector.shape_cast %473 : vector<2xf32> to vector<2x1xf32>
    %cst_189 = arith.constant dense<0.000000e+00> : vector<1xf32>
    %475 = vector.multi_reduction <add>, %474, %cst_189 [0] : vector<2x1xf32> to vector<1xf32>
    %476 = vector.shape_cast %475 : vector<1xf32> to vector<1x1xf32>
    %cst_190 = arith.constant 0.001953125 : f32
    %477 = vector.broadcast %cst_190 : f32 to vector<1x1xf32>
    %478 = arith.mulf %476, %477 : vector<1x1xf32>
    %c4_191 = arith.constant 4 : index
    %479 = memref.load %arg3[%c4_191] : memref<8xf32, #tpu.memory_space<smem>>
    %cst_192 = arith.constant 9.99999974E-6 : f32
    %480 = vector.broadcast %cst_192 : f32 to vector<1x1xf32>
    %481 = arith.addf %478, %480 : vector<1x1xf32>
    %482 = math.rsqrt %481 : vector<1x1xf32>
    %483 = vector.broadcast %479 : f32 to vector<1x1xf32>
    %484 = arith.mulf %483, %482 : vector<1x1xf32>
    %485 = vector.broadcast %484 : vector<1x1xf32> to vector<2x256xf32>
    %486 = arith.mulf %471, %485 : vector<2x256xf32>
    %c4_193 = arith.constant 4 : index
    %487 = memref.load %arg4[%c4_193] : memref<8xf32, #tpu.memory_space<smem>>
    %488 = vector.broadcast %487 : f32 to vector<2x256xf32>
    %489 = arith.addf %486, %488 : vector<2x256xf32>
    %c0_194 = arith.constant 0 : index
    %c4_195 = arith.constant 4 : index
    %c0_196 = arith.constant 0 : index
    %490 = vector.load %arg5[%c0_194, %c4_195, %c0_196] : memref<2x8x256xf32, #tpu.memory_space<vmem>>, vector<2x1x256xf32>
    %491 = vector.shape_cast %490 : vector<2x1x256xf32> to vector<2x256xf32>
    %492 = vector.shape_cast %489 : vector<2x256xf32> to vector<2x1x256xf32>
    tpu.vector_store %arg5[%c0_194, %c4_195, %c0_196], %492 {strides = array<i32>} : memref<2x8x256xf32, #tpu.memory_space<vmem>>, vector<2x1x256xf32>,
    %c20_197 = arith.constant 20 : index
    %493 = memref.load %arg2[%c20_197] : memref<32xf32, #tpu.memory_space<smem>>
    %494 = vector.broadcast %493 : f32 to vector<2x256xf32>
    %495 = arith.mulf %101, %494 : vector<2x256xf32>
    %c21_198 = arith.constant 21 : index
    %496 = memref.load %arg2[%c21_198] : memref<32xf32, #tpu.memory_space<smem>>
    %497 = vector.broadcast %496 : f32 to vector<2x256xf32>
    %498 = arith.mulf %158, %497 : vector<2x256xf32>
    %499 = arith.addf %495, %498 : vector<2x256xf32>
    %c22_199 = arith.constant 22 : index
    %500 = memref.load %arg2[%c22_199] : memref<32xf32, #tpu.memory_space<smem>>
    %501 = vector.broadcast %500 : f32 to vector<2x256xf32>
    %502 = arith.mulf %215, %501 : vector<2x256xf32>
    %503 = arith.addf %499, %502 : vector<2x256xf32>
    %c23_200 = arith.constant 23 : index
    %504 = memref.load %arg2[%c23_200] : memref<32xf32, #tpu.memory_space<smem>>
    %505 = vector.broadcast %504 : f32 to vector<2x256xf32>
    %506 = arith.mulf %272, %505 : vector<2x256xf32>
    %507 = arith.addf %503, %506 : vector<2x256xf32>
    %cst_201 = arith.constant dense<0.000000e+00> : vector<2xf32>
    %508 = vector.multi_reduction <add>, %507, %cst_201 [1] : vector<2x256xf32> to vector<2xf32>
    %509 = vector.shape_cast %508 : vector<2xf32> to vector<2x1xf32>
    %cst_202 = arith.constant dense<0.000000e+00> : vector<1xf32>
    %510 = vector.multi_reduction <add>, %509, %cst_202 [0] : vector<2x1xf32> to vector<1xf32>
    %511 = vector.shape_cast %510 : vector<1xf32> to vector<1x1xf32>
    %cst_203 = arith.constant 0.001953125 : f32
    %512 = vector.broadcast %cst_203 : f32 to vector<1x1xf32>
    %513 = arith.mulf %511, %512 : vector<1x1xf32>
    %514 = vector.broadcast %513 : vector<1x1xf32> to vector<2x256xf32>
    %515 = arith.subf %507, %514 : vector<2x256xf32>
    %516 = arith.mulf %515, %515 : vector<2x256xf32>
    %cst_204 = arith.constant dense<0.000000e+00> : vector<2xf32>
    %517 = vector.multi_reduction <add>, %516, %cst_204 [1] : vector<2x256xf32> to vector<2xf32>
    %518 = vector.shape_cast %517 : vector<2xf32> to vector<2x1xf32>
    %cst_205 = arith.constant dense<0.000000e+00> : vector<1xf32>
    %519 = vector.multi_reduction <add>, %518, %cst_205 [0] : vector<2x1xf32> to vector<1xf32>
    %520 = vector.shape_cast %519 : vector<1xf32> to vector<1x1xf32>
    %cst_206 = arith.constant 0.001953125 : f32
    %521 = vector.broadcast %cst_206 : f32 to vector<1x1xf32>
    %522 = arith.mulf %520, %521 : vector<1x1xf32>
    %c5_207 = arith.constant 5 : index
    %523 = memref.load %arg3[%c5_207] : memref<8xf32, #tpu.memory_space<smem>>
    %cst_208 = arith.constant 9.99999974E-6 : f32
    %524 = vector.broadcast %cst_208 : f32 to vector<1x1xf32>
    %525 = arith.addf %522, %524 : vector<1x1xf32>
    %526 = math.rsqrt %525 : vector<1x1xf32>
    %527 = vector.broadcast %523 : f32 to vector<1x1xf32>
    %528 = arith.mulf %527, %526 : vector<1x1xf32>
    %529 = vector.broadcast %528 : vector<1x1xf32> to vector<2x256xf32>
    %530 = arith.mulf %515, %529 : vector<2x256xf32>
    %c5_209 = arith.constant 5 : index
    %531 = memref.load %arg4[%c5_209] : memref<8xf32, #tpu.memory_space<smem>>
    %532 = vector.broadcast %531 : f32 to vector<2x256xf32>
    %533 = arith.addf %530, %532 : vector<2x256xf32>
    %c0_210 = arith.constant 0 : index
    %c5_211 = arith.constant 5 : index
    %c0_212 = arith.constant 0 : index
    %534 = vector.load %arg5[%c0_210, %c5_211, %c0_212] : memref<2x8x256xf32, #tpu.memory_space<vmem>>, vector<2x1x256xf32>
    %535 = vector.shape_cast %534 : vector<2x1x256xf32> to vector<2x256xf32>
    %536 = vector.shape_cast %533 : vector<2x256xf32> to vector<2x1x256xf32>
    tpu.vector_store %arg5[%c0_210, %c5_211, %c0_212], %536 {strides = array<i32>} : memref<2x8x256xf32, #tpu.memory_space<vmem>>, vector<2x1x256xf32>,
    %c24_213 = arith.constant 24 : index
    %537 = memref.load %arg2[%c24_213] : memref<32xf32, #tpu.memory_space<smem>>
    %538 = vector.broadcast %537 : f32 to vector<2x256xf32>
    %539 = arith.mulf %101, %538 : vector<2x256xf32>
    %c25_214 = arith.constant 25 : index
    %540 = memref.load %arg2[%c25_214] : memref<32xf32, #tpu.memory_space<smem>>
    %541 = vector.broadcast %540 : f32 to vector<2x256xf32>
    %542 = arith.mulf %158, %541 : vector<2x256xf32>
    %543 = arith.addf %539, %542 : vector<2x256xf32>
    %c26_215 = arith.constant 26 : index
    %544 = memref.load %arg2[%c26_215] : memref<32xf32, #tpu.memory_space<smem>>
    %545 = vector.broadcast %544 : f32 to vector<2x256xf32>
    %546 = arith.mulf %215, %545 : vector<2x256xf32>
    %547 = arith.addf %543, %546 : vector<2x256xf32>
    %c27_216 = arith.constant 27 : index
    %548 = memref.load %arg2[%c27_216] : memref<32xf32, #tpu.memory_space<smem>>
    %549 = vector.broadcast %548 : f32 to vector<2x256xf32>
    %550 = arith.mulf %272, %549 : vector<2x256xf32>
    %551 = arith.addf %547, %550 : vector<2x256xf32>
    %cst_217 = arith.constant dense<0.000000e+00> : vector<2xf32>
    %552 = vector.multi_reduction <add>, %551, %cst_217 [1] : vector<2x256xf32> to vector<2xf32>
    %553 = vector.shape_cast %552 : vector<2xf32> to vector<2x1xf32>
    %cst_218 = arith.constant dense<0.000000e+00> : vector<1xf32>
    %554 = vector.multi_reduction <add>, %553, %cst_218 [0] : vector<2x1xf32> to vector<1xf32>
    %555 = vector.shape_cast %554 : vector<1xf32> to vector<1x1xf32>
    %cst_219 = arith.constant 0.001953125 : f32
    %556 = vector.broadcast %cst_219 : f32 to vector<1x1xf32>
    %557 = arith.mulf %555, %556 : vector<1x1xf32>
    %558 = vector.broadcast %557 : vector<1x1xf32> to vector<2x256xf32>
    %559 = arith.subf %551, %558 : vector<2x256xf32>
    %560 = arith.mulf %559, %559 : vector<2x256xf32>
    %cst_220 = arith.constant dense<0.000000e+00> : vector<2xf32>
    %561 = vector.multi_reduction <add>, %560, %cst_220 [1] : vector<2x256xf32> to vector<2xf32>
    %562 = vector.shape_cast %561 : vector<2xf32> to vector<2x1xf32>
    %cst_221 = arith.constant dense<0.000000e+00> : vector<1xf32>
    %563 = vector.multi_reduction <add>, %562, %cst_221 [0] : vector<2x1xf32> to vector<1xf32>
    %564 = vector.shape_cast %563 : vector<1xf32> to vector<1x1xf32>
    %cst_222 = arith.constant 0.001953125 : f32
    %565 = vector.broadcast %cst_222 : f32 to vector<1x1xf32>
    %566 = arith.mulf %564, %565 : vector<1x1xf32>
    %c6_223 = arith.constant 6 : index
    %567 = memref.load %arg3[%c6_223] : memref<8xf32, #tpu.memory_space<smem>>
    %cst_224 = arith.constant 9.99999974E-6 : f32
    %568 = vector.broadcast %cst_224 : f32 to vector<1x1xf32>
    %569 = arith.addf %566, %568 : vector<1x1xf32>
    %570 = math.rsqrt %569 : vector<1x1xf32>
    %571 = vector.broadcast %567 : f32 to vector<1x1xf32>
    %572 = arith.mulf %571, %570 : vector<1x1xf32>
    %573 = vector.broadcast %572 : vector<1x1xf32> to vector<2x256xf32>
    %574 = arith.mulf %559, %573 : vector<2x256xf32>
    %c6_225 = arith.constant 6 : index
    %575 = memref.load %arg4[%c6_225] : memref<8xf32, #tpu.memory_space<smem>>
    %576 = vector.broadcast %575 : f32 to vector<2x256xf32>
    %577 = arith.addf %574, %576 : vector<2x256xf32>
    %c0_226 = arith.constant 0 : index
    %c6_227 = arith.constant 6 : index
    %c0_228 = arith.constant 0 : index
    %578 = vector.load %arg5[%c0_226, %c6_227, %c0_228] : memref<2x8x256xf32, #tpu.memory_space<vmem>>, vector<2x1x256xf32>
    %579 = vector.shape_cast %578 : vector<2x1x256xf32> to vector<2x256xf32>
    %580 = vector.shape_cast %577 : vector<2x256xf32> to vector<2x1x256xf32>
    tpu.vector_store %arg5[%c0_226, %c6_227, %c0_228], %580 {strides = array<i32>} : memref<2x8x256xf32, #tpu.memory_space<vmem>>, vector<2x1x256xf32>,
    %c28_229 = arith.constant 28 : index
    %581 = memref.load %arg2[%c28_229] : memref<32xf32, #tpu.memory_space<smem>>
    %582 = vector.broadcast %581 : f32 to vector<2x256xf32>
    %583 = arith.mulf %101, %582 : vector<2x256xf32>
    %c29_230 = arith.constant 29 : index
    %584 = memref.load %arg2[%c29_230] : memref<32xf32, #tpu.memory_space<smem>>
    %585 = vector.broadcast %584 : f32 to vector<2x256xf32>
    %586 = arith.mulf %158, %585 : vector<2x256xf32>
    %587 = arith.addf %583, %586 : vector<2x256xf32>
    %c30_231 = arith.constant 30 : index
    %588 = memref.load %arg2[%c30_231] : memref<32xf32, #tpu.memory_space<smem>>
    %589 = vector.broadcast %588 : f32 to vector<2x256xf32>
    %590 = arith.mulf %215, %589 : vector<2x256xf32>
    %591 = arith.addf %587, %590 : vector<2x256xf32>
    %c31_232 = arith.constant 31 : index
    %592 = memref.load %arg2[%c31_232] : memref<32xf32, #tpu.memory_space<smem>>
    %593 = vector.broadcast %592 : f32 to vector<2x256xf32>
    %594 = arith.mulf %272, %593 : vector<2x256xf32>
    %595 = arith.addf %591, %594 : vector<2x256xf32>
    %cst_233 = arith.constant dense<0.000000e+00> : vector<2xf32>
    %596 = vector.multi_reduction <add>, %595, %cst_233 [1] : vector<2x256xf32> to vector<2xf32>
    %597 = vector.shape_cast %596 : vector<2xf32> to vector<2x1xf32>
    %cst_234 = arith.constant dense<0.000000e+00> : vector<1xf32>
    %598 = vector.multi_reduction <add>, %597, %cst_234 [0] : vector<2x1xf32> to vector<1xf32>
    %599 = vector.shape_cast %598 : vector<1xf32> to vector<1x1xf32>
    %cst_235 = arith.constant 0.001953125 : f32
    %600 = vector.broadcast %cst_235 : f32 to vector<1x1xf32>
    %601 = arith.mulf %599, %600 : vector<1x1xf32>
    %602 = vector.broadcast %601 : vector<1x1xf32> to vector<2x256xf32>
    %603 = arith.subf %595, %602 : vector<2x256xf32>
    %604 = arith.mulf %603, %603 : vector<2x256xf32>
    %cst_236 = arith.constant dense<0.000000e+00> : vector<2xf32>
    %605 = vector.multi_reduction <add>, %604, %cst_236 [1] : vector<2x256xf32> to vector<2xf32>
    %606 = vector.shape_cast %605 : vector<2xf32> to vector<2x1xf32>
    %cst_237 = arith.constant dense<0.000000e+00> : vector<1xf32>
    %607 = vector.multi_reduction <add>, %606, %cst_237 [0] : vector<2x1xf32> to vector<1xf32>
    %608 = vector.shape_cast %607 : vector<1xf32> to vector<1x1xf32>
    %cst_238 = arith.constant 0.001953125 : f32
    %609 = vector.broadcast %cst_238 : f32 to vector<1x1xf32>
    %610 = arith.mulf %608, %609 : vector<1x1xf32>
    %c7_239 = arith.constant 7 : index
    %611 = memref.load %arg3[%c7_239] : memref<8xf32, #tpu.memory_space<smem>>
    %cst_240 = arith.constant 9.99999974E-6 : f32
    %612 = vector.broadcast %cst_240 : f32 to vector<1x1xf32>
    %613 = arith.addf %610, %612 : vector<1x1xf32>
    %614 = math.rsqrt %613 : vector<1x1xf32>
    %615 = vector.broadcast %611 : f32 to vector<1x1xf32>
    %616 = arith.mulf %615, %614 : vector<1x1xf32>
    %617 = vector.broadcast %616 : vector<1x1xf32> to vector<2x256xf32>
    %618 = arith.mulf %603, %617 : vector<2x256xf32>
    %c7_241 = arith.constant 7 : index
    %619 = memref.load %arg4[%c7_241] : memref<8xf32, #tpu.memory_space<smem>>
    %620 = vector.broadcast %619 : f32 to vector<2x256xf32>
    %621 = arith.addf %618, %620 : vector<2x256xf32>
    %c0_242 = arith.constant 0 : index
    %c7_243 = arith.constant 7 : index
    %c0_244 = arith.constant 0 : index
    %622 = vector.load %arg5[%c0_242, %c7_243, %c0_244] : memref<2x8x256xf32, #tpu.memory_space<vmem>>, vector<2x1x256xf32>
    %623 = vector.shape_cast %622 : vector<2x1x256xf32> to vector<2x256xf32>
    %624 = vector.shape_cast %621 : vector<2x256xf32> to vector<2x1x256xf32>
    tpu.vector_store %arg5[%c0_242, %c7_243, %c0_244], %624 {strides = array<i32>} : memref<2x8x256xf32, #tpu.memory_space<vmem>>, vector<2x1x256xf32>,
    return
  }
}

</mosaic_0001>

<bundles_post_ra>
// kernel: dil_conv_s.1
= control target key start
LH: loop header
LB: loop body
LE: loop exit
PB: predicated region body
PF: predicated region fallthrough
CT: control target
= control target key end

     0   :  { %10 = vsyncpa [#allocation4], 0  ;;  %s3601_s0 = inlined_call_operand.vmem [shape: f32[2,4,256], index: 0, kind: input, shape index: {}]   ;;  %s3602_s1 = inlined_call_operand.vmem [shape: f32[36], index: 1, kind: input, shape index: {}]   ;;  %s3603_s2 = inlined_call_operand.vmem [shape: f32[32], index: 2, kind: input, shape index: {}]   ;;  %s3604_s3 = inlined_call_operand.vmem [shape: f32[8], index: 3, kind: input, shape index: {}]   ;;  %s3605_s4 = inlined_call_operand.vmem [shape: f32[8], index: 4, kind: input, shape index: {}]   ;;  %s3606_s5 = inlined_call_operand.vmem [shape: f32[2,8,256], index: 5, kind: output, shape index: {}]  }
   0x1   :  { %11 = vsyncpa [#allocation6], 0  ;;  %s31_s20 = sshll.u32 %s3603_s2, 4  ;;  %s32_s20 = int_to_ptr.vmem [resolvable:$true] %s31_s20 }
   0x2   :  { %12 = vsyncpa [#allocation9], 0  ;;  %s21_s23 = sshll.u32 %s3602_s1, 4  ;;  %s2240_s24 = scalar_lea.vmem %s32_s20, 16  ;;  %s22_s23 = int_to_ptr.vmem [resolvable:$true] %s21_s23 }
   0x3   :  { %p2241_p0 = scmp.ne.s32.totalorder %s32_s20, %s2240_s24  ;;  %p2245_p1 = scmp.lt.s32.totalorder %s32_s20, %s32_s20 }
   0x4   :  { %p2246_p2 = scmp.lt.s32.totalorder %s2240_s24, %s2240_s24 }
   0x6   :  { %p2247_p3 = por %p2246_p2, %p2245_p1 }
   0x8   :  { %p2248_p4 = pnand %p2247_p3, %p2241_p0 }
   0xa   :  { %2251 = shalt.err (!%p2248_p4)
}
   0xb   :  { %s2294_s25 = smov [#allocation5]   ;;  %s2252_s26 = scalar_lea.vmem %s22_s23, 16 }
   0xc   :  { %34 = dma.vmem_to_smem %s32_s20, 16, %s2294_s25, [#allocation6]  }
   0xd   :  { %p2253_p5 = scmp.ne.s32.totalorder %s22_s23, %s2252_s26  ;;  %p2257_p6 = scmp.lt.s32.totalorder %s22_s23, %s22_s23 }
   0xe   :  { %p2258_p7 = scmp.lt.s32.totalorder %s2252_s26, %s2252_s26 }
  0x10   :  { %p2259_p8 = por %p2258_p7, %p2257_p6 }
  0x12   :  { %p2260_p9 = pnand %p2259_p8, %p2253_p5 }
  0x14   :  { %2263 = shalt.err (!%p2260_p9)
}
  0x15   :  { %s2295_s2 = smov [#allocation3]   ;;  %s41_s28 = sshll.u32 %s3604_s3, 4  ;;  %s42_s28 = int_to_ptr.vmem [resolvable:$true] %s41_s28 }
  0x16   :  { %24 = dma.vmem_to_smem %s22_s23, 16, %s2295_s2, [#allocation4]  }
  0x17   :  { %s51_s6 = sshll.u32 %s3605_s4, 4  ;;  %s2264_s7 = scalar_lea.vmem %s42_s28, 16  ;;  %s52_s6 = int_to_ptr.vmem [resolvable:$true] %s51_s6 }
  0x18   :  { %p2265_p10 = scmp.ne.s32.totalorder %s42_s28, %s2264_s7  ;;  %p2269_p11 = scmp.lt.s32.totalorder %s42_s28, %s42_s28 }
  0x19   :  { %p2270_p12 = scmp.lt.s32.totalorder %s2264_s7, %s2264_s7 }
  0x1b   :  { %p2271_p13 = por %p2270_p12, %p2269_p11 }
  0x1d   :  { %p2272_p0 = pnand %p2271_p13, %p2265_p10 }
  0x1f   :  { %2275 = shalt.err (!%p2272_p0)
}
  0x20   :  { %s2296_s8 = smov [#allocation7]   ;;  %s2276_s9 = scalar_lea.vmem %s52_s6, 16 }
  0x21   :  { %44 = dma.vmem_to_smem %s42_s28, 16, %s2296_s8, [#allocation6]  }
  0x22   :  { %p2277_p1 = scmp.ne.s32.totalorder %s52_s6, %s2276_s9  ;;  %p2281_p2 = scmp.lt.s32.totalorder %s52_s6, %s52_s6 }
  0x23   :  { %p2282_p3 = scmp.lt.s32.totalorder %s2276_s9, %s2276_s9 }
  0x25   :  { %p2283_p4 = por %p2282_p3, %p2281_p2 }
  0x27   :  { %p2284_p5 = pnand %p2283_p4, %p2277_p1 }
  0x29   :  { %2287 = shalt.err (!%p2284_p5)
}
  0x2a   :  { %s2297_s3 = smov [#allocation8]  }
  0x2b   :  { %54 = dma.vmem_to_smem %s52_s6, 16, %s2297_s3, [#allocation9]  }
  0x2c   :  { %2288 = dma.done.wait [#allocation4], 16  }
  0x2d   :  { %2289 = vsyncadd [#allocation4], 4294967280 }
  0x2e   :  { %2290 = dma.done.wait [#allocation6], 32  }
  0x2f   :  { %2291 = vsyncadd [#allocation6], 4294967264 }
  0x30   :  { %2292 = dma.done.wait [#allocation9], 16  }
  0x31   :  { %2293 = vsyncadd [#allocation9], 4294967280 }
  0x32   :  { %67 = sfence }
  0x33   :  { %v72_v0 = vld [vmem:[%s3601_s0] sm:$0xff]  ;;  %v73_v1 = vld [vmem:[%s3601_s0 + $0x8] sm:$0xff]  ;;  %s2355_s13 = sld [smem:[#allocation3 + $0x6]]  ;;  %v3607_v2 = vlaneseq  ;;  %v2298_v3 = vmov 0.0   ;;  %v2299_v14 = vmov 1966171168  }
  0x34   :  { %68 = vst [vmem:[#allocation2] sm:$0xff] %v2298_v3  ;;  %69 = vst [vmem:[#allocation2 + $0x8] sm:$0xff] %v2298_v3  ;;  %v74_v4 = vmax.f32 %v72_v0, 0.0  ;;  %v75_v5 = vmax.f32 %v73_v1, 0.0  ;;  %s2116_s14 = sld [smem:[#allocation3 + $0x3]]  ;;  %v182_v15 = vunpack.c.l.s4 %v2299_v14  ;;  %s2300_s16 = smov 64  }
  0x35   :  { %70 = vst [vmem:[#allocation2 + $0x10] sm:$0xff] %v2298_v3  ;;  %71 = vst [vmem:[#allocation2 + $0x18] sm:$0xff] %v2298_v3  ;;  %v79_v6 = vand.u32 127, %v3607_v2  ;;  %s2362_s0 = sld [smem:[#allocation3 + $0x4]]  ;;  %v185_v24 = vshrl.u32 %v3607_v2, 7  ;;  %s2301_s18 = smov 96  }
  0x36   :  { %76 = vst [vmem:[#allocation2 + $0x4] sm:$0xff] %v74_v4  ;;  %77 = vst [vmem:[#allocation2 + $0x14] sm:$0xff] %v75_v5  ;;  %s2365_s15 = sld [smem:[#allocation3 + $0x7]]  ;;  %v183_v23 = vunpack.c.0.s8 %v182_v15  ;;  %s2302_s20 = smov 94   ;;  %vm148_vm4 = vcmask 785408   ;;  %vm171_vm5 = vcmask 523264  }
  0x37   :  { %v80_v7 = vadd.s32 128, %v79_v6  ;;  %v85_v8 = vand.u32 15, %v79_v6  ;;  %s2373_s17 = sld [smem:[#allocation3 + $0x5]]  ;;  %s2303_s24 = smov 98   ;;  %vm350_vm6 = vcmask 801792   ;;  %vm209_vm7 = vcmask 769024  }
  0x38   :  { %v2384_v38 = vsub.s32 %v183_v23, %v185_v24  ;;  %s2123_s19 = sld [smem:[#allocation3 + $0x8]]  ;;  %s2304_s12 = smov 126   ;;  %vm272_vm8 = vcmask 1031168   ;;  %vm365_vm9 = vcmask 1014784   ;;  %vm930_vm10 = vcmask 277504  }
  0x39   :  { %v92_v9 = vand.u32 15, %v80_v7  ;;  %v160_v10 = vstv %s2355_s13  ;;  %v105_v11 = vadd.s32 4294967294, %v85_v8  ;;  %v117_v28 = vadd.s32 2, %v85_v8  ;;  %s2125_s21 = sld [smem:[#allocation3 + $0xc]] }
  0x3a   :  { %v137_v12 = vstv %s2116_s14  ;;  %3612 = vst [vmem:[#allocation13_spill] sm:$0xff] %v2384_v38  ;;  %s2126_s22 = sld [smem:[#allocation3 + $0xf]]  ;;  %vm935_vm11 = vcmask 1041408  }
  0x3b   :  { %v106_v13 = vadd.s32 4294967294, %v92_v9  ;;  %vm107_vm0 = vcmp.ge.s32.totalorder %v105_v11, 0  ;;  %v227_v27 = vstv %s2362_s0  ;;  %v118_v32 = vadd.s32 2, %v92_v9  ;;  %s2128_s23 = sld [smem:[#allocation3 + $0xd]] }
  0x3c   :  { %v2112_v30 = vsel %vm107_vm0, 1.0, %v2298_v3  ;;  %v247_v36 = vstv %s2365_s15  ;;  %vm121_vm2 = vcmp.le.s32.totalorder %v117_v28, 15  ;;  %s2129_s25 = sld [smem:[#allocation3 + $0x10]] }
  0x3d   :  { %v156_v16 = vld [vmem:[#allocation2 + $0x4] ss:$4 sm:$0x7]  ;;  %v158_v17 = vld [vmem:[#allocation2 + $0x14] ss:$4 sm:$0x7]  ;;  %v284_v41 = vstv %s2373_s17 }
  0x3e   :  { %v161_v18 = vmul.f32 %v160_v10, %v156_v16  ;;  %v2367_v19 = vld [vmem:[#allocation2] ss:$4 sm:$0x7]  ;;  %v2369_v20 = vld [vmem:[#allocation2 + $0x10] ss:$4 sm:$0x7]  ;;  %v162_v22 = vmul.f32 %v160_v10, %v158_v17  ;;  %v302_v53 = vstv %s2123_s19 }
  0x3f   :  { %v138_v21 = vmul.f32 %v137_v12, %v2367_v19  ;;  %v139_v25 = vmul.f32 %v137_v12, %v2369_v20  ;;  %v225_v26 = vld [vmem:[#allocation2 + $0x14] ss:$4 sm:$0x3]  ;;  %vm108_vm1 = vcmp.ge.s32.totalorder %v106_v13, 0  ;;  %vm122_vm3 = vcmp.le.s32.totalorder %v118_v32, 15  ;;  %s2131_s26 = sld [smem:[#allocation3 + $0xe]] }
  0x40   :  { %165 = vrot.lane.b32.xlu1 %v161_v18, %s2300_s16  ;;  %v223_v29 = vld [vmem:[#allocation2 + $0x4] ss:$4 sm:$0x3]  ;;  %v2113_v31 = vsel %vm108_vm1, 1.0, %v2298_v3  ;;  %v229_v33 = vmul.f32 %v227_v27, %v225_v26  ;;  %v2114_v44 = vsel %vm121_vm2, 1.0, %v2298_v3  ;;  %v2115_v45 = vsel %vm122_vm3, 1.0, %v2298_v3 }
  0x41   :  { %142 = vrot.lane.b32.xlu0 %v138_v21, %s2301_s18  ;;  %v228_v34 = vmul.f32 %v227_v27, %v223_v29  ;;  %v245_v35 = vld [vmem:[#allocation2 + $0x14] ss:$4 sm:$0x7]  ;;  %v180_v37 = vcombine.low %v2112_v30, %v2113_v31  ;;  %v244_v39 = vld [vmem:[#allocation2 + $0x4] ss:$4 sm:$0x7]  ;;  %v321_v48 = vcombine.low %v2114_v44, %v2115_v45  ;;  %v381_v60 = vstv %s2125_s21 }
  0x42   :  { %v249_v40 = vmul.f32 %v247_v36, %v245_v35  ;;  %v248_v42 = vmul.f32 %v247_v36, %v244_v39  ;;  %v286_v46 = vmul.f32 %v284_v41, %v245_v35  ;;  %v285_v52 = vmul.f32 %v284_v41, %v244_v39  ;;  %v2403_v59 = vld [vmem:[#allocation2 + $0x11] ss:$4 sm:$0x7]  ;;  %v2405_v61 = vld [vmem:[#allocation2 + $0x1] ss:$4 sm:$0x7] }
  0x43   :  { %v187_v43 = vrot.slane %v180_v37, %v2384_v38  ;;  %v328_v51 = vrot.slane %v321_v48, %v2384_v38  ;;  %v304_v54 = vmul.f32 %v302_v53, %v245_v35  ;;  %v303_v56 = vmul.f32 %v302_v53, %v244_v39  ;;  %v401_v0 = vld [vmem:[#allocation2 + $0x15] ss:$4 sm:$0x7]  ;;  %v399_v3 = vld [vmem:[#allocation2 + $0x5] ss:$4 sm:$0x7] }
  0x44   :  { %167 = vrot.lane.b32.xlu1 %v162_v22, %s2300_s16  ;;  %v383_v62 = vmul.f32 %v381_v60, %v2403_v59  ;;  %v382_v63 = vmul.f32 %v381_v60, %v2405_v61  ;;  %v403_v1 = vstv %s2126_s22  ;;  %v431_v6 = vld [vmem:[#allocation2 + $0x15] ss:$4 sm:$0x3]  ;;  %v433_v7 = vstv %s2128_s23  ;;  %v429_v8 = vld [vmem:[#allocation2 + $0x5] ss:$4 sm:$0x3] }
  0x45   :  { %144 = vrot.lane.b32.xlu0 %v139_v25, %s2301_s18  ;;  %v188_v47 = vcombine.high %v187_v43, %v187_v43  ;;  %v195_v49 = vrot.slane %v187_v43, %v2384_v38  ;;  %v329_v55 = vcombine.high %v328_v51, %v328_v51  ;;  %v336_v58 = vrot.slane %v328_v51, %v2384_v38  ;;  %v451_v11 = vld [vmem:[#allocation2 + $0x15] ss:$4 sm:$0x7]  ;;  %s2132_s2 = sld [smem:[#allocation3 + $0x11]] }
  0x46   :  { %v405_v4 = vmul.f32 %v403_v1, %v401_v0  ;;  %v404_v5 = vmul.f32 %v403_v1, %v399_v3  ;;  %v435_v9 = vmul.f32 %v433_v7, %v431_v6  ;;  %v434_v10 = vmul.f32 %v433_v7, %v429_v8  ;;  %v450_v13 = vld [vmem:[#allocation2 + $0x5] ss:$4 sm:$0x7]  ;;  %s2134_s1 = sld [smem:[#allocation3 + $0x15]] }
  0x47   :  { %v202_v50 = vrot.slane %v188_v47, %v2384_v38  ;;  %v343_v57 = vrot.slane %v329_v55, %v2384_v38  ;;  %v453_v12 = vstv %s2129_s25  ;;  %v489_v16 = vstv %s2131_s26  ;;  %s2135_s27 = sld [smem:[#allocation3 + $0x18]]  ;;  %v2419_v24 = vld [vmem:[#allocation2 + $0x12] ss:$4 sm:$0x7] }
  0x48   :  { %234 = vrot.lane.b32.xlu1 %v229_v33, %s2301_s18  ;;  %v455_v14 = vmul.f32 %v453_v12, %v451_v11  ;;  %v454_v15 = vmul.f32 %v453_v12, %v450_v13  ;;  %v491_v17 = vmul.f32 %v489_v16, %v451_v11  ;;  %v490_v18 = vmul.f32 %v489_v16, %v450_v13  ;;  %s2137_s28 = sld [smem:[#allocation3 + $0x16]]  ;;  %v2421_v26 = vld [vmem:[#allocation2 + $0x2] ss:$4 sm:$0x7] }
  0x49   :  { %232 = vrot.lane.b32.xlu0 %v228_v34, %s2301_s18  ;;  %v569_v29 = vld [vmem:[#allocation2 + $0x16] ss:$4 sm:$0x7]  ;;  %s2138_s29 = sld [smem:[#allocation3 + $0x19]] }
  0x4a   :  { %v567_v31 = vld [vmem:[#allocation2 + $0x6] ss:$4 sm:$0x7]  ;;  %v599_v34 = vld [vmem:[#allocation2 + $0x16] ss:$4 sm:$0x3] }
  0x4b   :  { %v507_v21 = vstv %s2132_s2  ;;  %s2140_s30 = sld [smem:[#allocation3 + $0x17]]  ;;  %v597_v36 = vld [vmem:[#allocation2 + $0x6] ss:$4 sm:$0x3] }
  0x4c   :  { %254 = vrot.lane.b32.xlu1 %v249_v40, %s2300_s16  ;;  %v509_v22 = vmul.f32 %v507_v21, %v451_v11  ;;  %v508_v23 = vmul.f32 %v507_v21, %v450_v13  ;;  %v549_v25 = vstv %s2134_s1  ;;  %v619_v40 = vld [vmem:[#allocation2 + $0x16] ss:$4 sm:$0x7]  ;;  %s2141_s6 = sld [smem:[#allocation3 + $0x1a]] }
  0x4d   :  { %252 = vrot.lane.b32.xlu0 %v248_v42, %s2300_s16  ;;  %v551_v27 = vmul.f32 %v549_v25, %v2419_v24  ;;  %v550_v28 = vmul.f32 %v549_v25, %v2421_v26  ;;  %v571_v30 = vstv %s2135_s27  ;;  %v618_v42 = vld [vmem:[#allocation2 + $0x6] ss:$4 sm:$0x7]  ;;  %s2143_s7 = sld [smem:[#allocation3 + $0x1e]] }
  0x4e   :  { %v573_v32 = vmul.f32 %v571_v30, %v569_v29  ;;  %v572_v33 = vmul.f32 %v571_v30, %v567_v31  ;;  %v601_v35 = vstv %s2137_s28  ;;  %s2144_s8 = sld [smem:[#allocation3 + $0x21]]  ;;  %v2437_v51 = vld [vmem:[#allocation2 + $0x13] ss:$4 sm:$0x7] }
  0x4f   :  { %v603_v37 = vmul.f32 %v601_v35, %v599_v34  ;;  %v602_v39 = vmul.f32 %v601_v35, %v597_v36  ;;  %v621_v41 = vstv %s2138_s29  ;;  %s2146_s9 = sld [smem:[#allocation3 + $0x1f]]  ;;  %v2439_v53 = vld [vmem:[#allocation2 + $0x3] ss:$4 sm:$0x7] }
  0x50   :  { %291 = vrot.lane.b32.xlu1 %v286_v46, %s2301_s18  ;;  %v623_v43 = vmul.f32 %v621_v41, %v619_v40  ;;  %v622_v44 = vmul.f32 %v621_v41, %v618_v42  ;;  %s2147_s3 = sld [smem:[#allocation3 + $0x22]]  ;;  %v765_v1 = vld [vmem:[#allocation2 + $0x7] ss:$4 sm:$0x3] }
  0x51   :  { %203 = vrot.lane.b32.xlu0 %v195_v49, %s2302_s20  ;;  %v657_v45 = vstv %s2140_s30  ;;  %s2149_s4 = sld [smem:[#allocation3 + $0x20]]  ;;  %v786_v7 = vld [vmem:[#allocation2 + $0x7] ss:$4 sm:$0x7] }
  0x52   :  { %v659_v46 = vmul.f32 %v657_v45, %v619_v40  ;;  %v658_v47 = vmul.f32 %v657_v45, %v618_v42  ;;  %v675_v48 = vstv %s2141_s6  ;;  %s2150_s10 = sld [smem:[#allocation3 + $0x23]]  ;;  %v758_v38 = vld [vmem:[#allocation2 + $0x3] ss:$4 sm:$0x7] }
  0x53   :  { %v677_v49 = vmul.f32 %v675_v48, %v619_v40  ;;  %s2118_s11 = sld [smem:[#allocation3 + $0x1]] }
  0x54   :  { %205 = vrot.lane.b32.xlu1 %v202_v50, %s2302_s20  ;;  %v676_v50 = vmul.f32 %v675_v48, %v618_v42  ;;  %s2127_s13 = sld [smem:[#allocation3 + $0xa]]  ;;  %s2305_s20 = smov 124  }
  0x55   :  { %289 = vrot.lane.b32.xlu0 %v285_v52, %s2301_s18  ;;  %v717_v52 = vstv %s2143_s7  ;;  %v769_v0 = vstv %s2146_s9  ;;  %s2136_s14 = sld [smem:[#allocation3 + $0x13]] }
  0x56   :  { %v718_v55 = vmul.f32 %v717_v52, %v2439_v53  ;;  %v789_v6 = vstv %s2147_s3  ;;  %s2531_s0 = sld [smem:[#allocation3 + $0x1b]] }
  0x57   :  { %s2121_s15 = sld [smem:[#allocation3 + $0x2]] }
  0x58   :  { %309 = vrot.lane.b32.xlu1 %v304_v54, %s2300_s16  ;;  %v719_v54 = vmul.f32 %v717_v52, %v2437_v51  ;;  %v843_v13 = vstv %s2150_s10  ;;  %s2543_s17 = sld [smem:[#allocation3 + $0x14]] }
  0x59   :  { %307 = vrot.lane.b32.xlu0 %v303_v56, %s2300_s16  ;;  %v737_v56 = vld [vmem:[#allocation2 + $0x17] ss:$4 sm:$0x7]  ;;  %s2558_s19 = sld [smem:[#allocation3 + $0x1d]] }
  0x5a   :  { %s132_s21 = sld [smem:[#allocation3]] }
  0x5b   :  { %s2124_s22 = sld [smem:[#allocation3 + $0x9]] }
  0x5c   :  { %346 = vrot.lane.b32.xlu1 %v343_v57, %s2303_s24  ;;  %v739_v57 = vstv %s2144_s8  ;;  %s2133_s23 = sld [smem:[#allocation3 + $0x12]] }
  0x5d   :  { %344 = vrot.lane.b32.xlu0 %v336_v58, %s2303_s24  ;;  %v735_v58 = vld [vmem:[#allocation2 + $0x7] ss:$4 sm:$0x7]  ;;  %v741_v60 = vmul.f32 %v739_v57, %v737_v56  ;;  %s2640_s24 = sld [smem:[#allocation5 + $0x4]] }
  0x5e   :  { %s2642_s25 = sld [smem:[#allocation5]] }
  0x5f   :  { %s2644_s26 = sld [smem:[#allocation5 + $0x8]] }
  0x60   :  { %388 = vrot.lane.b32.xlu1 %v383_v62, %s2301_s18  ;;  %v740_v62 = vmul.f32 %v739_v57, %v735_v58  ;;  %s2646_s2 = sld [smem:[#allocation5 + $0xc]] }
  0x61   :  { %386 = vrot.lane.b32.xlu0 %v382_v63, %s2301_s18  ;;  %v767_v63 = vld [vmem:[#allocation2 + $0x17] ss:$4 sm:$0x3]  ;;  %s2648_s1 = sld [smem:[#allocation5 + $0x5]] }
  0x62   :  { %v771_v3 = vmul.f32 %v769_v0, %v767_v63  ;;  %v425_v63 = vstv %s2127_s13  ;;  %s2650_s27 = sld [smem:[#allocation5 + $0x1]] }
  0x63   :  { %s2652_s28 = sld [smem:[#allocation5 + $0x9]] }
  0x64   :  { %410 = vrot.lane.b32.xlu1 %v405_v4, %s2300_s16  ;;  %v770_v4 = vmul.f32 %v769_v0, %v765_v1  ;;  %v2503_v1 = vld [vmem:[#allocation2 + $0x1] ss:$4 sm:$0x7]  ;;  %s2654_s29 = sld [smem:[#allocation5 + $0xd]] }
  0x65   :  { %408 = vrot.lane.b32.xlu0 %v404_v5, %s2300_s16  ;;  %v787_v5 = vld [vmem:[#allocation2 + $0x17] ss:$4 sm:$0x7]  ;;  %s2657_s30 = sld [smem:[#allocation5 + $0x6]] }
  0x66   :  { %v791_v8 = vmul.f32 %v789_v6, %v787_v5  ;;  %s2660_s6 = sld [smem:[#allocation5 + $0x2]] }
  0x67   :  { %s2666_s7 = sld [smem:[#allocation5 + $0xa]] }
  0x68   :  { %440 = vrot.lane.b32.xlu1 %v435_v9, %s2301_s18  ;;  %v790_v9 = vmul.f32 %v789_v6, %v786_v7  ;;  %s2671_s8 = sld [smem:[#allocation5 + $0x18]] }
  0x69   :  { %438 = vrot.lane.b32.xlu0 %v434_v10, %s2301_s18  ;;  %v825_v10 = vstv %s2149_s4  ;;  %s2678_s9 = sld [smem:[#allocation5 + $0x7]] }
  0x6a   :  { %v827_v11 = vmul.f32 %v825_v10, %v787_v5  ;;  %v826_v12 = vmul.f32 %v825_v10, %v786_v7  ;;  %s2687_s3 = sld [smem:[#allocation5 + $0x3]] }
  0x6b   :  { %s2694_s4 = sld [smem:[#allocation5 + $0x19]] }
  0x6c   :  { %460 = vrot.lane.b32.xlu1 %v455_v14, %s2300_s16  ;;  %v845_v14 = vmul.f32 %v843_v13, %v787_v5  ;;  %s2700_s10 = sld [smem:[#allocation5 + $0xb]] }
  0x6d   :  { %458 = vrot.lane.b32.xlu0 %v454_v15, %s2300_s16  ;;  %v844_v15 = vmul.f32 %v843_v13, %v786_v7  ;;  %s2723_s13 = sld [smem:[#allocation5 + $0xf]] }
  0x70   :  { %496 = vrot.lane.b32.xlu1 %v491_v17, %s2301_s18 }
  0x71   :  { %494 = vrot.lane.b32.xlu0 %v490_v18, %s2301_s18 }
  0x74   :  { %514 = vrot.lane.b32.xlu1 %v509_v22, %s2300_s16  ;;  %v2465_v22 = vld [vmem:[#allocation2 + $0x10] ss:$4 sm:$0x7] }
  0x75   :  { %512 = vrot.lane.b32.xlu0 %v508_v23, %s2300_s16  ;;  %v219_v23 = vstv %s2118_s11  ;;  %s2707_s11 = sld [smem:[#allocation5 + $0x10]] }
  0x76   :  { %v221_v30 = vmul.f32 %v219_v23, %v2465_v22 }
  0x78   :  { %556 = vrot.lane.b32.xlu1 %v551_v27, %s2301_s18  ;;  %v2467_v27 = vld [vmem:[#allocation2] ss:$4 sm:$0x7] }
  0x79   :  { %554 = vrot.lane.b32.xlu0 %v550_v28, %s2301_s18 }
  0x7c   :  { %578 = vrot.lane.b32.xlu1 %v573_v32, %s2300_s16 }
  0x7d   :  { %576 = vrot.lane.b32.xlu0 %v572_v33, %s2300_s16  ;;  %v220_v33 = vmul.f32 %v219_v23, %v2467_v27 }
  0x80   :  { %608 = vrot.lane.b32.xlu1 %v603_v37, %s2301_s18 }
  0x81   :  { %606 = vrot.lane.b32.xlu0 %v602_v39, %s2301_s18 }
  0x84   :  { %628 = vrot.lane.b32.xlu1 %v623_v43, %s2300_s16 }
  0x85   :  { %626 = vrot.lane.b32.xlu0 %v622_v44, %s2300_s16 }
  0x88   :  { %664 = vrot.lane.b32.xlu1 %v659_v46, %s2301_s18 }
  0x89   :  { %662 = vrot.lane.b32.xlu0 %v658_v47, %s2301_s18 }
  0x8c   :  { %682 = vrot.lane.b32.xlu1 %v677_v49, %s2300_s16 }
  0x8d   :  { %680 = vrot.lane.b32.xlu0 %v676_v50, %s2300_s16 }
  0x90   :  { %724 = vrot.lane.b32.xlu1 %v719_v54, %s2301_s18 }
  0x91   :  { %722 = vrot.lane.b32.xlu0 %v718_v55, %s2301_s18 }
  0x94   :  { %746 = vrot.lane.b32.xlu1 %v741_v60, %s2300_s16 }
  0x95   :  { %744 = vrot.lane.b32.xlu0 %v740_v62, %s2300_s16  ;;  %v2501_v62 = vld [vmem:[#allocation2 + $0x11] ss:$4 sm:$0x7] }
  0x96   :  { %v427_v5 = vmul.f32 %v425_v63, %v2501_v62 }
  0x98   :  { %776 = vrot.lane.b32.xlu1 %v771_v3, %s2301_s18 }
  0x99   :  { %774 = vrot.lane.b32.xlu0 %v770_v4, %s2301_s18 }
  0x9c   :  { %796 = vrot.lane.b32.xlu1 %v791_v8, %s2300_s16  ;;  %v426_v8 = vmul.f32 %v425_v63, %v2503_v1 }
  0x9d   :  { %794 = vrot.lane.b32.xlu0 %v790_v9, %s2300_s16 }
  0xa0   :  { %832 = vrot.lane.b32.xlu1 %v827_v11, %s2301_s18 }
  0xa1   :  { %830 = vrot.lane.b32.xlu0 %v826_v12, %s2301_s18  ;;  %s2548_s18 = sld [smem:[#allocation3 + $0x1c]] }
  0xa4   :  { %850 = vrot.lane.b32.xlu1 %v845_v14, %s2300_s16 }
  0xa5   :  { %848 = vrot.lane.b32.xlu0 %v844_v15, %s2300_s16  ;;  %s2130_s16 = sld [smem:[#allocation3 + $0xb]] }
  0xb2   :  { %v2457_v16 = vpop.permute.xlu1 %165 }
  0xb3   :  { %v2459_v17 = vpop.permute.xlu0 %142 }
  0xb6   :  { %v2461_v18 = vpop.permute.xlu1 %167 }
  0xb7   :  { %v2463_v21 = vpop.permute.xlu0 %144 }
  0xba   :  { %v235_v25 = vpop.permute.xlu1 %234 }
  0xbb   :  { %v237_v28 = vrot.slane %v235_v25, 7  ;;  %v233_v29 = vpop.permute.xlu0 %232 }
  0xbc   :  { %v236_v31 = vrot.slane %v233_v29, 7 }
  0xbd   :  { %v239_v32 = vsel %vm148_vm4, %v237_v28, %v235_v25 }
  0xbe   :  { %v238_v34 = vsel %vm148_vm4, %v236_v31, %v233_v29  ;;  %v255_v35 = vpop.permute.xlu1 %254  ;;  %v243_v39 = vadd.f32 %v239_v32, %v221_v30 }
  0xbf   :  { %v257_v36 = vrot.slane %v255_v35, 7  ;;  %v253_v37 = vpop.permute.xlu0 %252  ;;  %v242_v41 = vadd.f32 %v238_v34, %v220_v33 }
  0xc0   :  { %v256_v40 = vrot.slane %v253_v37, 7 }
  0xc1   :  { %v259_v42 = vsel %vm171_vm5, %v257_v36, %v255_v35 }
  0xc2   :  { %v258_v43 = vsel %vm171_vm5, %v256_v40, %v253_v37  ;;  %v2475_v44 = vpop.permute.xlu1 %291  ;;  %v263_v45 = vadd.f32 %v259_v42, %v243_v39  ;;  %v591_v39 = vld [vmem:[#allocation2 + $0x12] ss:$4 sm:$0x7]  ;;  %v593_v40 = vstv %s2136_s14  ;;  %v590_v42 = vld [vmem:[#allocation2 + $0x2] ss:$4 sm:$0x7] }
  0xc3   :  { %v2477_v46 = vpop.permute.xlu0 %203  ;;  %v262_v47 = vadd.f32 %v258_v43, %v242_v41  ;;  %s2729_s14 = sld [smem:[#allocation5 + $0x1a]] }
  0xc4   :  { %268 = vrot.lane.b32.xlu1 %v263_v45, %s2304_s12 }
  0xc5   :  { %266 = vrot.lane.b32.xlu0 %v262_v47, %s2304_s12  ;;  %v595_v47 = vmul.f32 %v593_v40, %v591_v39 }
  0xc6   :  { %v2481_v48 = vpop.permute.xlu1 %205 }
  0xc7   :  { %3613 = vst [vmem:[#allocation14_spill] sm:$0xff] %v2481_v48  ;;  %v2483_v49 = vpop.permute.xlu0 %289  ;;  %v821_v48 = vstv %s2558_s19  ;;  %s2761_s19 = sld [smem:[#allocation5 + $0x12]] }
  0xca   :  { %v2485_v50 = vpop.permute.xlu1 %309 }
  0xcb   :  { %v2487_v52 = vpop.permute.xlu0 %307 }
  0xce   :  { %v2489_v54 = vpop.permute.xlu1 %346 }
  0xcf   :  { %v2491_v55 = vpop.permute.xlu0 %344 }
  0xd2   :  { %v2493_v56 = vpop.permute.xlu1 %388 }
  0xd3   :  { %v2495_v57 = vpop.permute.xlu0 %386 }
  0xd6   :  { %v2497_v58 = vpop.permute.xlu1 %410 }
  0xd7   :  { %v2499_v60 = vpop.permute.xlu0 %408 }
  0xda   :  { %v441_v0 = vpop.permute.xlu1 %440 }
  0xdb   :  { %v443_v3 = vrot.slane %v441_v0, 7  ;;  %v439_v4 = vpop.permute.xlu0 %438 }
  0xdc   :  { %v442_v6 = vrot.slane %v439_v4, 7 }
  0xdd   :  { %v445_v7 = vsel %vm148_vm4, %v443_v3, %v441_v0  ;;  %v594_v3 = vmul.f32 %v593_v40, %v590_v42 }
  0xde   :  { %v444_v9 = vsel %vm148_vm4, %v442_v6, %v439_v4  ;;  %v461_v10 = vpop.permute.xlu1 %460  ;;  %v449_v13 = vadd.f32 %v445_v7, %v427_v5 }
  0xdf   :  { %v463_v11 = vrot.slane %v461_v10, 7  ;;  %v459_v12 = vpop.permute.xlu0 %458  ;;  %v448_v15 = vadd.f32 %v444_v9, %v426_v8 }
  0xe0   :  { %v462_v14 = vrot.slane %v459_v12, 7 }
  0xe1   :  { %v465_v23 = vsel %vm171_vm5, %v463_v11, %v461_v10 }
  0xe2   :  { %v464_v25 = vsel %vm171_vm5, %v462_v14, %v459_v12  ;;  %v2511_v28 = vpop.permute.xlu1 %496  ;;  %v469_v29 = vadd.f32 %v465_v23, %v449_v13 }
  0xe3   :  { %v2513_v30 = vpop.permute.xlu0 %494  ;;  %v468_v31 = vadd.f32 %v464_v25, %v448_v15 }
  0xe4   :  { %474 = vrot.lane.b32.xlu1 %v469_v29, %s2304_s12 }
  0xe5   :  { %472 = vrot.lane.b32.xlu0 %v468_v31, %s2304_s12  ;;  %v3608_v31 = vstv %s2531_s0 }
  0xe6   :  { %v2517_v32 = vpop.permute.xlu1 %514  ;;  %v715_v40 = vmul.f32 %v3608_v31, %v2437_v51  ;;  %v653_v51 = vstv %s2543_s17  ;;  %s2747_s17 = sld [smem:[#allocation5 + $0x1c]] }
  0xe7   :  { %v2519_v33 = vpop.permute.xlu0 %512  ;;  %v2575_v31 = vmul.f32 %v653_v51, %v591_v39  ;;  %v348_v39 = vrot.slane %v2491_v55, 7 }
  0xea   :  { %v2521_v34 = vpop.permute.xlu1 %556 }
  0xeb   :  { %v2523_v35 = vpop.permute.xlu0 %554 }
  0xee   :  { %v2525_v36 = vpop.permute.xlu1 %578 }
  0xef   :  { %v2527_v37 = vpop.permute.xlu0 %576 }
  0xf2   :  { %v609_v41 = vpop.permute.xlu1 %608 }
  0xf3   :  { %v611_v43 = vrot.slane %v609_v41, 7  ;;  %v607_v45 = vpop.permute.xlu0 %606 }
  0xf4   :  { %v610_v63 = vrot.slane %v607_v45, 7 }
  0xf5   :  { %v613_v0 = vsel %vm148_vm4, %v611_v43, %v609_v41 }
  0xf6   :  { %v612_v4 = vsel %vm148_vm4, %v610_v63, %v607_v45  ;;  %v629_v5 = vpop.permute.xlu1 %628  ;;  %v617_v8 = vadd.f32 %v613_v0, %v595_v47  ;;  %v280_v47 = vstv %s2121_s15  ;;  %v294_v63 = vrot.slane %v2475_v44, 7  ;;  %s2739_s15 = sld [smem:[#allocation5 + $0x1b]] }
  0xf7   :  { %v631_v6 = vrot.slane %v629_v5, 7  ;;  %v627_v7 = vpop.permute.xlu0 %626  ;;  %v616_v10 = vadd.f32 %v612_v4, %v594_v3  ;;  %v293_v3 = vrot.slane %v2483_v49, 7  ;;  %v485_v4 = vstv %s2130_s16  ;;  %s2745_s16 = sld [smem:[#allocation5 + $0x11]] }
  0xf8   :  { %v630_v9 = vrot.slane %v627_v7, 7 }
  0xf9   :  { %v633_v11 = vsel %vm171_vm5, %v631_v6, %v629_v5  ;;  %v295_v2 = vsel %vm148_vm4, %v293_v3, %v2483_v49 }
  0xfa   :  { %v632_v12 = vsel %vm171_vm5, %v630_v9, %v627_v7  ;;  %v2535_v13 = vpop.permute.xlu1 %664  ;;  %v637_v14 = vadd.f32 %v633_v11, %v617_v8  ;;  %v312_v7 = vrot.slane %v2485_v50, 7  ;;  %v281_v11 = vmul.f32 %v280_v47, %v2467_v27 }
  0xfb   :  { %v2537_v15 = vpop.permute.xlu0 %662  ;;  %v636_v23 = vadd.f32 %v632_v12, %v616_v10  ;;  %v282_v10 = vmul.f32 %v280_v47, %v2465_v22  ;;  %v311_v12 = vrot.slane %v2487_v52, 7  ;;  %v2577_v22 = vmul.f32 %v653_v51, %v590_v42 }
  0xfc   :  { %642 = vrot.lane.b32.xlu1 %v637_v14, %s2304_s12  ;;  %v759_v14 = vld [vmem:[#allocation2 + $0x13] ss:$4 sm:$0x7]  ;;  %v299_v3 = vadd.f32 %v295_v2, %v281_v11 }
  0xfd   :  { %640 = vrot.lane.b32.xlu0 %v636_v23, %s2304_s12  ;;  %v761_v23 = vstv %s2548_s18  ;;  %v313_v49 = vsel %vm171_vm5, %v311_v12, %v2487_v52  ;;  %v517_v12 = vrot.slane %v2517_v32, 7  ;;  %s2751_s18 = sld [smem:[#allocation5 + $0x15]] }
  0xfe   :  { %v2541_v25 = vpop.permute.xlu1 %682 }
  0xff   :  { %v2545_v29 = vpop.permute.xlu0 %680 }
 0x102   :  { %v725_v41 = vpop.permute.xlu1 %724 }
 0x103   :  { %v727_v43 = vrot.slane %v725_v41, 1  ;;  %v2553_v45 = vpop.permute.xlu0 %722 }
 0x105   :  { %v729_v0 = vsel %vm148_vm4, %v725_v41, %v727_v43  ;;  %v487_v41 = vmul.f32 %v485_v4, %v2501_v62  ;;  %v486_v43 = vmul.f32 %v485_v4, %v2503_v1  ;;  %v349_v62 = vrot.slane %v2489_v54, 7 }
 0x106   :  { %v733_v5 = vadd.f32 %v729_v0, %v715_v40  ;;  %v747_v6 = vpop.permute.xlu1 %746  ;;  %v296_v40 = vsel %vm148_vm4, %v294_v63, %v2475_v44  ;;  %v314_v44 = vsel %vm171_vm5, %v312_v7, %v2485_v50  ;;  %v763_v1 = vmul.f32 %v761_v23, %v759_v14 }
 0x107   :  { %v749_v8 = vrot.slane %v747_v6, 7  ;;  %v2562_v9 = vpop.permute.xlu0 %744  ;;  %v498_v7 = vrot.slane %v2513_v30, 7  ;;  %v2594_v52 = vsel %vm350_vm6, %v349_v62, %v2489_v54 }
 0x109   :  { %v751_v0 = vsel %vm171_vm5, %v749_v8, %v747_v6  ;;  %v300_v6 = vadd.f32 %v296_v40, %v282_v10  ;;  %v762_v8 = vmul.f32 %v761_v23, %v758_v38  ;;  %v317_v10 = vadd.f32 %v313_v49, %v299_v3 }
 0x10a   :  { %v2579_v27 = vadd.f32 %v751_v0, %v733_v5  ;;  %v777_v47 = vpop.permute.xlu1 %776  ;;  %v499_v5 = vrot.slane %v2511_v28, 7  ;;  %v2599_v40 = vsel %vm350_vm6, %v348_v39, %v2491_v55  ;;  %v516_v23 = vrot.slane %v2519_v33, 7 }
 0x10b   :  { %v779_v63 = vrot.slane %v777_v47, 7  ;;  %v775_v4 = vpop.permute.xlu0 %774  ;;  %v318_v50 = vadd.f32 %v314_v44, %v300_v6  ;;  %v500_v62 = vsel %vm148_vm4, %v498_v7, %v2513_v30  ;;  %v666_v49 = vrot.slane %v2537_v15, 7 }
 0x10c   :  { %3614 = vst [vmem:[#allocation15_spill] sm:$0xff] %v2579_v27  ;;  %v778_v42 = vrot.slane %v775_v4, 7  ;;  %v685_v3 = vrot.slane %v2541_v25, 7  ;;  %v684_v30 = vrot.slane %v2545_v29, 7 }
 0x10d   :  { %v781_v51 = vsel %vm148_vm4, %v779_v63, %v777_v47  ;;  %v501_v63 = vsel %vm148_vm4, %v499_v5, %v2511_v28 }
 0x10e   :  { %v780_v0 = vsel %vm148_vm4, %v778_v42, %v775_v4  ;;  %v797_v27 = vpop.permute.xlu1 %796  ;;  %v785_v47 = vadd.f32 %v781_v51, %v763_v1  ;;  %v667_v4 = vrot.slane %v2535_v13, 7  ;;  %v519_v1 = vsel %vm171_vm5, %v517_v12, %v2517_v32 }
 0x10f   :  { %v799_v2 = vrot.slane %v797_v27, 7  ;;  %v795_v11 = vpop.permute.xlu0 %794  ;;  %v784_v6 = vadd.f32 %v780_v0, %v762_v8  ;;  %v505_v8 = vadd.f32 %v501_v63, %v487_v41  ;;  %v504_v0 = vadd.f32 %v500_v62, %v486_v43 }
 0x110   :  { %v798_v44 = vrot.slane %v795_v11, 7  ;;  %v822_v32 = vmul.f32 %v821_v48, %v758_v38  ;;  %v668_v41 = vsel %vm148_vm4, %v666_v49, %v2537_v15  ;;  %v687_v43 = vsel %vm171_vm5, %v685_v3, %v2541_v25 }
 0x111   :  { %v801_v54 = vsel %vm171_vm5, %v799_v2, %v797_v27  ;;  %v518_v27 = vsel %vm171_vm5, %v516_v23, %v2519_v33  ;;  %v669_v2 = vsel %vm148_vm4, %v667_v4, %v2535_v13  ;;  %v523_v12 = vadd.f32 %v519_v1, %v505_v8 }
 0x112   :  { %v805_v42 = vadd.f32 %v801_v54, %v785_v47  ;;  %v800_v55 = vsel %vm171_vm5, %v798_v44, %v795_v11  ;;  %v833_v39 = vpop.permute.xlu1 %832  ;;  %v823_v11 = vmul.f32 %v821_v48, %v759_v14  ;;  %v356_v33 = vmul.f32 %v2594_v52, %v318_v50 }
 0x113   :  { %v835_v28 = vrot.slane %v833_v39, 7  ;;  %v831_v5 = vpop.permute.xlu0 %830  ;;  %v804_v51 = vadd.f32 %v800_v55, %v784_v6  ;;  %v355_v23 = vmul.f32 %v2599_v40, %v317_v10  ;;  %v522_v44 = vadd.f32 %v518_v27, %v504_v0 }
 0x114   :  { %v834_v7 = vrot.slane %v831_v5, 7  ;;  %810 = vrot.lane.b32.xlu1 %v805_v42, %s2304_s12  ;;  %v673_v38 = vadd.f32 %v669_v2, %v2575_v31  ;;  %v686_v48 = vsel %vm171_vm5, %v684_v30, %v2545_v29  ;;  %v672_v50 = vadd.f32 %v668_v41, %v2577_v22 }
 0x115   :  { %808 = vrot.lane.b32.xlu0 %v804_v51, %s2304_s12  ;;  %v837_v63 = vsel %vm148_vm4, %v835_v28, %v833_v39  ;;  %v525_v25 = vmul.f32 %v523_v12, %v2594_v52  ;;  %v524_v31 = vmul.f32 %v522_v44, %v2599_v40  ;;  %v545_v28 = vstv %s2133_s23  ;;  %s2715_s12 = sld [smem:[#allocation5 + $0xe]] }
 0x116   :  { %v851_v47 = vpop.permute.xlu1 %850  ;;  %v836_v15 = vsel %vm148_vm4, %v834_v7, %v831_v5  ;;  %v691_v10 = vadd.f32 %v687_v43, %v673_v38  ;;  %v841_v6 = vadd.f32 %v837_v63, %v823_v11  ;;  %v690_v54 = vadd.f32 %v686_v48, %v672_v50  ;;  %s2789_s23 = sld [smem:[#allocation5 + $0x17]] }
 0x117   :  { %v853_v13 = vrot.slane %v851_v47, 7  ;;  %v849_v14 = vpop.permute.xlu0 %848  ;;  %v840_v62 = vadd.f32 %v836_v15, %v822_v32  ;;  %v146_v5 = vrot.slane %v2459_v17, 1  ;;  %v147_v51 = vrot.slane %v2463_v21, 1 }
 0x118   :  { %v852_v4 = vrot.slane %v849_v14, 7  ;;  %361 = vrot.lane.b32.xlu1 %v356_v33, %s2305_s20  ;;  %v693_v55 = vmul.f32 %v691_v10, %v2594_v52  ;;  %v692_v22 = vmul.f32 %v690_v54, %v2599_v40  ;;  %v169_v7 = vrot.slane %v2457_v16, 7 }
 0x119   :  { %359 = vrot.lane.b32.xlu0 %v355_v23, %s2305_s20  ;;  %v855_v49 = vsel %vm171_vm5, %v853_v13, %v851_v47  ;;  %v547_v2 = vmul.f32 %v545_v28, %v2419_v24  ;;  %v391_v11 = vrot.slane %v2493_v56, 1  ;;  %v559_v32 = vrot.slane %v2521_v34, 1 }
 0x11a   :  { %v854_v29 = vsel %vm171_vm5, %v852_v4, %v849_v14  ;;  %v859_v42 = vadd.f32 %v855_v49, %v841_v6  ;;  %v558_v24 = vrot.slane %v2523_v35, 1  ;;  %v3615_v12 = vstv %s2531_s0  ;;  %s2733_s0 = sld [smem:[#allocation5 + $0x14]] }
 0x11b   :  { %v858_v39 = vadd.f32 %v854_v29, %v840_v62  ;;  %v714_v41 = vmul.f32 %v3615_v12, %v2439_v53  ;;  %v726_v47 = vrot.slane %v2553_v45, 1  ;;  %v412_v33 = vrot.slane %v2499_v60, 7 }
 0x11c   :  { %530 = vrot.lane.b32.xlu1 %v525_v25, %s2305_s20  ;;  %v861_v1 = vmul.f32 %v859_v42, %v2594_v52  ;;  %v133_v52 = vstv %s132_s21  ;;  %v581_v23 = vrot.slane %v2525_v36, 7  ;;  %v393_v44 = vsel %vm148_vm4, %v2493_v56, %v391_v11  ;;  %v3616_v56 = vld [vmem:[#allocation14_spill] sm:$0xff]  ;;  %s2777_s21 = sld [smem:[#allocation5 + $0x13]] }
 0x11d   :  { %528 = vrot.lane.b32.xlu0 %v524_v31, %s2305_s20  ;;  %v860_v3 = vmul.f32 %v858_v39, %v2599_v40  ;;  %v377_v40 = vstv %s2124_s22  ;;  %v135_v8 = vmul.f32 %v133_v52, %v2369_v20  ;;  %v134_v27 = vmul.f32 %v133_v52, %v2367_v19  ;;  %s2783_s22 = sld [smem:[#allocation5 + $0x1d]] }
 0x11e   :  { %v379_v30 = vmul.f32 %v377_v40, %v2403_v59  ;;  %v378_v0 = vmul.f32 %v377_v40, %v2405_v61  ;;  %v546_v20 = vmul.f32 %v545_v28, %v2421_v26  ;;  %v149_v19 = vsel %vm148_vm4, %v2459_v17, %v146_v5 }
 0x11f   :  { %v390_v59 = vrot.slane %v2495_v57, 1  ;;  %v150_v61 = vsel %vm148_vm4, %v2463_v21, %v147_v51  ;;  %v172_v26 = vsel %vm171_vm5, %v169_v7, %v2457_v16  ;;  %v413_v17 = vrot.slane %v2497_v58, 7  ;;  %v3617_v51 = vld [vmem:[#allocation15_spill] sm:$0xff] }
 0x120   :  { %698 = vrot.lane.b32.xlu1 %v693_v55, %s2305_s20  ;;  %v153_v21 = vadd.f32 %v149_v19, %v134_v27  ;;  %v580_v53 = vrot.slane %v2527_v37, 7  ;;  %v748_v43 = vrot.slane %v2562_v9, 7  ;;  %v170_v16 = vrot.slane %v2461_v18, 7 }
 0x121   :  { %696 = vrot.lane.b32.xlu0 %v692_v22, %s2305_s20  ;;  %v154_v63 = vadd.f32 %v150_v61, %v135_v8  ;;  %v392_v13 = vsel %vm148_vm4, %v2495_v57, %v390_v59  ;;  %v561_v14 = vsel %vm148_vm4, %v2521_v34, %v559_v32  ;;  %v207_v38 = vrot.slane %v2477_v46, 7 }
 0x122   :  { %v208_v48 = vrot.slane %v3616_v56, 7  ;;  %v560_v15 = vsel %vm148_vm4, %v2523_v35, %v558_v24  ;;  %v728_v4 = vsel %vm148_vm4, %v2553_v45, %v726_v47  ;;  %v397_v50 = vadd.f32 %v393_v44, %v379_v30 }
 0x123   :  { %v415_v57 = vsel %vm171_vm5, %v413_v17, %v2497_v58  ;;  %v414_v34 = vsel %vm171_vm5, %v412_v33, %v2499_v60  ;;  %v583_v10 = vsel %vm171_vm5, %v581_v23, %v2525_v36  ;;  %v396_v6 = vadd.f32 %v392_v13, %v378_v0 }
 0x124   :  { %866 = vrot.lane.b32.xlu1 %v861_v1, %s2305_s20  ;;  %v565_v25 = vadd.f32 %v561_v14, %v547_v2  ;;  %v582_v35 = vsel %vm171_vm5, %v580_v53, %v2527_v37  ;;  %v750_v45 = vsel %vm171_vm5, %v748_v43, %v2562_v9  ;;  %v176_v54 = vadd.f32 %v172_v26, %v153_v21 }
 0x125   :  { %864 = vrot.lane.b32.xlu0 %v860_v3, %s2305_s20  ;;  %v564_v58 = vadd.f32 %v560_v15, %v546_v20  ;;  %v732_v62 = vadd.f32 %v728_v4, %v714_v41  ;;  %v210_v60 = vsel %vm209_vm7, %v207_v38, %v2477_v46  ;;  %v419_v36 = vadd.f32 %v415_v57, %v397_v50  ;;  %s2771_s20 = sld [smem:[#allocation5 + $0x16]] }
 0x126   :  { %v418_v31 = vadd.f32 %v414_v34, %v396_v6  ;;  %v587_v29 = vadd.f32 %v583_v10, %v565_v25  ;;  %v173_v37 = vsel %vm171_vm5, %v170_v16, %v2461_v18  ;;  %v211_v9 = vsel %vm209_vm7, %v208_v48, %v3616_v56 }
 0x127   :  { %v586_v55 = vadd.f32 %v582_v35, %v564_v58  ;;  %v754_v39 = vadd.f32 %v750_v45, %v732_v62  ;;  %v177_v22 = vadd.f32 %v173_v37, %v154_v63  ;;  %v2749_v46 = vmul.f32 %v210_v60, %v176_v54 }
 0x128   :  { %v2755_v3 = vmul.f32 %v419_v36, %v211_v9  ;;  %v2757_v52 = vmul.f32 %v418_v31, %v210_v60  ;;  %v2759_v28 = vmul.f32 %v587_v29, %v211_v9  ;;  %v2766_v8 = vmul.f32 %v3617_v51, %v211_v9 }
 0x129   :  { %v2753_v18 = vmul.f32 %v211_v9, %v177_v22  ;;  %v2763_v5 = vmul.f32 %v586_v55, %v210_v60  ;;  %v2768_v27 = vmul.f32 %v754_v39, %v210_v60  ;;  %v1035_v30 = vstv %s2640_s24  ;;  %s2958_s24 = sld [smem:[#allocation5 + $0x1e]] }
 0x12a   :  { %v1039_v7 = vstv %s2648_s1  ;;  %v877_v0 = vstv %s2642_s25  ;;  %v1188_v2 = vstv %s2644_s26  ;;  %v1341_v11 = vstv %s2646_s2  ;;  %s2306_s25 = smov 34   ;;  %s3036_s26 = sld [smem:[#allocation5 + $0x1f]] }
 0x12b   :  { %v1045_v19 = vstv %s2657_s30  ;;  %v881_v59 = vstv %s2650_s27  ;;  %v1192_v32 = vstv %s2652_s28  ;;  %v1345_v61 = vstv %s2654_s29  ;;  %s3433_s2 = sld [smem:[#allocation7]] }
 0x12c   :  { %v1051_v12 = vstv %s2678_s9  ;;  %v887_v41 = vstv %s2660_s6  ;;  %v1198_v47 = vstv %s2666_s7  ;;  %v1800_v26 = vstv %s2671_s8  ;;  %s3435_s1 = sld [smem:[#allocation8]] }
 0x12d   :  { %v893_v17 = vstv %s2687_s3  ;;  %v1204_v33 = vstv %s2700_s10  ;;  %v1804_v23 = vstv %s2694_s4  ;;  %v1494_v21 = vstv %s2707_s11  ;;  %s3439_s27 = sld [smem:[#allocation7 + $0x1]] }
 0x12e   :  { %v1351_v53 = vstv %s2715_s12  ;;  %v1357_v43 = vstv %s2723_s13  ;;  %v1810_v16 = vstv %s2729_s14  ;;  %v1647_v56 = vstv %s2733_s0  ;;  %s3441_s28 = sld [smem:[#allocation8 + $0x1]] }
 0x12f   :  { %v1816_v50 = vstv %s2739_s15  ;;  %v1498_v57 = vstv %s2745_s16  ;;  %v1651_v6 = vstv %s2751_s18  ;;  %v1953_v25 = vstv %s2747_s17  ;;  %s3445_s29 = sld [smem:[#allocation7 + $0x2]] }
 0x130   :  { %v1504_v45 = vstv %s2761_s19  ;;  %v1510_v54 = vstv %s2777_s21  ;;  %v1657_v58 = vstv %s2771_s20  ;;  %v1957_v29 = vstv %s2783_s22  ;;  %s3449_s30 = sld [smem:[#allocation8 + $0x2]] }
 0x131   :  { %v1663_v22 = vstv %s2789_s23  ;;  %s3452_s6 = sld [smem:[#allocation7 + $0x3]] }
 0x132   :  { %s3454_s7 = sld [smem:[#allocation7 + $0x4]] }
 0x133   :  { %s3460_s8 = sld [smem:[#allocation8 + $0x3]] }
 0x134   :  { %s3464_s9 = sld [smem:[#allocation8 + $0x4]] }
 0x135   :  { %s2191_s3 = sld [smem:[#allocation7 + $0x5]] }
 0x136   :  { %v2731_v49 = vpop.permute.xlu1 %268  ;;  %s2199_s4 = sld [smem:[#allocation7 + $0x6]] }
 0x137   :  { %v2737_v42 = vpop.permute.xlu0 %266  ;;  %v271_v44 = vrot.slane %v2731_v49, 1  ;;  %s3479_s10 = sld [smem:[#allocation8 + $0x6]] }
 0x138   :  { %v270_v63 = vrot.slane %v2737_v42, 1  ;;  %s2207_s11 = sld [smem:[#allocation7 + $0x7]] }
 0x139   :  { %v274_v35 = vsel %vm272_vm8, %v2731_v49, %v271_v44  ;;  %s2192_s12 = sld [smem:[#allocation8 + $0x5]] }
 0x13a   :  { %v273_v62 = vsel %vm272_vm8, %v2737_v42, %v270_v63  ;;  %v278_v49 = vadd.f32 %v274_v35, %v2753_v18  ;;  %s2208_s13 = sld [smem:[#allocation8 + $0x7]] }
 0x156   :  { %v475_v1 = vpop.permute.xlu1 %474 }
 0x157   :  { %v473_v40 = vpop.permute.xlu0 %472  ;;  %v477_v13 = vrot.slane %v475_v1, 1 }
 0x158   :  { %v476_v14 = vrot.slane %v473_v40, 1 }
 0x159   :  { %v479_v60 = vsel %vm272_vm8, %v475_v1, %v477_v13  ;;  %v277_v1 = vadd.f32 %v273_v62, %v2749_v46 }
 0x15a   :  { %v478_v36 = vsel %vm272_vm8, %v473_v40, %v476_v14  ;;  %v483_v40 = vadd.f32 %v479_v60, %v2755_v3 }
 0x16e   :  { %v643_v20 = vpop.permute.xlu1 %642 }
 0x16f   :  { %v641_v24 = vpop.permute.xlu0 %640  ;;  %v645_v48 = vrot.slane %v643_v20, 1 }
 0x170   :  { %v644_v15 = vrot.slane %v641_v24, 1 }
 0x171   :  { %v647_v37 = vsel %vm272_vm8, %v643_v20, %v645_v48  ;;  %v482_v20 = vadd.f32 %v478_v36, %v2757_v52 }
 0x172   :  { %v646_v9 = vsel %vm272_vm8, %v641_v24, %v644_v15  ;;  %v651_v63 = vadd.f32 %v647_v37, %v2759_v28 }
 0x173   :  { %v650_v18 = vadd.f32 %v646_v9, %v2763_v5 }
 0x186   :  { %v811_v38 = vpop.permute.xlu1 %810 }
 0x187   :  { %v809_v4 = vpop.permute.xlu0 %808  ;;  %v813_v34 = vrot.slane %v811_v38, 1 }
 0x188   :  { %v812_v10 = vrot.slane %v809_v4, 1 }
 0x189   :  { %v815_v51 = vsel %vm272_vm8, %v811_v38, %v813_v34 }
 0x18a   :  { %v362_v31 = vpop.permute.xlu1 %361  ;;  %v814_v44 = vsel %vm272_vm8, %v809_v4, %v812_v10  ;;  %v819_v38 = vadd.f32 %v815_v51, %v2766_v8 }
 0x18b   :  { %v364_v55 = vrot.slane %v362_v31, 1  ;;  %v360_v39 = vpop.permute.xlu0 %359  ;;  %v818_v3 = vadd.f32 %v814_v44, %v2768_v27 }
 0x18c   :  { %v363_v42 = vrot.slane %v360_v39, 1 }
 0x18d   :  { %v367_v24 = vsel %vm365_vm9, %v362_v31, %v364_v55 }
 0x18e   :  { %v2827_v13 = vadd.f32 %v367_v24, %v278_v49  ;;  %v366_v14 = vsel %vm365_vm9, %v360_v39, %v363_v42  ;;  %v531_v46 = vpop.permute.xlu1 %530 }
 0x18f   :  { %v2832_v52 = vadd.f32 %v366_v14, %v277_v1  ;;  %v533_v48 = vrot.slane %v531_v46, 1  ;;  %v529_v15 = vpop.permute.xlu0 %528 }
 0x190   :  { %v532_v28 = vrot.slane %v529_v15, 1  ;;  %v1037_v5 = vmul.f32 %v1035_v30, %v2827_v13  ;;  %v879_v4 = vmul.f32 %v877_v0, %v2827_v13  ;;  %v1190_v8 = vmul.f32 %v1188_v2, %v2827_v13 }
 0x191   :  { %v535_v27 = vsel %vm365_vm9, %v531_v46, %v533_v48  ;;  %v1036_v34 = vmul.f32 %v1035_v30, %v2832_v52  ;;  %v878_v10 = vmul.f32 %v877_v0, %v2832_v52  ;;  %v1189_v35 = vmul.f32 %v1188_v2, %v2832_v52 }
 0x192   :  { %v2853_v62 = vadd.f32 %v535_v27, %v483_v40  ;;  %v534_v60 = vsel %vm365_vm9, %v529_v15, %v532_v28  ;;  %v699_v36 = vpop.permute.xlu1 %698  ;;  %v1342_v31 = vmul.f32 %v1341_v11, %v2832_v52  ;;  %v2862_v30 = vmul.f32 %v1341_v11, %v2827_v13 }
 0x193   :  { %v2864_v37 = vadd.f32 %v534_v60, %v482_v20  ;;  %v701_v0 = vrot.slane %v699_v36, 1  ;;  %v697_v9 = vpop.permute.xlu0 %696  ;;  %v2869_v2 = vmul.f32 %v1800_v26, %v2832_v52  ;;  %v2874_v55 = vmul.f32 %v1800_v26, %v2827_v13 }
 0x194   :  { %v700_v39 = vrot.slane %v697_v9, 1  ;;  %v1041_v49 = vmul.f32 %v1039_v7, %v2853_v62  ;;  %v883_v11 = vmul.f32 %v881_v59, %v2853_v62  ;;  %v1194_v51 = vmul.f32 %v1192_v32, %v2853_v62 }
 0x195   :  { %v703_v44 = vsel %vm365_vm9, %v699_v36, %v701_v0  ;;  %v1040_v42 = vmul.f32 %v1039_v7, %v2864_v37  ;;  %v882_v26 = vmul.f32 %v881_v59, %v2864_v37  ;;  %v1193_v1 = vmul.f32 %v1192_v32, %v2864_v37 }
 0x196   :  { %v2895_v40 = vadd.f32 %v703_v44, %v651_v63  ;;  %v702_v20 = vsel %vm365_vm9, %v697_v9, %v700_v39  ;;  %v867_v24 = vpop.permute.xlu1 %866  ;;  %v1043_v14 = vadd.f32 %v1041_v49, %v1037_v5  ;;  %v885_v46 = vadd.f32 %v883_v11, %v879_v4 }
 0x197   :  { %v2898_v48 = vadd.f32 %v702_v20, %v650_v18  ;;  %v869_v15 = vrot.slane %v867_v24, 1  ;;  %v865_v28 = vpop.permute.xlu0 %864  ;;  %v1042_v7 = vadd.f32 %v1040_v42, %v1036_v34  ;;  %v884_v27 = vadd.f32 %v882_v26, %v878_v10 }
 0x198   :  { %v868_v59 = vrot.slane %v865_v28, 1  ;;  %v1047_v32 = vmul.f32 %v1045_v19, %v2895_v40  ;;  %v889_v63 = vmul.f32 %v887_v41, %v2895_v40  ;;  %v1195_v60 = vadd.f32 %v1193_v1, %v1189_v35 }
 0x199   :  { %v871_v18 = vsel %vm365_vm9, %v867_v24, %v869_v15  ;;  %v1046_v5 = vmul.f32 %v1045_v19, %v2898_v48  ;;  %v888_v4 = vmul.f32 %v887_v41, %v2898_v48  ;;  %v1196_v34 = vadd.f32 %v1194_v51, %v1190_v8 }
 0x19a   :  { %v2913_v10 = vadd.f32 %v871_v18, %v819_v38  ;;  %v870_v36 = vsel %vm365_vm9, %v865_v28, %v868_v59  ;;  %v1049_v0 = vadd.f32 %v1047_v32, %v1043_v14  ;;  %v891_v9 = vadd.f32 %v889_v63, %v885_v46 }
 0x19b   :  { %v2916_v35 = vadd.f32 %v870_v36, %v818_v3  ;;  %v1048_v39 = vadd.f32 %v1046_v5, %v1042_v7  ;;  %v890_v49 = vadd.f32 %v888_v4, %v884_v27  ;;  %v1199_v19 = vmul.f32 %v1198_v47, %v2898_v48 }
 0x19c   :  { %v1053_v41 = vmul.f32 %v1051_v12, %v2913_v10  ;;  %v895_v38 = vmul.f32 %v893_v17, %v2913_v10  ;;  %v1200_v8 = vmul.f32 %v1198_v47, %v2895_v40  ;;  %v1206_v11 = vmul.f32 %v1204_v33, %v2913_v10 }
 0x19d   :  { %v1052_v3 = vmul.f32 %v1051_v12, %v2916_v35  ;;  %v894_v51 = vmul.f32 %v893_v17, %v2916_v35  ;;  %v1201_v44 = vadd.f32 %v1199_v19, %v1195_v60  ;;  %v1205_v42 = vmul.f32 %v1204_v33, %v2916_v35  ;;  %v3618_v60 = vld [vmem:[#allocation13_spill] sm:$0xff] }
 0x19e   :  { %v2942_v26 = vadd.f32 %v1053_v41, %v1049_v0  ;;  %v2944_v1 = vadd.f32 %v895_v38, %v891_v9  ;;  %v1202_v47 = vadd.f32 %v1200_v8, %v1196_v34  ;;  %v1346_v20 = vmul.f32 %v1345_v61, %v2864_v37 }
 0x19f   :  { %v2949_v24 = vadd.f32 %v1052_v3, %v1048_v39  ;;  %v2951_v12 = vadd.f32 %v894_v51, %v890_v49  ;;  %v2953_v17 = vadd.f32 %v1205_v42, %v1201_v44  ;;  %v1347_v33 = vmul.f32 %v1345_v61, %v2853_v62 }
 0x1a0   :  { %v2960_v14 = vadd.f32 %v1206_v11, %v1202_v47  ;;  %v1348_v46 = vadd.f32 %v1346_v20, %v1342_v31  ;;  %v1352_v15 = vmul.f32 %v1351_v53, %v2898_v48  ;;  %v1353_v28 = vmul.f32 %v1351_v53, %v2895_v40 }
 0x1a1   :  { %v1058_v7 = vcombine.low %v2949_v24, %v2942_v26  ;;  %v900_v27 = vcombine.low %v2951_v12, %v2944_v1  ;;  %v1349_v61 = vadd.f32 %v1347_v33, %v2862_v30  ;;  %v1358_v59 = vmul.f32 %v1357_v43, %v2916_v35 }
 0x1a2   :  { %v1211_v31 = vcombine.low %v2953_v17, %v2960_v14  ;;  %v1354_v32 = vadd.f32 %v1352_v15, %v1348_v46  ;;  %v1359_v53 = vmul.f32 %v1357_v43, %v2913_v10  ;;  %v1805_v63 = vmul.f32 %v1804_v23, %v2864_v37 }
 0x1a3   :  { %v2985_v18 = vrot.slane %v1058_v7, %v3618_v60  ;;  %v2988_v30 = vrot.slane %v900_v27, %v3618_v60  ;;  %v1355_v5 = vadd.f32 %v1353_v28, %v1349_v61  ;;  %v1806_v4 = vmul.f32 %v1804_v23, %v2853_v62 }
 0x1a4   :  { %v2994_v34 = vrot.slane %v1211_v31, %v3618_v60  ;;  %v2996_v36 = vadd.f32 %v1358_v59, %v1354_v32  ;;  %v1807_v43 = vadd.f32 %v1805_v63, %v2869_v2  ;;  %v1811_v0 = vmul.f32 %v1810_v16, %v2898_v48 }
 0x1a5   :  { %v3004_v9 = vrot.slane %v2985_v18, %v3618_v60  ;;  %v3008_v23 = vrot.slane %v2988_v30, %v3618_v60  ;;  %v3010_v39 = vadd.f32 %v1359_v53, %v1355_v5  ;;  %v1808_v49 = vadd.f32 %v1806_v4, %v2874_v55 }
 0x1a6   :  { %v3015_v2 = vrot.slane %v2994_v34, %v3618_v60  ;;  %v1812_v19 = vmul.f32 %v1810_v16, %v2895_v40  ;;  %v1813_v41 = vadd.f32 %v1811_v0, %v1807_v43  ;;  %v1817_v38 = vmul.f32 %v1816_v50, %v2916_v35 }
 0x1a7   :  { %1082 = vrot.lane.b32.xlu1 %v3004_v9, %s2306_s25  ;;  %924 = vrot.lane.b32.xlu0 %v3008_v23, %s2306_s25  ;;  %v1364_v55 = vcombine.low %v2996_v36, %v3010_v39  ;;  %v1818_v16 = vmul.f32 %v1816_v50, %v2913_v10  ;;  %v1495_v8 = vmul.f32 %v1494_v21, %v2832_v52  ;;  %v1963_v11 = vstv %s2958_s24 }
 0x1a8   :  { %v1814_v3 = vadd.f32 %v1812_v19, %v1808_v49  ;;  %v3038_v51 = vadd.f32 %v1817_v38, %v1813_v41  ;;  %v1496_v44 = vmul.f32 %v1494_v21, %v2827_v13  ;;  %v1499_v42 = vmul.f32 %v1498_v57, %v2864_v37 }
 0x1a9   :  { %v3047_v50 = vrot.slane %v1364_v55, %v3618_v60  ;;  %v1500_v47 = vmul.f32 %v1498_v57, %v2853_v62  ;;  %v1505_v20 = vmul.f32 %v1504_v45, %v2898_v48  ;;  %v1506_v33 = vmul.f32 %v1504_v45, %v2895_v40 }
 0x1aa   :  { %v3058_v46 = vadd.f32 %v1818_v16, %v1814_v3  ;;  %v1501_v21 = vadd.f32 %v1499_v42, %v1495_v8  ;;  %v1511_v15 = vmul.f32 %v1510_v54, %v2916_v35  ;;  %v1512_v28 = vmul.f32 %v1510_v54, %v2913_v10 }
 0x1ab   :  { %1235 = vrot.lane.b32.xlu1 %v3015_v2, %s2306_s25  ;;  %v3070_v57 = vrot.slane %v3047_v50, %v3618_v60  ;;  %v1502_v45 = vadd.f32 %v1500_v47, %v1496_v44  ;;  %v1648_v7 = vmul.f32 %v1647_v56, %v2832_v52  ;;  %v1649_v27 = vmul.f32 %v1647_v56, %v2827_v13 }
 0x1ac   :  { %v1823_v61 = vcombine.low %v3038_v51, %v3058_v46  ;;  %v1507_v54 = vadd.f32 %v1505_v20, %v1501_v21  ;;  %v1652_v59 = vmul.f32 %v1651_v6, %v2864_v37  ;;  %v1653_v31 = vmul.f32 %v1651_v6, %v2853_v62 }
 0x1ad   :  { %1388 = vrot.lane.b32.xlu0 %v3070_v57, %s2306_s25  ;;  %v1508_v32 = vadd.f32 %v1506_v33, %v1502_v45  ;;  %v1658_v53 = vmul.f32 %v1657_v58, %v2898_v48  ;;  %v1659_v56 = vmul.f32 %v1657_v58, %v2895_v40  ;;  %v1664_v63 = vmul.f32 %v1663_v22, %v2916_v35 }
 0x1ae   :  { %v3098_v5 = vrot.slane %v1823_v61, %v3618_v60  ;;  %v3100_v6 = vadd.f32 %v1511_v15, %v1507_v54  ;;  %v1654_v4 = vadd.f32 %v1652_v59, %v1648_v7  ;;  %v1655_v43 = vadd.f32 %v1653_v31, %v1649_v27 }
 0x1af   :  { %v3102_v0 = vadd.f32 %v1512_v28, %v1508_v32  ;;  %v1665_v49 = vmul.f32 %v1663_v22, %v2913_v10  ;;  %v908_v58 = vcombine.high %v2988_v30, %v2988_v30  ;;  %v1969_v19 = vstv %s3036_s26 }
 0x1b0   :  { %v3112_v41 = vrot.slane %v3098_v5, %v3618_v60  ;;  %v1660_v38 = vadd.f32 %v1658_v53, %v1654_v4  ;;  %v1661_v55 = vadd.f32 %v1659_v56, %v1655_v43  ;;  %v1954_v16 = vmul.f32 %v1953_v25, %v2832_v52 }
 0x1b1   :  { %v1517_v8 = vcombine.low %v3100_v6, %v3102_v0  ;;  %v1955_v3 = vmul.f32 %v1953_v25, %v2827_v13  ;;  %v1958_v22 = vmul.f32 %v1957_v29, %v2864_v37  ;;  %v1959_v30 = vmul.f32 %v1957_v29, %v2853_v62 }
 0x1b2   :  { %1847 = vrot.lane.b32.xlu1 %v3112_v41, %s2306_s25  ;;  %v3130_v44 = vadd.f32 %v1664_v63, %v1660_v38  ;;  %v3132_v42 = vadd.f32 %v1665_v49, %v1661_v55  ;;  %v1964_v52 = vmul.f32 %v1963_v11, %v2898_v48  ;;  %v1965_v47 = vmul.f32 %v1963_v11, %v2895_v40 }
 0x1b3   :  { %v1524_v20 = vrot.slane %v1517_v8, %v3618_v60  ;;  %v1960_v25 = vadd.f32 %v1958_v22, %v1954_v16  ;;  %v1961_v13 = vadd.f32 %v1959_v30, %v1955_v3  ;;  %v1970_v37 = vmul.f32 %v1969_v19, %v2916_v35 }
 0x1b4   :  { %v1670_v29 = vcombine.low %v3130_v44, %v3132_v42  ;;  %v922_v62 = vrot.slane %v908_v58, %v3618_v60  ;;  %v1971_v33 = vmul.f32 %v1969_v19, %v2913_v10  ;;  %v1066_v21 = vcombine.high %v2985_v18, %v2985_v18 }
 0x1b5   :  { %v1532_v48 = vrot.slane %v1524_v20, %v3618_v60  ;;  %v1966_v15 = vadd.f32 %v1964_v52, %v1960_v25  ;;  %v1967_v40 = vadd.f32 %v1965_v47, %v1961_v13  ;;  %v1081_v27 = vcombine.high %v3004_v9, %v3004_v9 }
 0x1b6   :  { %v1677_v11 = vrot.slane %v1670_v29, %v3618_v60  ;;  %926 = vrot.lane.b32.xlu1 %v922_v62, %s2306_s25  ;;  %v1080_v45 = vrot.slane %v1066_v21, %v3618_v60  ;;  %v1219_v61 = vcombine.high %v2994_v34, %v2994_v34  ;;  %v923_v31 = vcombine.high %v3008_v23, %v3008_v23 }
 0x1b7   :  { %1541 = vrot.lane.b32.xlu0 %v1532_v48, %s2306_s25  ;;  %v3148_v35 = vadd.f32 %v1970_v37, %v1966_v15  ;;  %v3150_v28 = vadd.f32 %v1971_v33, %v1967_v40  ;;  %v1372_v32 = vcombine.high %v3047_v50, %v3047_v50  ;;  %v1234_v34 = vcombine.high %v3015_v2, %v3015_v2 }
 0x1b8   :  { %v1685_v10 = vrot.slane %v1677_v11, %v3618_v60  ;;  %v1233_v59 = vrot.slane %v1219_v61, %v3618_v60  ;;  %v1387_v23 = vcombine.high %v3070_v57, %v3070_v57  ;;  %v1525_v56 = vcombine.high %v1524_v20, %v1524_v20 }
 0x1b9   :  { %v1976_v18 = vcombine.low %v3148_v35, %v3150_v28  ;;  %v1386_v9 = vrot.slane %v1372_v32, %v3618_v60  ;;  %v1540_v2 = vcombine.high %v1532_v48, %v1532_v48  ;;  %v1678_v63 = vcombine.high %v1677_v11, %v1677_v11 }
 0x1ba   :  { %1084 = vrot.lane.b32.xlu1 %v1080_v45, %s2306_s25  ;;  %v1539_v50 = vrot.slane %v1525_v56, %v3618_v60  ;;  %v1693_v43 = vcombine.high %v1685_v10, %v1685_v10  ;;  %v1831_v57 = vcombine.high %v3098_v5, %v3098_v5  ;;  %v1846_v58 = vcombine.high %v3112_v41, %v3112_v41 }
 0x1bb   :  { %1694 = vrot.lane.b32.xlu0 %v1685_v10, %s2306_s25  ;;  %v1983_v7 = vrot.slane %v1976_v18, %v3618_v60  ;;  %v1692_v4 = vrot.slane %v1678_v63, %v3618_v60 }
 0x1bc   :  { %v1845_v49 = vrot.slane %v1831_v57, %v3618_v60 }
 0x1bd   :  { %v1991_v54 = vrot.slane %v1983_v7, %v3618_v60  ;;  %v1984_v19 = vcombine.high %v1983_v7, %v1983_v7 }
 0x1be   :  { %1086 = vrot.lane.b32.xlu1 %v1081_v27, %s2306_s25 }
 0x1bf   :  { %2000 = vrot.lane.b32.xlu0 %v1991_v54, %s2306_s25  ;;  %v1999_v53 = vcombine.high %v1991_v54, %v1991_v54  ;;  %v1998_v38 = vrot.slane %v1984_v19, %v3618_v60 }
 0x1c2   :  { %1237 = vrot.lane.b32.xlu1 %v1233_v59, %s2306_s25 }
 0x1c3   :  { %928 = vrot.lane.b32.xlu0 %v923_v31, %s2306_s25 }
 0x1c6   :  { %1239 = vrot.lane.b32.xlu1 %v1234_v34, %s2306_s25 }
 0x1c7   :  { %1390 = vrot.lane.b32.xlu0 %v1386_v9, %s2306_s25 }
 0x1ca   :  { %2004 = vrot.lane.b32.xlu1 %v1999_v53, %s2306_s25 }
 0x1cb   :  { %1392 = vrot.lane.b32.xlu0 %v1387_v23, %s2306_s25 }
 0x1cf   :  { %1543 = vrot.lane.b32.xlu0 %v1539_v50, %s2306_s25 }
 0x1d3   :  { %1545 = vrot.lane.b32.xlu0 %v1540_v2, %s2306_s25 }
 0x1d7   :  { %1696 = vrot.lane.b32.xlu0 %v1692_v4, %s2306_s25 }
 0x1db   :  { %1698 = vrot.lane.b32.xlu0 %v1693_v43, %s2306_s25 }
 0x1df   :  { %1849 = vrot.lane.b32.xlu0 %v1845_v49, %s2306_s25 }
 0x1e3   :  { %1851 = vrot.lane.b32.xlu0 %v1846_v58, %s2306_s25 }
 0x1e7   :  { %2002 = vrot.lane.b32.xlu0 %v1998_v38, %s2306_s25 }
 0x219   :  { %v1083_v55 = vpop.permute.xlu1 %1082  ;;  %v925_v16 = vpop.permute.xlu0 %924 }
 0x21d   :  { %v1236_v8 = vpop.permute.xlu1 %1235 }
 0x21f   :  { %v1389_v5 = vpop.permute.xlu0 %1388 }
 0x224   :  { %v1848_v3 = vpop.permute.xlu1 %1847 }
 0x228   :  { %v927_v22 = vpop.permute.xlu1 %926 }
 0x229   :  { %v1542_v30 = vpop.permute.xlu0 %1541  ;;  %v931_v41 = vsel %vm930_vm10, %v925_v16, %v927_v22 }
 0x22a   :  { %v936_v33 = vsel %vm935_vm11, %v931_v41, 0.0 }
 0x22c   :  { %v1085_v52 = vpop.permute.xlu1 %1084 }
 0x22d   :  { %v1695_v47 = vpop.permute.xlu0 %1694  ;;  %v1088_v48 = vsel %vm930_vm10, %v1083_v55, %v1085_v52 }
 0x22e   :  { %v1092_v7 = vsel %vm935_vm11, %v1088_v48, 0.0 }
 0x230   :  { %v1087_v20 = vpop.permute.xlu1 %1086 }
 0x231   :  { %v2001_v25 = vpop.permute.xlu0 %2000  ;;  %v1089_v62 = vsel %vm930_vm10, %v1085_v52, %v1087_v20 }
 0x232   :  { %v1093_v10 = vsel %vm935_vm11, %v1089_v62, 0.0 }
 0x233   :  { %v1094_v54 = vadd.f32 %v1093_v10, %v1092_v7 }
 0x234   :  { %v1238_v13 = vpop.permute.xlu1 %1237 }
 0x235   :  { %v929_v37 = vpop.permute.xlu0 %928  ;;  %v1241_v18 = vsel %vm930_vm10, %v1236_v8, %v1238_v13 }
 0x236   :  { %v932_v29 = vsel %vm930_vm10, %v927_v22, %v929_v37  ;;  %v1245_v31 = vsel %vm935_vm11, %v1241_v18, 0.0 }
 0x237   :  { %v937_v21 = vsel %vm935_vm11, %v932_v29, 0.0 }
 0x238   :  { %v938_v15 = vadd.f32 %v937_v21, %v936_v33  ;;  %v1240_v40 = vpop.permute.xlu1 %1239 }
 0x239   :  { %v1391_v11 = vpop.permute.xlu0 %1390  ;;  %v1242_v45 = vsel %vm930_vm10, %v1238_v13, %v1240_v40 }
 0x23a   :  { %939 = vadd.xlane.f32.xlu1 %v938_v15  ;;  %v1246_v27 = vsel %vm935_vm11, %v1242_v45, 0.0  ;;  %v1394_v61 = vsel %vm930_vm10, %v1389_v5, %v1391_v11 }
 0x23b   :  { %v1247_v34 = vadd.f32 %v1246_v27, %v1245_v31  ;;  %v1398_v9 = vsel %vm935_vm11, %v1394_v61, 0.0 }
 0x23c   :  { %v2005_v13 = vpop.permute.xlu1 %2004 }
 0x23d   :  { %v1393_v59 = vpop.permute.xlu0 %1392 }
 0x23e   :  { %v1395_v32 = vsel %vm930_vm10, %v1391_v11, %v1393_v59  ;;  %1095 = vadd.xlane.f32.xlu1 %v1094_v54 }
 0x23f   :  { %v1399_v53 = vsel %vm935_vm11, %v1395_v32, 0.0 }
 0x240   :  { %v1400_v23 = vadd.f32 %v1399_v53, %v1398_v9 }
 0x241   :  { %v1544_v56 = vpop.permute.xlu0 %1543 }
 0x242   :  { %1401 = vadd.xlane.f32.xlu0 %v1400_v23  ;;  %1248 = vadd.xlane.f32.xlu1 %v1247_v34  ;;  %v1547_v50 = vsel %vm930_vm10, %v1542_v30, %v1544_v56 }
 0x243   :  { %v1551_v4 = vsel %vm935_vm11, %v1547_v50, 0.0 }
 0x245   :  { %v1546_v2 = vpop.permute.xlu0 %1545 }
 0x246   :  { %v1548_v63 = vsel %vm930_vm10, %v1544_v56, %v1546_v2 }
 0x247   :  { %v1552_v43 = vsel %vm935_vm11, %v1548_v63, 0.0 }
 0x248   :  { %v1553_v57 = vadd.f32 %v1552_v43, %v1551_v4 }
 0x249   :  { %v1697_v49 = vpop.permute.xlu0 %1696 }
 0x24a   :  { %1554 = vadd.xlane.f32.xlu0 %v1553_v57  ;;  %v1700_v58 = vsel %vm930_vm10, %v1695_v47, %v1697_v49 }
 0x24b   :  { %v1704_v55 = vsel %vm935_vm11, %v1700_v58, 0.0 }
 0x24d   :  { %v1699_v19 = vpop.permute.xlu0 %1698 }
 0x24e   :  { %v1701_v38 = vsel %vm930_vm10, %v1697_v49, %v1699_v19 }
 0x24f   :  { %v1705_v16 = vsel %vm935_vm11, %v1701_v38, 0.0 }
 0x250   :  { %v1706_v8 = vadd.f32 %v1705_v16, %v1704_v55 }
 0x251   :  { %v1850_v5 = vpop.permute.xlu0 %1849 }
 0x252   :  { %1707 = vadd.xlane.f32.xlu1 %v1706_v8  ;;  %v1853_v22 = vsel %vm930_vm10, %v1848_v3, %v1850_v5 }
 0x253   :  { %v1857_v20 = vsel %vm935_vm11, %v1853_v22, 0.0 }
 0x255   :  { %v1852_v30 = vpop.permute.xlu0 %1851 }
 0x256   :  { %v1854_v52 = vsel %vm930_vm10, %v1850_v5, %v1852_v30 }
 0x257   :  { %v1858_v41 = vsel %vm935_vm11, %v1854_v52, 0.0 }
 0x258   :  { %v1859_v47 = vadd.f32 %v1858_v41, %v1857_v20 }
 0x259   :  { %v2003_v37 = vpop.permute.xlu0 %2002 }
 0x25a   :  { %v2006_v29 = vsel %vm930_vm10, %v2001_v25, %v2003_v37  ;;  %v2007_v62 = vsel %vm930_vm10, %v2003_v37, %v2005_v13  ;;  %1860 = vadd.xlane.f32.xlu0 %v1859_v47 }
 0x25b   :  { %v2010_v33 = vsel %vm935_vm11, %v2006_v29, 0.0  ;;  %v2011_v21 = vsel %vm935_vm11, %v2007_v62, 0.0 }
 0x25c   :  { %v2012_v3 = vadd.f32 %v2011_v21, %v2010_v33 }
 0x25e   :  { %2013 = vadd.xlane.f32.xlu1 %v2012_v3 }
 0x2c3   :  { %v940_v48 = vpop.xlane.xlu1 %939 }
 0x2c4   :  { %v941_v15 = vsel %vm935_vm11, %v940_v48, 0.0 }
 0x2c5   :  { %v942_v40 = vrot.slane %v941_v15, 4 }
 0x2c7   :  { %v943_v11 = vadd.f32 %v942_v40, %v941_v15  ;;  %v1096_v45 = vpop.xlane.xlu1 %1095 }
 0x2c8   :  { %v1097_v10 = vsel %vm935_vm11, %v1096_v45, 0.0 }
 0x2c9   :  { %v944_v18 = vrot.slane %v943_v11, 2  ;;  %v1098_v7 = vrot.slane %v1097_v10, 4 }
 0x2cb   :  { %v945_v25 = vadd.f32 %v944_v18, %v943_v11  ;;  %v1099_v27 = vadd.f32 %v1098_v7, %v1097_v10  ;;  %v1402_v61 = vpop.xlane.xlu0 %1401  ;;  %v1249_v54 = vpop.xlane.xlu1 %1248 }
 0x2cc   :  { %v1403_v59 = vsel %vm935_vm11, %v1402_v61, 0.0  ;;  %v1250_v31 = vsel %vm935_vm11, %v1249_v54, 0.0 }
 0x2cd   :  { %v946_v32 = vrot.slane %v945_v25, 1  ;;  %v1100_v34 = vrot.slane %v1099_v27, 2  ;;  %v1404_v9 = vrot.slane %v1403_v59, 4  ;;  %v1251_v53 = vrot.slane %v1250_v31, 4 }
 0x2cf   :  { %v947_v23 = vadd.f32 %v946_v32, %v945_v25  ;;  %v1101_v56 = vadd.f32 %v1100_v34, %v1099_v27  ;;  %v1405_v50 = vadd.f32 %v1404_v9, %v1403_v59  ;;  %v1252_v2 = vadd.f32 %v1251_v53, %v1250_v31 }
 0x2d1   :  { %v948_v63 = vmul.f32 0.001953125, %v947_v23  ;;  %v1102_v4 = vrot.slane %v1101_v56, 1  ;;  %v1406_v43 = vrot.slane %v1405_v50, 2  ;;  %v1253_v57 = vrot.slane %v1252_v2, 2 }
 0x2d3   :  { %v3234_v49 = vsub.f32 %v2951_v12, %v948_v63  ;;  %v3237_v58 = vsub.f32 %v2944_v1, %v948_v63  ;;  %v1103_v19 = vadd.f32 %v1102_v4, %v1101_v56  ;;  %v1407_v38 = vadd.f32 %v1406_v43, %v1405_v50  ;;  %v1555_v55 = vpop.xlane.xlu0 %1554 }
 0x2d4   :  { %v1254_v16 = vadd.f32 %v1253_v57, %v1252_v2  ;;  %v1556_v8 = vsel %vm935_vm11, %v1555_v55, 0.0 }
 0x2d5   :  { %v951_v5 = vmul.f32 %v3234_v49, %v3234_v49  ;;  %v952_v22 = vmul.f32 %v3237_v58, %v3237_v58  ;;  %v1104_v30 = vmul.f32 0.001953125, %v1103_v19  ;;  %v1408_v52 = vrot.slane %v1407_v38, 1 }
 0x2d6   :  { %v1255_v20 = vrot.slane %v1254_v16, 1  ;;  %v1557_v12 = vrot.slane %v1556_v8, 4 }
 0x2d7   :  { %v3245_v41 = vsub.f32 %v2949_v24, %v1104_v30  ;;  %v3248_v1 = vsub.f32 %v2942_v26, %v1104_v30  ;;  %v1409_v47 = vadd.f32 %v1408_v52, %v1407_v38  ;;  %v955_v13 = vcombine.low %v951_v5, %v952_v22 }
 0x2d8   :  { %v1256_v37 = vadd.f32 %v1255_v20, %v1254_v16  ;;  %v1558_v29 = vadd.f32 %v1557_v12, %v1556_v8 }
 0x2d9   :  { %v1107_v62 = vmul.f32 %v3245_v41, %v3245_v41  ;;  %v1108_v33 = vmul.f32 %v3248_v1, %v3248_v1  ;;  %v1410_v21 = vmul.f32 0.001953125, %v1409_v47  ;;  %v3255_v3 = vrot.slane %v955_v13, %v3618_v60 }
 0x2da   :  { %v1257_v48 = vmul.f32 0.001953125, %v1256_v37  ;;  %v1559_v24 = vrot.slane %v1558_v29, 2 }
 0x2db   :  { %v3258_v15 = vsub.f32 %v2996_v36, %v1410_v21  ;;  %v3261_v26 = vsub.f32 %v3010_v39, %v1410_v21  ;;  %v1708_v40 = vpop.xlane.xlu1 %1707  ;;  %v3265_v11 = vrot.slane %v3255_v3, %v3618_v60  ;;  %v1111_v45 = vcombine.low %v1107_v62, %v1108_v33 }
 0x2dc   :  { %v3268_v10 = vsub.f32 %v2953_v17, %v1257_v48  ;;  %v3271_v18 = vsub.f32 %v2960_v14, %v1257_v48  ;;  %v1560_v7 = vadd.f32 %v1559_v24, %v1558_v29  ;;  %v1709_v25 = vsel %vm935_vm11, %v1708_v40, 0.0 }
 0x2dd   :  { %v1710_v36 = vrot.slane %v1709_v25, 4  ;;  %979 = vrot.lane.b32.xlu0 %v3265_v11, %s2306_s25  ;;  %v3277_v39 = vrot.slane %v1111_v45, %v3618_v60  ;;  %v1413_v27 = vmul.f32 %v3258_v15, %v3258_v15  ;;  %v1414_v17 = vmul.f32 %v3261_v26, %v3261_v26 }
 0x2de   :  { %v1260_v14 = vmul.f32 %v3268_v10, %v3268_v10  ;;  %v1261_v61 = vmul.f32 %v3271_v18, %v3271_v18  ;;  %v1561_v54 = vrot.slane %v1560_v7, 1 }
 0x2df   :  { %v1711_v59 = vadd.f32 %v1710_v36, %v1709_v25  ;;  %v3289_v31 = vrot.slane %v3277_v39, %v3618_v60  ;;  %v1417_v32 = vcombine.low %v1413_v27, %v1414_v17 }
 0x2e0   :  { %v1562_v34 = vadd.f32 %v1561_v54, %v1560_v7  ;;  %v1264_v9 = vcombine.low %v1260_v14, %v1261_v61 }
 0x2e1   :  { %v1712_v53 = vrot.slane %v1711_v59, 2  ;;  %1135 = vrot.lane.b32.xlu0 %v3289_v31, %s2306_s25  ;;  %v3294_v23 = vrot.slane %v1417_v32, %v3618_v60 }
 0x2e2   :  { %v1563_v56 = vmul.f32 0.001953125, %v1562_v34  ;;  %v1271_v50 = vrot.slane %v1264_v9, %v3618_v60 }
 0x2e3   :  { %v1713_v2 = vadd.f32 %v1712_v53, %v1711_v59  ;;  %v1861_v63 = vpop.xlane.xlu0 %1860  ;;  %v1432_v4 = vrot.slane %v3294_v23, %v3618_v60 }
 0x2e4   :  { %v3300_v43 = vsub.f32 %v3100_v6, %v1563_v56  ;;  %v3303_v57 = vsub.f32 %v3102_v0, %v1563_v56  ;;  %v1862_v19 = vsel %vm935_vm11, %v1861_v63, 0.0  ;;  %v3307_v38 = vrot.slane %v1271_v50, %v3618_v60 }
 0x2e5   :  { %v1714_v55 = vrot.slane %v1713_v2, 1  ;;  %v1863_v16 = vrot.slane %v1862_v19, 4  ;;  %1441 = vrot.lane.b32.xlu1 %v1432_v4, %s2306_s25  ;;  %v1272_v48 = vcombine.high %v1271_v50, %v1271_v50  ;;  %v1440_v34 = vcombine.high %v1432_v4, %v1432_v4 }
 0x2e6   :  { %v1566_v8 = vmul.f32 %v3300_v43, %v3300_v43  ;;  %v1567_v5 = vmul.f32 %v3303_v57, %v3303_v57  ;;  %1288 = vrot.lane.b32.xlu0 %v3307_v38, %s2306_s25 }
 0x2e7   :  { %v1715_v6 = vadd.f32 %v1714_v55, %v1713_v2  ;;  %v1864_v0 = vadd.f32 %v1863_v16, %v1862_v19  ;;  %v2014_v22 = vpop.xlane.xlu1 %2013 }
 0x2e8   :  { %v2015_v30 = vsel %vm935_vm11, %v2014_v22, 0.0  ;;  %v1570_v52 = vcombine.low %v1566_v8, %v1567_v5 }
 0x2e9   :  { %v1716_v20 = vmul.f32 0.001953125, %v1715_v6  ;;  %v1865_v12 = vrot.slane %v1864_v0, 2  ;;  %v2016_v47 = vrot.slane %v2015_v30, 4  ;;  %v963_v6 = vcombine.high %v3255_v3, %v3255_v3 }
 0x2ea   :  { %v1577_v13 = vrot.slane %v1570_v52, %v3618_v60  ;;  %v1119_v3 = vcombine.high %v3277_v39, %v3277_v39 }
 0x2eb   :  { %v3319_v37 = vsub.f32 %v3130_v44, %v1716_v20  ;;  %v3322_v29 = vsub.f32 %v3132_v42, %v1716_v20  ;;  %v1866_v62 = vadd.f32 %v1865_v12, %v1864_v0  ;;  %v2017_v33 = vadd.f32 %v2016_v47, %v2015_v30 }
 0x2ec   :  { %v1585_v21 = vrot.slane %v1577_v13, %v3618_v60  ;;  %v1286_v42 = vrot.slane %v1272_v48, %v3618_v60  ;;  %v1578_v9 = vcombine.high %v1577_v13, %v1577_v13  ;;  %v977_v30 = vrot.slane %v963_v6, %v3618_v60 }
 0x2ed   :  { %v1719_v24 = vmul.f32 %v3319_v37, %v3319_v37  ;;  %v1720_v40 = vmul.f32 %v3322_v29, %v3322_v29  ;;  %v1867_v45 = vrot.slane %v1866_v62, 1  ;;  %v2018_v7 = vrot.slane %v2017_v33, 2 }
 0x2ee   :  { %1594 = vrot.lane.b32.xlu1 %v1585_v21, %s2306_s25  ;;  %v1592_v63 = vrot.slane %v1578_v9, %v3618_v60  ;;  %v1593_v8 = vcombine.high %v1585_v21, %v1585_v21  ;;  %v978_v20 = vcombine.high %v3265_v11, %v3265_v11  ;;  %v1133_v12 = vrot.slane %v1119_v3, %v3618_v60 }
 0x2ef   :  { %v1868_v44 = vadd.f32 %v1867_v45, %v1866_v62  ;;  %v2019_v25 = vadd.f32 %v2018_v7, %v2017_v33  ;;  %v1723_v36 = vcombine.low %v1719_v24, %v1720_v40  ;;  %v1134_v47 = vcombine.high %v3289_v31, %v3289_v31 }
 0x2f0   :  { %v1425_v13 = vcombine.high %v3294_v23, %v3294_v23  ;;  %v1287_v11 = vcombine.high %v3307_v38, %v3307_v38 }
 0x2f1   :  { %v1869_v27 = vmul.f32 0.001953125, %v1868_v44  ;;  %v2020_v17 = vrot.slane %v2019_v25, 1  ;;  %v1730_v14 = vrot.slane %v1723_v36, %v3618_v60 }
 0x2f2   :  { %1290 = vrot.lane.b32.xlu1 %v1286_v42, %s2306_s25  ;;  %v1439_v39 = vrot.slane %v1425_v13, %v3618_v60 }
 0x2f3   :  { %v3334_v61 = vsub.f32 %v3038_v51, %v1869_v27  ;;  %v3337_v54 = vsub.f32 %v3058_v46, %v1869_v27  ;;  %v2021_v59 = vadd.f32 %v2020_v17, %v2019_v25  ;;  %v1738_v32 = vrot.slane %v1730_v14, %v3618_v60 }
 0x2f4   :  { %v1731_v62 = vcombine.high %v1730_v14, %v1730_v14 }
 0x2f5   :  { %v1872_v53 = vmul.f32 %v3334_v61, %v3334_v61  ;;  %v1873_v56 = vmul.f32 %v3337_v54, %v3337_v54  ;;  %v2022_v50 = vmul.f32 0.001953125, %v2021_v59  ;;  %1747 = vrot.lane.b32.xlu0 %v1738_v32, %s2306_s25  ;;  %v1746_v0 = vcombine.high %v1738_v32, %v1738_v32 }
 0x2f6   :  { %1445 = vrot.lane.b32.xlu1 %v1440_v34, %s2306_s25  ;;  %v1745_v33 = vrot.slane %v1731_v62, %v3618_v60 }
 0x2f7   :  { %v3347_v51 = vsub.f32 %v3148_v35, %v2022_v50  ;;  %v3350_v46 = vsub.f32 %v3150_v28, %v2022_v50  ;;  %v1876_v2 = vcombine.low %v1872_v53, %v1873_v56 }
 0x2f9   :  { %v2025_v4 = vmul.f32 %v3347_v51, %v3347_v51  ;;  %v2026_v19 = vmul.f32 %v3350_v46, %v3350_v46  ;;  %v1883_v55 = vrot.slane %v1876_v2, %v3618_v60 }
 0x2fa   :  { %1596 = vrot.lane.b32.xlu1 %v1592_v63, %s2306_s25 }
 0x2fb   :  { %v1891_v16 = vrot.slane %v1883_v55, %v3618_v60  ;;  %v2029_v35 = vcombine.low %v2025_v4, %v2026_v19  ;;  %v1884_v21 = vcombine.high %v1883_v55, %v1883_v55 }
 0x2fd   :  { %1900 = vrot.lane.b32.xlu0 %v1891_v16, %s2306_s25  ;;  %v2036_v28 = vrot.slane %v2029_v35, %v3618_v60  ;;  %v1898_v31 = vrot.slane %v1884_v21, %v3618_v60  ;;  %v1899_v23 = vcombine.high %v1891_v16, %v1891_v16 }
 0x2fe   :  { %1598 = vrot.lane.b32.xlu1 %v1593_v8, %s2306_s25 }
 0x2ff   :  { %v2044_v5 = vrot.slane %v2036_v28, %v3618_v60  ;;  %v2037_v22 = vcombine.high %v2036_v28, %v2036_v28 }
 0x301   :  { %2053 = vrot.lane.b32.xlu0 %v2044_v5, %s2306_s25  ;;  %v2051_v52 = vrot.slane %v2037_v22, %v3618_v60  ;;  %v2052_v38 = vcombine.high %v2044_v5, %v2044_v5 }
 0x302   :  { %1751 = vrot.lane.b32.xlu1 %v1746_v0, %s2306_s25 }
 0x305   :  { %981 = vrot.lane.b32.xlu0 %v977_v30, %s2306_s25 }
 0x306   :  { %2055 = vrot.lane.b32.xlu1 %v2051_v52, %s2306_s25 }
 0x309   :  { %983 = vrot.lane.b32.xlu0 %v978_v20, %s2306_s25 }
 0x30d   :  { %1137 = vrot.lane.b32.xlu0 %v1133_v12, %s2306_s25 }
 0x311   :  { %1139 = vrot.lane.b32.xlu0 %v1134_v47, %s2306_s25 }
 0x315   :  { %1292 = vrot.lane.b32.xlu0 %v1287_v11, %s2306_s25 }
 0x319   :  { %1443 = vrot.lane.b32.xlu0 %v1439_v39, %s2306_s25 }
 0x31d   :  { %1749 = vrot.lane.b32.xlu0 %v1745_v33, %s2306_s25 }
 0x321   :  { %1902 = vrot.lane.b32.xlu0 %v1898_v31, %s2306_s25 }
 0x325   :  { %1904 = vrot.lane.b32.xlu0 %v1899_v23, %s2306_s25 }
 0x329   :  { %2057 = vrot.lane.b32.xlu0 %v2052_v38, %s2306_s25 }
 0x34f   :  { %v980_v48 = vpop.permute.xlu0 %979 }
 0x353   :  { %v1136_v24 = vpop.permute.xlu0 %1135 }
 0x357   :  { %v1442_v45 = vpop.permute.xlu1 %1441 }
 0x358   :  { %v1289_v40 = vpop.permute.xlu0 %1288 }
 0x360   :  { %v1595_v44 = vpop.permute.xlu1 %1594 }
 0x364   :  { %v1291_v36 = vpop.permute.xlu1 %1290 }
 0x365   :  { %v1294_v16 = vsel %vm930_vm10, %v1289_v40, %v1291_v36 }
 0x366   :  { %v1298_v6 = vsel %vm935_vm11, %v1294_v16, 0.0 }
 0x367   :  { %v1748_v7 = vpop.permute.xlu0 %1747 }
 0x368   :  { %v1446_v17 = vpop.permute.xlu1 %1445 }
 0x36c   :  { %v1597_v53 = vpop.permute.xlu1 %1596 }
 0x36d   :  { %v1600_v22 = vsel %vm930_vm10, %v1595_v44, %v1597_v53 }
 0x36e   :  { %v1604_v47 = vsel %vm935_vm11, %v1600_v22, 0.0 }
 0x36f   :  { %v1901_v25 = vpop.permute.xlu0 %1900 }
 0x370   :  { %v1599_v4 = vpop.permute.xlu1 %1598 }
 0x371   :  { %v1601_v28 = vsel %vm930_vm10, %v1597_v53, %v1599_v4 }
 0x372   :  { %v1605_v52 = vsel %vm935_vm11, %v1601_v28, 0.0 }
 0x373   :  { %v2054_v42 = vpop.permute.xlu0 %2053  ;;  %v1606_v39 = vadd.f32 %v1605_v52, %v1604_v47 }
 0x374   :  { %v1752_v33 = vpop.permute.xlu1 %1751 }
 0x377   :  { %v982_v27 = vpop.permute.xlu0 %981 }
 0x378   :  { %v985_v60 = vsel %vm930_vm10, %v980_v48, %v982_v27  ;;  %v2056_v44 = vpop.permute.xlu1 %2055 }
 0x379   :  { %v989_v32 = vsel %vm935_vm11, %v985_v60, 0.0  ;;  %v2059_v60 = vsel %vm930_vm10, %v2054_v42, %v2056_v44 }
 0x37b   :  { %v984_v14 = vpop.permute.xlu0 %983 }
 0x37c   :  { %v986_v59 = vsel %vm930_vm10, %v982_v27, %v984_v14 }
 0x37d   :  { %v990_v34 = vsel %vm935_vm11, %v986_v59, 0.0 }
 0x37e   :  { %v991_v9 = vadd.f32 %v990_v34, %v989_v32  ;;  %v2063_v34 = vsel %vm935_vm11, %v2059_v60, 0.0 }
 0x37f   :  { %v1138_v56 = vpop.permute.xlu0 %1137 }
 0x380   :  { %992 = vadd.xlane.f32.xlu0 %v991_v9  ;;  %v1141_v50 = vsel %vm930_vm10, %v1136_v24, %v1138_v56 }
 0x381   :  { %v1145_v19 = vsel %vm935_vm11, %v1141_v50, 0.0 }
 0x383   :  { %v1140_v2 = vpop.permute.xlu0 %1139 }
 0x384   :  { %v1142_v63 = vsel %vm930_vm10, %v1138_v56, %v1140_v2 }
 0x385   :  { %v1146_v55 = vsel %vm935_vm11, %v1142_v63, 0.0 }
 0x386   :  { %v1147_v35 = vadd.f32 %v1146_v55, %v1145_v19 }
 0x387   :  { %v1293_v8 = vpop.permute.xlu0 %1292 }
 0x388   :  { %v1295_v5 = vsel %vm930_vm10, %v1291_v36, %v1293_v8  ;;  %1148 = vadd.xlane.f32.xlu0 %v1147_v35 }
 0x389   :  { %v1299_v0 = vsel %vm935_vm11, %v1295_v5, 0.0 }
 0x38a   :  { %v1300_v30 = vadd.f32 %v1299_v0, %v1298_v6 }
 0x38b   :  { %v1444_v20 = vpop.permute.xlu0 %1443 }
 0x38c   :  { %v1447_v3 = vsel %vm930_vm10, %v1442_v45, %v1444_v20  ;;  %v1448_v12 = vsel %vm930_vm10, %v1444_v20, %v1446_v17  ;;  %1301 = vadd.xlane.f32.xlu1 %v1300_v30 }
 0x38d   :  { %v1451_v13 = vsel %vm935_vm11, %v1447_v3, 0.0  ;;  %v1452_v11 = vsel %vm935_vm11, %v1448_v12, 0.0 }
 0x38e   :  { %v1453_v62 = vadd.f32 %v1452_v11, %v1451_v13 }
 0x38f   :  { %v1750_v21 = vpop.permute.xlu0 %1749 }
 0x390   :  { %v1753_v31 = vsel %vm930_vm10, %v1748_v7, %v1750_v21  ;;  %v1754_v23 = vsel %vm930_vm10, %v1750_v21, %v1752_v33  ;;  %1454 = vadd.xlane.f32.xlu0 %v1453_v62  ;;  %1607 = vadd.xlane.f32.xlu1 %v1606_v39 }
 0x391   :  { %v1757_v38 = vsel %vm935_vm11, %v1753_v31, 0.0  ;;  %v1758_v48 = vsel %vm935_vm11, %v1754_v23, 0.0 }
 0x392   :  { %v1759_v24 = vadd.f32 %v1758_v48, %v1757_v38 }
 0x393   :  { %v1903_v40 = vpop.permute.xlu0 %1902 }
 0x394   :  { %1760 = vadd.xlane.f32.xlu0 %v1759_v24  ;;  %v1906_v45 = vsel %vm930_vm10, %v1901_v25, %v1903_v40 }
 0x395   :  { %v1910_v17 = vsel %vm935_vm11, %v1906_v45, 0.0 }
 0x397   :  { %v1905_v36 = vpop.permute.xlu0 %1904 }
 0x398   :  { %v1907_v27 = vsel %vm930_vm10, %v1903_v40, %v1905_v36 }
 0x399   :  { %v1911_v7 = vsel %vm935_vm11, %v1907_v27, 0.0 }
 0x39a   :  { %v1912_v14 = vadd.f32 %v1911_v7, %v1910_v17 }
 0x39b   :  { %v2058_v59 = vpop.permute.xlu0 %2057 }
 0x39c   :  { %v2060_v32 = vsel %vm930_vm10, %v2056_v44, %v2058_v59  ;;  %1913 = vadd.xlane.f32.xlu1 %v1912_v14 }
 0x39d   :  { %v2064_v9 = vsel %vm935_vm11, %v2060_v32, 0.0 }
 0x39e   :  { %v2065_v25 = vadd.f32 %v2064_v9, %v2063_v34 }
 0x3a0   :  { %2066 = vadd.xlane.f32.xlu0 %v2065_v25 }
 0x409   :  { %v993_v53 = vpop.xlane.xlu0 %992 }
 0x40a   :  { %v994_v56 = vsel %vm935_vm11, %v993_v53, 0.0 }
 0x40b   :  { %v995_v50 = vrot.slane %v994_v56, 4 }
 0x40d   :  { %v996_v2 = vadd.f32 %v995_v50, %v994_v56 }
 0x40f   :  { %v997_v63 = vrot.slane %v996_v2, 2 }
 0x411   :  { %v998_v4 = vadd.f32 %v997_v63, %v996_v2  ;;  %v1149_v19 = vpop.xlane.xlu0 %1148 }
 0x412   :  { %v1150_v42 = vsel %vm935_vm11, %v1149_v19, 0.0  ;;  %v1005_v19 = vstv %s3433_s2 }
 0x413   :  { %v999_v55 = vrot.slane %v998_v4, 1  ;;  %v1151_v16 = vrot.slane %v1150_v42, 4 }
 0x415   :  { %v1000_v35 = vadd.f32 %v999_v55, %v998_v4  ;;  %v1152_v8 = vadd.f32 %v1151_v16, %v1150_v42  ;;  %v1302_v28 = vpop.xlane.xlu1 %1301 }
 0x416   :  { %v1303_v5 = vsel %vm935_vm11, %v1302_v28, 0.0 }
 0x417   :  { %v1001_v6 = vmul.f32 0.001953125, %v1000_v35  ;;  %v1153_v0 = vrot.slane %v1152_v8, 2  ;;  %v1304_v22 = vrot.slane %v1303_v5, 4 }
 0x419   :  { %v1003_v30 = vadd.f32 1e-05, %v1001_v6  ;;  %v1154_v52 = vadd.f32 %v1153_v0, %v1152_v8  ;;  %v1305_v20 = vadd.f32 %v1304_v22, %v1303_v5  ;;  %v1455_v3 = vpop.xlane.xlu0 %1454  ;;  %v1608_v12 = vpop.xlane.xlu1 %1607 }
 0x41a   :  { %v1456_v47 = vsel %vm935_vm11, %v1455_v3, 0.0  ;;  %v1609_v13 = vsel %vm935_vm11, %v1608_v12, 0.0 }
 0x41b   :  { %2224 = vrsqrt.f32 %v1003_v30  ;;  %v1155_v11 = vrot.slane %v1154_v52, 1  ;;  %v1306_v39 = vrot.slane %v1305_v20, 2  ;;  %v1457_v62 = vrot.slane %v1456_v47, 4 }
 0x41c   :  { %v1610_v33 = vrot.slane %v1609_v13, 4 }
 0x41d   :  { %v1156_v21 = vadd.f32 %v1155_v11, %v1154_v52  ;;  %v1307_v31 = vadd.f32 %v1306_v39, %v1305_v20  ;;  %v1458_v23 = vadd.f32 %v1457_v62, %v1456_v47  ;;  %v1761_v38 = vpop.xlane.xlu0 %1760  ;;  %v1010_v20 = vstv %s3435_s1 }
 0x41e   :  { %v1611_v48 = vadd.f32 %v1610_v33, %v1609_v13  ;;  %v1762_v24 = vsel %vm935_vm11, %v1761_v38, 0.0 }
 0x41f   :  { %v1157_v40 = vmul.f32 0.001953125, %v1156_v21  ;;  %v1308_v45 = vrot.slane %v1307_v31, 1  ;;  %v1459_v44 = vrot.slane %v1458_v23, 2  ;;  %v1763_v36 = vrot.slane %v1762_v24, 4 }
 0x420   :  { %v1612_v27 = vrot.slane %v1611_v48, 2 }
 0x421   :  { %v1159_v17 = vadd.f32 1e-05, %v1157_v40  ;;  %v1309_v7 = vadd.f32 %v1308_v45, %v1307_v31  ;;  %v1460_v60 = vadd.f32 %v1459_v44, %v1458_v23  ;;  %v1764_v14 = vadd.f32 %v1763_v36, %v1762_v24 }
 0x422   :  { %v1613_v59 = vadd.f32 %v1612_v27, %v1611_v48  ;;  %v1161_v23 = vstv %s3439_s27  ;;  %v1166_v45 = vstv %s3441_s28  ;;  %v1314_v44 = vstv %s3445_s29 }
 0x423   :  { %2226 = vrsqrt.f32 %v1159_v17  ;;  %v1310_v32 = vmul.f32 0.001953125, %v1309_v7  ;;  %v1461_v34 = vrot.slane %v1460_v60, 1  ;;  %v1765_v9 = vrot.slane %v1764_v14, 2 }
 0x424   :  { %v1614_v25 = vrot.slane %v1613_v59, 1 }
 0x425   :  { %v1312_v53 = vadd.f32 1e-05, %v1310_v32  ;;  %v1462_v56 = vadd.f32 %v1461_v34, %v1460_v60  ;;  %v1766_v50 = vadd.f32 %v1765_v9, %v1764_v14  ;;  %v1914_v2 = vpop.xlane.xlu1 %1913 }
 0x426   :  { %v1615_v63 = vadd.f32 %v1614_v25, %v1613_v59  ;;  %v1915_v4 = vsel %vm935_vm11, %v1914_v2, 0.0  ;;  %v1467_v25 = vstv %s3452_s6 }
 0x427   :  { %2228 = vrsqrt.f32 %v1312_v53  ;;  %v1463_v42 = vmul.f32 0.001953125, %v1462_v56  ;;  %v1767_v55 = vrot.slane %v1766_v50, 1  ;;  %v1916_v16 = vrot.slane %v1915_v4, 4 }
 0x428   :  { %v2225_v35 = vpop.eup %2224  ;;  %v1616_v8 = vmul.f32 0.001953125, %v1615_v63  ;;  %v1319_v56 = vstv %s3449_s30 }
 0x429   :  { %v1465_v28 = vadd.f32 1e-05, %v1463_v42  ;;  %v1768_v5 = vadd.f32 %v1767_v55, %v1766_v50  ;;  %v1917_v6 = vadd.f32 %v1916_v16, %v1915_v4  ;;  %v2067_v0 = vpop.xlane.xlu0 %2066  ;;  %v1006_v22 = vmul.f32 %v2225_v35, %v1005_v19 }
 0x42a   :  { %v1618_v30 = vadd.f32 1e-05, %v1616_v8  ;;  %v2068_v52 = vsel %vm935_vm11, %v2067_v0, 0.0  ;;  %v1472_v16 = vstv %s3460_s8 }
 0x42b   :  { %2230 = vrsqrt.f32 %v1465_v28  ;;  %v1769_v3 = vmul.f32 0.001953125, %v1768_v5  ;;  %v1918_v12 = vrot.slane %v1917_v6, 2  ;;  %v2069_v47 = vrot.slane %v2068_v52, 4 }
 0x42c   :  { %2232 = vrsqrt.f32 %v1618_v30  ;;  %v1007_v13 = vmul.f32 %v1006_v22, %v3234_v49  ;;  %v1008_v11 = vmul.f32 %v1006_v22, %v3237_v58  ;;  %v1625_v28 = vstv %s3464_s9 }
 0x42d   :  { %v1919_v39 = vadd.f32 %v1918_v12, %v1917_v6  ;;  %v2070_v62 = vadd.f32 %v2069_v47, %v2068_v52  ;;  %v1771_v33 = vadd.f32 1e-05, %v1769_v3  ;;  %v1773_v22 = vstv %s2191_s3 }
 0x42e   :  { %v1011_v21 = vadd.f32 %v1010_v20, %v1007_v13  ;;  %v1012_v31 = vadd.f32 %v1010_v20, %v1008_v11  ;;  %v1931_v47 = vstv %s3479_s10  ;;  %v2079_v13 = vstv %s2207_s11 }
 0x42f   :  { %v1920_v38 = vrot.slane %v1919_v39, 1  ;;  %v2071_v48 = vrot.slane %v2070_v62, 2  ;;  %2234 = vrsqrt.f32 %v1771_v33  ;;  %v1778_v11 = vstv %s2192_s12 }
 0x430   :  { %v2227_v24 = vpop.eup %2226  ;;  %1015 = vrot.lane.b32.xlu1 %v1011_v21, %s2306_s25  ;;  %1017 = vrot.lane.b32.xlu0 %v1012_v31, %s2306_s25 }
 0x431   :  { %v1921_v49 = vadd.f32 %v1920_v38, %v1919_v39  ;;  %v2072_v58 = vadd.f32 %v2071_v48, %v2070_v62  ;;  %v1162_v40 = vmul.f32 %v2227_v24, %v1161_v23  ;;  %v2084_v23 = vstv %s2208_s13 }
 0x433   :  { %v1922_v36 = vmul.f32 0.001953125, %v1921_v49  ;;  %v2073_v27 = vrot.slane %v2072_v58, 1  ;;  %v1163_v17 = vmul.f32 %v1162_v40, %v3245_v41  ;;  %v1164_v7 = vmul.f32 %v1162_v40, %v3248_v1 }
 0x434   :  { %v2229_v60 = vpop.eup %2228  ;;  %v1620_v41 = vstv %s3454_s7  ;;  %v3619_v40 = vlaneseq }
 0x435   :  { %v1924_v14 = vadd.f32 1e-05, %v1922_v36  ;;  %v2074_v59 = vadd.f32 %v2073_v27, %v2072_v58  ;;  %v1167_v32 = vadd.f32 %v1166_v45, %v1163_v17  ;;  %v1168_v34 = vadd.f32 %v1166_v45, %v1164_v7 }
 0x436   :  { %v1315_v9 = vmul.f32 %v2229_v60, %v1314_v44  ;;  %vm3501_vm12 = vcmp.lt.s32.totalorder %v3619_v40, 256 }
 0x437   :  { %2236 = vrsqrt.f32 %v1924_v14  ;;  %v2075_v53 = vmul.f32 0.001953125, %v2074_v59  ;;  %1171 = vrot.lane.b32.xlu1 %v1167_v32, %s2306_s25  ;;  %1173 = vrot.lane.b32.xlu0 %v1168_v34, %s2306_s25 }
 0x438   :  { %v2231_v1 = vpop.eup %2230  ;;  %v1317_v50 = vmul.f32 %v1315_v9, %v3271_v18  ;;  %v1316_v2 = vmul.f32 %v1315_v9, %v3268_v10 }
 0x439   :  { %v2233_v63 = vpop.eup %2232  ;;  %v2077_v4 = vadd.f32 1e-05, %v2075_v53  ;;  %v1468_v19 = vmul.f32 %v2231_v1, %v1467_v25 }
 0x43a   :  { %v1321_v42 = vadd.f32 %v1319_v56, %v1317_v50  ;;  %v1320_v55 = vadd.f32 %v1319_v56, %v1316_v2  ;;  %v1621_v35 = vmul.f32 %v2233_v63, %v1620_v41 }
 0x43b   :  { %2238 = vrsqrt.f32 %v2077_v4  ;;  %v1469_v8 = vmul.f32 %v1468_v19, %v3258_v15  ;;  %v1470_v6 = vmul.f32 %v1468_v19, %v3261_v26 }
 0x43c   :  { %1326 = vrot.lane.b32.xlu1 %v1321_v42, %s2306_s25  ;;  %1324 = vrot.lane.b32.xlu0 %v1320_v55, %s2306_s25  ;;  %v1622_v18 = vmul.f32 %v1621_v35, %v3300_v43  ;;  %v2235_v0 = vpop.eup %2234  ;;  %v1623_v30 = vmul.f32 %v1621_v35, %v3303_v57  ;;  %v1926_v43 = vstv %s2199_s4 }
 0x43d   :  { %v1473_v5 = vadd.f32 %v1472_v16, %v1469_v8  ;;  %v1474_v15 = vadd.f32 %v1472_v16, %v1470_v6  ;;  %v1774_v52 = vmul.f32 %v2235_v0, %v1773_v22 }
 0x43e   :  { %v1626_v10 = vadd.f32 %v1625_v28, %v1622_v18  ;;  %v1627_v26 = vadd.f32 %v1625_v28, %v1623_v30 }
 0x43f   :  { %v1775_v12 = vmul.f32 %v1774_v52, %v3319_v37  ;;  %v1776_v31 = vmul.f32 %v1774_v52, %v3322_v29 }
 0x440   :  { %1477 = vrot.lane.b32.xlu1 %v1473_v5, %s2306_s25  ;;  %1630 = vrot.lane.b32.xlu0 %v1626_v10, %s2306_s25 }
 0x441   :  { %v1779_v21 = vadd.f32 %v1778_v11, %v1775_v12  ;;  %v1780_v24 = vadd.f32 %v1778_v11, %v1776_v31 }
 0x444   :  { %v2237_v20 = vpop.eup %2236  ;;  %1479 = vrot.lane.b32.xlu1 %v1474_v15, %s2306_s25 }
 0x445   :  { %v1927_v3 = vmul.f32 %v2237_v20, %v1926_v43 }
 0x447   :  { %v1928_v39 = vmul.f32 %v1927_v3, %v3334_v61  ;;  %v1929_v61 = vmul.f32 %v1927_v3, %v3337_v54 }
 0x448   :  { %v2239_v62 = vpop.eup %2238  ;;  %1632 = vrot.lane.b32.xlu1 %v1627_v26, %s2306_s25 }
 0x449   :  { %v1932_v33 = vadd.f32 %v1931_v47, %v1928_v39  ;;  %v2080_v57 = vmul.f32 %v2239_v62, %v2079_v13  ;;  %v1933_v58 = vadd.f32 %v1931_v47, %v1929_v61 }
 0x44b   :  { %1936 = vrot.lane.b32.xlu0 %v1932_v33, %s2306_s25  ;;  %v2081_v38 = vmul.f32 %v2080_v57, %v3347_v51  ;;  %v2082_v48 = vmul.f32 %v2080_v57, %v3350_v46 }
 0x44c   :  { %1783 = vrot.lane.b32.xlu1 %v1779_v21, %s2306_s25 }
 0x44d   :  { %v2085_v37 = vadd.f32 %v2084_v23, %v2081_v38  ;;  %v2086_v49 = vadd.f32 %v2084_v23, %v2082_v48 }
 0x44f   :  { %2089 = vrot.lane.b32.xlu0 %v2085_v37, %s2306_s25 }
 0x450   :  { %1785 = vrot.lane.b32.xlu1 %v1780_v24, %s2306_s25 }
 0x453   :  { %2091 = vrot.lane.b32.xlu0 %v2086_v49, %s2306_s25 }
 0x454   :  { %1938 = vrot.lane.b32.xlu1 %v1933_v58, %s2306_s25 }
 0x4a2   :  { %v1018_v29 = vpop.permute.xlu0 %1017  ;;  %v1016_v51 = vpop.permute.xlu1 %1015 }
 0x4a3   :  { %v1020_v46 = vrot.slane %v1018_v29, 1  ;;  %v1019_v44 = vrot.slane %v1016_v51, 1 }
 0x4a5   :  { %v1022_v54 = vsel %vm930_vm10, %v1018_v29, %v1020_v46  ;;  %v1021_v36 = vsel %vm930_vm10, %v1016_v51, %v1019_v44 }
 0x4a6   :  { %2154 = vst.msk [vmem:[%s3606_s5 + $0x10] ss:$8 sm:$0x3] %vm3501_vm12, %v1022_v54  ;;  %1029 = vst.msk [vmem:[%s3606_s5] ss:$8 sm:$0x3] %vm3501_vm12, %v1021_v36 }
 0x4a9   :  { %v1174_v27 = vpop.permute.xlu0 %1173  ;;  %v1172_v17 = vpop.permute.xlu1 %1171 }
 0x4aa   :  { %v1176_v7 = vrot.slane %v1174_v27, 1  ;;  %v1175_v60 = vrot.slane %v1172_v17, 1 }
 0x4ac   :  { %v1178_v14 = vsel %vm930_vm10, %v1174_v27, %v1176_v7  ;;  %v1177_v59 = vsel %vm930_vm10, %v1172_v17, %v1175_v60 }
 0x4ad   :  { %2162 = vst.msk [vmem:[%s3606_s5 + $0x11] ss:$8 sm:$0x3] %vm3501_vm12, %v1178_v14  ;;  %2161 = vst.msk [vmem:[%s3606_s5 + $0x1] ss:$8 sm:$0x3] %vm3501_vm12, %v1177_v59 }
 0x4ae   :  { %v1325_v32 = vpop.permute.xlu0 %1324  ;;  %v1327_v34 = vpop.permute.xlu1 %1326 }
 0x4af   :  { %v1328_v9 = vrot.slane %v1325_v32, 1  ;;  %v1329_v25 = vrot.slane %v1327_v34, 1 }
 0x4b1   :  { %v1330_v53 = vsel %vm930_vm10, %v1325_v32, %v1328_v9  ;;  %v1331_v56 = vsel %vm930_vm10, %v1327_v34, %v1329_v25 }
 0x4b2   :  { %2169 = vst.msk [vmem:[%s3606_s5 + $0x2] ss:$8 sm:$0x3] %vm3501_vm12, %v1330_v53  ;;  %2170 = vst.msk [vmem:[%s3606_s5 + $0x12] ss:$8 sm:$0x3] %vm3501_vm12, %v1331_v56  ;;  %v1631_v41 = vpop.permute.xlu0 %1630  ;;  %v1478_v1 = vpop.permute.xlu1 %1477 }
 0x4b3   :  { %v1634_v50 = vrot.slane %v1631_v41, 1  ;;  %v1481_v2 = vrot.slane %v1478_v1, 1 }
 0x4b5   :  { %v1636_v63 = vsel %vm930_vm10, %v1631_v41, %v1634_v50  ;;  %v1483_v4 = vsel %vm930_vm10, %v1478_v1, %v1481_v2 }
 0x4b6   :  { %2185 = vst.msk [vmem:[%s3606_s5 + $0x4] ss:$8 sm:$0x3] %vm3501_vm12, %v1636_v63  ;;  %2177 = vst.msk [vmem:[%s3606_s5 + $0x3] ss:$8 sm:$0x3] %vm3501_vm12, %v1483_v4  ;;  %v1480_v19 = vpop.permute.xlu1 %1479 }
 0x4b7   :  { %v1482_v42 = vrot.slane %v1480_v19, 1 }
 0x4b9   :  { %v1484_v55 = vsel %vm930_vm10, %v1480_v19, %v1482_v42 }
 0x4ba   :  { %2178 = vst.msk [vmem:[%s3606_s5 + $0x13] ss:$8 sm:$0x3] %vm3501_vm12, %v1484_v55  ;;  %v1633_v16 = vpop.permute.xlu1 %1632 }
 0x4bb   :  { %v1635_v35 = vrot.slane %v1633_v16, 1 }
 0x4bd   :  { %v1637_v8 = vsel %vm930_vm10, %v1633_v16, %v1635_v35  ;;  %v1937_v28 = vpop.permute.xlu0 %1936 }
 0x4be   :  { %2186 = vst.msk [vmem:[%s3606_s5 + $0x14] ss:$8 sm:$0x3] %vm3501_vm12, %v1637_v8  ;;  %v1940_v18 = vrot.slane %v1937_v28, 1  ;;  %v1784_v5 = vpop.permute.xlu1 %1783 }
 0x4bf   :  { %v1787_v10 = vrot.slane %v1784_v5, 1 }
 0x4c0   :  { %v1942_v6 = vsel %vm930_vm10, %v1937_v28, %v1940_v18 }
 0x4c1   :  { %2201 = vst.msk [vmem:[%s3606_s5 + $0x6] ss:$8 sm:$0x3] %vm3501_vm12, %v1942_v6  ;;  %v1789_v0 = vsel %vm930_vm10, %v1784_v5, %v1787_v10  ;;  %v2090_v22 = vpop.permute.xlu0 %2089 }
 0x4c2   :  { %2193 = vst.msk [vmem:[%s3606_s5 + $0x5] ss:$8 sm:$0x3] %vm3501_vm12, %v1789_v0  ;;  %v2093_v15 = vrot.slane %v2090_v22, 1  ;;  %v1786_v30 = vpop.permute.xlu1 %1785 }
 0x4c3   :  { %v1788_v52 = vrot.slane %v1786_v30, 1 }
 0x4c4   :  { %v2095_v43 = vsel %vm930_vm10, %v2090_v22, %v2093_v15 }
 0x4c5   :  { %2209 = vst.msk [vmem:[%s3606_s5 + $0x7] ss:$8 sm:$0x3] %vm3501_vm12, %v2095_v43  ;;  %v1790_v20 = vsel %vm930_vm10, %v1786_v30, %v1788_v52  ;;  %v2092_v3 = vpop.permute.xlu0 %2091 }
 0x4c6   :  { %2194 = vst.msk [vmem:[%s3606_s5 + $0x15] ss:$8 sm:$0x3] %vm3501_vm12, %v1790_v20  ;;  %v2094_v26 = vrot.slane %v2092_v3, 1  ;;  %v1939_v12 = vpop.permute.xlu1 %1938 }
 0x4c7   :  { %v1941_v47 = vrot.slane %v1939_v12, 1 }
 0x4c8   :  { %v2096_v13 = vsel %vm930_vm10, %v2092_v3, %v2094_v26 }
 0x4c9   :  { %2210 = vst.msk [vmem:[%s3606_s5 + $0x17] ss:$8 sm:$0x3] %vm3501_vm12, %v2096_v13  ;;  %v1943_v11 = vsel %vm930_vm10, %v1939_v12, %v1941_v47 }
 0x4ca   :  { %2202 = vst.msk [vmem:[%s3606_s5 + $0x16] ss:$8 sm:$0x3] %vm3501_vm12, %v1943_v11 }
 0x4cb   :  { %2109 = vsyncpa [#allocation4], 1 }
 0x4cc   :  { %2110 = vsyncpa [#allocation6], 1 }
 0x4cd   :  { %2111 = vsyncpa [#allocation9], 1 }

</bundles_post_ra>
